<compile_context>
chip_gen: v7x
topology: tpu7x:2x2x1
jax: 0.10.0
libtpu: 0.0.40
codegen_flags: <defaults>
</compile_context>

<pallas_src>
import functools

import jax
import jax.numpy as jnp
import numpy as np
from jax.experimental import pallas as pl
from jax.experimental.pallas import tpu as pltpu


# --------------------------------------------------------------------------- #
# In-kernel helpers (operate on loaded values / refs)                          #
# --------------------------------------------------------------------------- #
def _mac_cols(w, col0, x, acc):
    """acc += w[:, col0:col0+K] @ x via VPU broadcast-MAC.

    w: (Cout, >=col0+K) loaded weight value, x: (K, HW), acc: (Cout, HW) f32.
    """
    K = x.shape[0]
    for c in range(K):
        acc = acc + w[:, col0 + c:col0 + c + 1] * x[c:c + 1, :]
    return acc


def _conv_same(scr_ref, cin, w, b, col_masks, k, img_w, halo, hw):
    """kxk 'same' conv over the data staged at scr_ref[:cin, halo:halo+hw].

    w:         (Cout, k*k*cin)   column index = (dh*k + dw)*cin + ci
    b:         (Cout, 1)
    col_masks: (k, hw)           1.0 where column offset dw stays inside the row
    Top/bottom out-of-image taps read the zeroed halo bands (contribute 0);
    left/right out-of-image taps are zeroed by one column-mask multiply per dw
    group on the (Cout, hw) partial sum.  Returns (Cout, hw) f32.
    """
    cout = w.shape[0]
    pad = k // 2
    acc = jnp.zeros((cout, hw), jnp.float32) + b          # bias broadcast over lanes
    for dw in range(k):
        col = jnp.zeros((cout, hw), jnp.float32)
        for dh in range(k):
            off = (dh - pad) * img_w + (dw - pad)
            tap = scr_ref[:cin, halo + off:halo + off + hw]
            col = _mac_cols(w, (dh * k + dw) * cin, tap, col)
        if dw != pad:                                     # center column needs no mask
            col = col * col_masks[dw:dw + 1, :]
        acc = acc + col
    return acc


def _distana_kernel(x_ch, h_ch, lat_in_ch, k_lat, k_comb, img_w, halo,
                    xh_ref, mlat_ref, mcomb_ref, w_lat_ref, b_lat_ref,
                    w_conv_ref, b_conv_ref, w_fc_ref, b_fc_ref,
                    o_ref, scr_ref):
    hw = xh_ref.shape[-1]
    n_rows = scr_ref.shape[0]

    # Halo bands carry the semantic zeros for top/bottom 'same' padding and are
    # never written with image data; re-zero them every step so uninitialized /
    # stale VMEM can never leak in.  Aligned (rows, 128k) stores, trivially cheap.
    scr_ref[:, :halo] = jnp.zeros((n_rows, halo), jnp.float32)
    scr_ref[:, halo + hw:] = jnp.zeros((n_rows, halo), jnp.float32)

    xh = xh_ref[0]                        # (x_ch + h_ch, hw) f32
    x = xh[:x_ch, :]
    h = xh[x_ch:, :]

    lat_ch = w_lat_ref.shape[0]

    # ---- lateral = tanh( conv_{k_lat}(h[:, :lat_in_ch]) ) -------------------
    scr_ref[:lat_in_ch, halo:halo + hw] = h[:lat_in_ch, :]
    lateral = jnp.tanh(
        _conv_same(scr_ref, lat_in_ch, w_lat_ref[...], b_lat_ref[...],
                   mlat_ref[...], k_lat, img_w, halo, hw))

    # ---- convolved = conv_{k_comb}( cat(x, lateral) ) -----------------------
    # The channel concat is realized by staging x / lateral into adjacent
    # scratch rows, matching the conv weight's input-channel order.
    scr_ref[:x_ch, halo:halo + hw] = x
    scr_ref[x_ch:x_ch + lat_ch, halo:halo + hw] = lateral
    convolved = _conv_same(scr_ref, x_ch + lat_ch, w_conv_ref[...],
                           b_conv_ref[...], mcomb_ref[...], k_comb, img_w,
                           halo, hw)

    # ---- out = 1x1 conv over cat(convolved, h) ------------------------------
    # Concat avoided by splitting the 1x1 weight columns.
    w_fc = w_fc_ref[...]
    out = jnp.zeros((w_fc.shape[0], hw), jnp.float32) + b_fc_ref[...]
    out = _mac_cols(w_fc, 0, convolved, out)
    out = _mac_cols(w_fc, h_ch, h, out)
    o_ref[0] = out.astype(o_ref.dtype)


# --------------------------------------------------------------------------- #
# Host-side helpers + wrapper                                                  #
# --------------------------------------------------------------------------- #
def _col_masks(k, H, W):
    """(k, H*W) float32 masks: row dw is 1.0 where column offset (dw - k//2)
    keeps the read inside the same image row."""
    pad = k // 2
    jj = np.arange(W)
    m = np.zeros((k, H * W), np.float32)
    for dw in range(k):
        dx = dw - pad
        ok = ((jj + dx >= 0) & (jj + dx < W)).astype(np.float32)
        m[dw] = np.tile(ok, H)
    return jnp.asarray(m)


def _conv_weight_2d(w):
    """(Cout, Cin, k, k) torch-layout conv weight -> (Cout, k*k*Cin)."""
    cout, cin, kh, kw = w.shape
    return jnp.transpose(w, (0, 2, 3, 1)).reshape(cout, kh * kw * cin)


def distana_tk_forward(xh_nchw, params, *, x_channels, h_channels,
                       lat_channels=None, k_lat=3, k_combined=3):
    """Fused Pallas forward of distana_tk.  xh_nchw: (N, x_ch + h_ch, H, W)."""
    w_lat, b_lat, w_conv, b_conv, w_fc, b_fc = params
    lat_channels = lat_channels or h_channels
    lat_in = min(lat_channels, h_channels)          # PyTorch h[:, :lat_channels]
    assert k_lat % 2 == 1 and k_combined % 2 == 1, "padding='same' with odd k only"
    assert x_channels >= 1 and h_channels >= 1

    N, C, H, W = xh_nchw.shape
    assert C == x_channels + h_channels
    HW = H * W
    out_ch = w_fc.shape[0]

    # channel-major, spatially flattened; reshape only (no transpose / no copy)
    xh = xh_nchw.reshape(N, C, HW).astype(jnp.float32)

    # kernel-friendly parameter layouts
    w_lat_m = _conv_weight_2d(w_lat).astype(jnp.float32)
    w_conv_m = _conv_weight_2d(w_conv).astype(jnp.float32)
    w_fc_m = w_fc.reshape(out_ch, 2 * h_channels).astype(jnp.float32)
    b_lat_m = b_lat.reshape(lat_channels, 1).astype(jnp.float32)
    b_conv_m = b_conv.reshape(h_channels, 1).astype(jnp.float32)
    b_fc_m = b_fc.reshape(out_ch, 1).astype(jnp.float32)

    mask_lat = _col_masks(k_lat, H, W)
    mask_comb = _col_masks(k_combined, H, W)

    # scratch: lane-dense flat slab with a 128-aligned halo on each side.
    # halo must cover the largest |tap offset| = pad*(W+1) so out-of-row taps
    # land in the zeroed bands.
    max_off = max(k_lat // 2, k_combined // 2) * (W + 1)
    halo = max(128, -(-max_off // 128) * 128)
    scr_rows = -(-max(lat_in, x_channels + lat_channels) // 8) * 8

    kern = functools.partial(_distana_kernel, x_channels, h_channels, lat_in,
                             k_lat, k_combined, W, halo)

    flops = 2 * N * HW * (k_lat * k_lat * lat_in * lat_channels
                          + k_combined * k_combined
                          * (x_channels + lat_channels) * h_channels
                          + 2 * h_channels * out_ch)
    bytes_accessed = 4 * (xh.size + N * out_ch * HW + w_lat_m.size
                          + w_conv_m.size + w_fc_m.size + mask_lat.size
                          + mask_comb.size + lat_channels + h_channels + out_ch)

    out = pl.pallas_call(
        kern,
        out_shape=jax.ShapeDtypeStruct((N, out_ch, HW), jnp.float32),
        grid_spec=pltpu.PrefetchScalarGridSpec(
            num_scalar_prefetch=0,
            grid=(N,),
            in_specs=[
                pl.BlockSpec((1, C, HW), lambda n: (n, 0, 0)),
                pl.BlockSpec(mask_lat.shape, lambda n: (0, 0)),
                pl.BlockSpec(mask_comb.shape, lambda n: (0, 0)),
                pl.BlockSpec(w_lat_m.shape, lambda n: (0, 0)),
                pl.BlockSpec(b_lat_m.shape, lambda n: (0, 0)),
                pl.BlockSpec(w_conv_m.shape, lambda n: (0, 0)),
                pl.BlockSpec(b_conv_m.shape, lambda n: (0, 0)),
                pl.BlockSpec(w_fc_m.shape, lambda n: (0, 0)),
                pl.BlockSpec(b_fc_m.shape, lambda n: (0, 0)),
            ],
            out_specs=pl.BlockSpec((1, out_ch, HW), lambda n: (n, 0, 0)),
            scratch_shapes=[pltpu.VMEM((scr_rows, HW + 2 * halo), jnp.float32)],
        ),
        compiler_params=pltpu.CompilerParams(
            dimension_semantics=("parallel",),
            vmem_limit_bytes=32 * 1024 * 1024),
        cost_estimate=pl.CostEstimate(
            flops=int(flops),
            transcendentals=int(N * HW * lat_channels),
            bytes_accessed=int(bytes_accessed)),
    )(xh, mask_lat, mask_comb, w_lat_m, b_lat_m, w_conv_m, b_conv_m,
      w_fc_m, b_fc_m)

    return out.reshape(N, out_ch, H, W)


# --------------------------------------------------------------------------- #
# Independent pure-JAX reference (lax convs, PyTorch semantics)                #
# --------------------------------------------------------------------------- #
def _ref_forward(xh, params, x_ch, h_ch, lat_in, k_lat, k_comb):
    w_lat, b_lat, w_conv, b_conv, w_fc, b_fc = params
    dn = ("NCHW", "OIHW", "NCHW")
    hp = jax.lax.Precision.HIGHEST
    x = xh[:, :x_ch]
    h = xh[:, x_ch:]
    lateral = jnp.tanh(
        jax.lax.conv_general_dilated(h[:, :lat_in], w_lat, (1, 1), "SAME",
                                     dimension_numbers=dn, precision=hp)
        + b_lat.reshape(1, -1, 1, 1))
    x_lat = jnp.concatenate([x, lateral], axis=1)
    convolved = jax.lax.conv_general_dilated(x_lat, w_conv, (1, 1), "SAME",
                                             dimension_numbers=dn, precision=hp)
    convolved = convolved + b_conv.reshape(1, -1, 1, 1)
    combined = jnp.concatenate([convolved, h], axis=1)
    out = jax.lax.conv_general_dilated(combined, w_fc, (1, 1), "VALID",
                                       dimension_numbers=dn, precision=hp)
    return out + b_fc.reshape(1, -1, 1, 1)


if __name__ == "__main__":
    # Small shapes consistent with the module: in_channels=8, h_channels=4
    # (so x_channels=4), lat_channels default (=h_channels), out_channels=8,
    # k_combined = k_lat = 3, batch=2, spatial 16x16.
    N, H, W = 2, 16, 16
    h_ch, x_ch = 4, 4
    in_ch = x_ch + h_ch
    lat_ch = h_ch                      # lat_channels=None -> h_channels
    lat_in = min(lat_ch, h_ch)
    out_ch = 8
    k_lat = k_comb = 3

    key = jax.random.PRNGKey(0)
    ks = jax.random.split(key, 7)
    w_lat = 0.1 * jax.random.normal(ks[0], (lat_ch, lat_in, k_lat, k_lat), jnp.float32)
    b_lat = 0.1 * jax.random.normal(ks[1], (lat_ch,), jnp.float32)
    w_conv = 0.1 * jax.random.normal(ks[2], (h_ch, x_ch + lat_ch, k_comb, k_comb), jnp.float32)
    b_conv = 0.1 * jax.random.normal(ks[3], (h_ch,), jnp.float32)
    w_fc = 0.1 * jax.random.normal(ks[4], (out_ch, 2 * h_ch, 1, 1), jnp.float32)
    b_fc = 0.1 * jax.random.normal(ks[5], (out_ch,), jnp.float32)
    xh = jax.random.normal(ks[6], (N, in_ch, H, W), jnp.float32)
    params = (w_lat, b_lat, w_conv, b_conv, w_fc, b_fc)

    out = distana_tk_forward(xh, params, x_channels=x_ch, h_channels=h_ch,
                             lat_channels=lat_ch, k_lat=k_lat, k_combined=k_comb)
    out = jax.block_until_ready(out)
    assert out.shape == (N, out_ch, H, W), out.shape

    ref = _ref_forward(xh, params, x_ch, h_ch, lat_in, k_lat, k_comb)
    np.testing.assert_allclose(np.asarray(out), np.asarray(ref),
                               rtol=1e-4, atol=1e-4)
    print("KERNEL_OK")
</pallas_src>

<mosaic_0001>
module attributes {stable_mosaic.version = 11 : i64} {
  func.func @_distana_kernel(%arg0: i32, %arg1: memref<1x8x256xf32, #tpu.memory_space<vmem>>, %arg2: memref<3x256xf32, #tpu.memory_space<vmem>>, %arg3: memref<3x256xf32, #tpu.memory_space<vmem>>, %arg4: memref<4x36xf32, #tpu.memory_space<vmem>>, %arg5: memref<4x1xf32, #tpu.memory_space<vmem>>, %arg6: memref<4x72xf32, #tpu.memory_space<vmem>>, %arg7: memref<4x1xf32, #tpu.memory_space<vmem>>, %arg8: memref<8x8xf32, #tpu.memory_space<vmem>>, %arg9: memref<8x1xf32, #tpu.memory_space<vmem>>, %arg10: memref<1x8x256xf32, #tpu.memory_space<vmem>>, %arg11: memref<8x512xf32, #tpu.memory_space<vmem>>) attributes {dimension_semantics = [#tpu.dimension_semantics<parallel>], iteration_bounds = array<i64: 2>, scalar_prefetch = 0 : i64, scratch_operands = 1 : i64, tpu.core_type = #tpu.core_type<tc>, window_params = [{transform_indices = @transform_0, window_bounds = array<i64: 1, 8, 256>}, {pipeline_mode = #tpu.pipeline_mode<synchronous>, transform_indices = @transform_1, window_bounds = array<i64: 3, 256>}, {pipeline_mode = #tpu.pipeline_mode<synchronous>, transform_indices = @transform_2, window_bounds = array<i64: 3, 256>}, {pipeline_mode = #tpu.pipeline_mode<synchronous>, transform_indices = @transform_3, window_bounds = array<i64: 4, 36>}, {pipeline_mode = #tpu.pipeline_mode<synchronous>, transform_indices = @transform_4, window_bounds = array<i64: 4, 1>}, {pipeline_mode = #tpu.pipeline_mode<synchronous>, transform_indices = @transform_5, window_bounds = array<i64: 4, 72>}, {pipeline_mode = #tpu.pipeline_mode<synchronous>, transform_indices = @transform_6, window_bounds = array<i64: 4, 1>}, {pipeline_mode = #tpu.pipeline_mode<synchronous>, transform_indices = @transform_7, window_bounds = array<i64: 8, 8>}, {pipeline_mode = #tpu.pipeline_mode<synchronous>, transform_indices = @transform_8, window_bounds = array<i64: 8, 1>}, {transform_indices = @transform_9, window_bounds = array<i64: 1, 8, 256>}]} {
    %cst = arith.constant 0.000000e+00 : f32
    %0 = vector.broadcast %cst : f32 to vector<8x128xf32>
    %c0 = arith.constant 0 : index
    %c0_0 = arith.constant 0 : index
    %1 = vector.load %arg11[%c0, %c0_0] : memref<8x512xf32, #tpu.memory_space<vmem>>, vector<8x128xf32>
    tpu.vector_store %arg11[%c0, %c0_0], %0 {strides = array<i32>} : memref<8x512xf32, #tpu.memory_space<vmem>>, vector<8x128xf32>,
    %cst_1 = arith.constant 0.000000e+00 : f32
    %2 = vector.broadcast %cst_1 : f32 to vector<8x128xf32>
    %c0_2 = arith.constant 0 : index
    %c384 = arith.constant 384 : index
    %3 = vector.load %arg11[%c0_2, %c384] : memref<8x512xf32, #tpu.memory_space<vmem>>, vector<8x128xf32>
    tpu.vector_store %arg11[%c0_2, %c384], %2 {strides = array<i32>} : memref<8x512xf32, #tpu.memory_space<vmem>>, vector<8x128xf32>,
    %c0_3 = arith.constant 0 : index
    %c0_4 = arith.constant 0 : index
    %c0_5 = arith.constant 0 : index
    %4 = vector.load %arg1[%c0_3, %c0_4, %c0_5] : memref<1x8x256xf32, #tpu.memory_space<vmem>>, vector<1x8x256xf32>
    %5 = vector.shape_cast %4 : vector<1x8x256xf32> to vector<8x256xf32>
    %6 = vector.extract_strided_slice %5 {offsets = [0, 0], sizes = [4, 256], strides = [1, 1]} : vector<8x256xf32> to vector<4x256xf32>
    %7 = vector.extract_strided_slice %5 {offsets = [4, 0], sizes = [4, 256], strides = [1, 1]} : vector<8x256xf32> to vector<4x256xf32>
    %c0_6 = arith.constant 0 : index
    %c128 = arith.constant 128 : index
    %8 = vector.load %arg11[%c0_6, %c128] : memref<8x512xf32, #tpu.memory_space<vmem>>, vector<4x256xf32>
    tpu.vector_store %arg11[%c0_6, %c128], %7 {strides = array<i32>} : memref<8x512xf32, #tpu.memory_space<vmem>>, vector<4x256xf32>,
    %c0_7 = arith.constant 0 : index
    %c0_8 = arith.constant 0 : index
    %9 = vector.load %arg4[%c0_7, %c0_8] : memref<4x36xf32, #tpu.memory_space<vmem>>, vector<4x36xf32>
    %c0_9 = arith.constant 0 : index
    %c0_10 = arith.constant 0 : index
    %10 = vector.load %arg5[%c0_9, %c0_10] : memref<4x1xf32, #tpu.memory_space<vmem>>, vector<4x1xf32>
    %c0_11 = arith.constant 0 : index
    %c0_12 = arith.constant 0 : index
    %11 = vector.load %arg2[%c0_11, %c0_12] : memref<3x256xf32, #tpu.memory_space<vmem>>, vector<3x256xf32>
    %cst_13 = arith.constant 0.000000e+00 : f32
    %12 = vector.broadcast %cst_13 : f32 to vector<4x256xf32>
    %13 = vector.broadcast %10 : vector<4x1xf32> to vector<4x256xf32>
    %14 = arith.addf %12, %13 : vector<4x256xf32>
    %cst_14 = arith.constant 0.000000e+00 : f32
    %15 = vector.broadcast %cst_14 : f32 to vector<4x256xf32>
    %c0_15 = arith.constant 0 : index
    %c111 = arith.constant 111 : index
    %16 = vector.load %arg11[%c0_15, %c111] : memref<8x512xf32, #tpu.memory_space<vmem>>, vector<4x256xf32>
    %17 = vector.extract_strided_slice %9 {offsets = [0, 0], sizes = [4, 1], strides = [1, 1]} : vector<4x36xf32> to vector<4x1xf32>
    %18 = vector.extract_strided_slice %16 {offsets = [0, 0], sizes = [1, 256], strides = [1, 1]} : vector<4x256xf32> to vector<1x256xf32>
    %19 = vector.broadcast %17 : vector<4x1xf32> to vector<4x256xf32>
    %20 = vector.broadcast %18 : vector<1x256xf32> to vector<4x256xf32>
    %21 = arith.mulf %19, %20 : vector<4x256xf32>
    %22 = arith.addf %15, %21 : vector<4x256xf32>
    %23 = vector.extract_strided_slice %9 {offsets = [0, 1], sizes = [4, 1], strides = [1, 1]} : vector<4x36xf32> to vector<4x1xf32>
    %24 = vector.extract_strided_slice %16 {offsets = [1, 0], sizes = [1, 256], strides = [1, 1]} : vector<4x256xf32> to vector<1x256xf32>
    %25 = vector.broadcast %23 : vector<4x1xf32> to vector<4x256xf32>
    %26 = vector.broadcast %24 : vector<1x256xf32> to vector<4x256xf32>
    %27 = arith.mulf %25, %26 : vector<4x256xf32>
    %28 = arith.addf %22, %27 : vector<4x256xf32>
    %29 = vector.extract_strided_slice %9 {offsets = [0, 2], sizes = [4, 1], strides = [1, 1]} : vector<4x36xf32> to vector<4x1xf32>
    %30 = vector.extract_strided_slice %16 {offsets = [2, 0], sizes = [1, 256], strides = [1, 1]} : vector<4x256xf32> to vector<1x256xf32>
    %31 = vector.broadcast %29 : vector<4x1xf32> to vector<4x256xf32>
    %32 = vector.broadcast %30 : vector<1x256xf32> to vector<4x256xf32>
    %33 = arith.mulf %31, %32 : vector<4x256xf32>
    %34 = arith.addf %28, %33 : vector<4x256xf32>
    %35 = vector.extract_strided_slice %9 {offsets = [0, 3], sizes = [4, 1], strides = [1, 1]} : vector<4x36xf32> to vector<4x1xf32>
    %36 = vector.extract_strided_slice %16 {offsets = [3, 0], sizes = [1, 256], strides = [1, 1]} : vector<4x256xf32> to vector<1x256xf32>
    %37 = vector.broadcast %35 : vector<4x1xf32> to vector<4x256xf32>
    %38 = vector.broadcast %36 : vector<1x256xf32> to vector<4x256xf32>
    %39 = arith.mulf %37, %38 : vector<4x256xf32>
    %40 = arith.addf %34, %39 : vector<4x256xf32>
    %c0_16 = arith.constant 0 : index
    %c127 = arith.constant 127 : index
    %41 = vector.load %arg11[%c0_16, %c127] : memref<8x512xf32, #tpu.memory_space<vmem>>, vector<4x256xf32>
    %42 = vector.extract_strided_slice %9 {offsets = [0, 12], sizes = [4, 1], strides = [1, 1]} : vector<4x36xf32> to vector<4x1xf32>
    %43 = vector.extract_strided_slice %41 {offsets = [0, 0], sizes = [1, 256], strides = [1, 1]} : vector<4x256xf32> to vector<1x256xf32>
    %44 = vector.broadcast %42 : vector<4x1xf32> to vector<4x256xf32>
    %45 = vector.broadcast %43 : vector<1x256xf32> to vector<4x256xf32>
    %46 = arith.mulf %44, %45 : vector<4x256xf32>
    %47 = arith.addf %40, %46 : vector<4x256xf32>
    %48 = vector.extract_strided_slice %9 {offsets = [0, 13], sizes = [4, 1], strides = [1, 1]} : vector<4x36xf32> to vector<4x1xf32>
    %49 = vector.extract_strided_slice %41 {offsets = [1, 0], sizes = [1, 256], strides = [1, 1]} : vector<4x256xf32> to vector<1x256xf32>
    %50 = vector.broadcast %48 : vector<4x1xf32> to vector<4x256xf32>
    %51 = vector.broadcast %49 : vector<1x256xf32> to vector<4x256xf32>
    %52 = arith.mulf %50, %51 : vector<4x256xf32>
    %53 = arith.addf %47, %52 : vector<4x256xf32>
    %54 = vector.extract_strided_slice %9 {offsets = [0, 14], sizes = [4, 1], strides = [1, 1]} : vector<4x36xf32> to vector<4x1xf32>
    %55 = vector.extract_strided_slice %41 {offsets = [2, 0], sizes = [1, 256], strides = [1, 1]} : vector<4x256xf32> to vector<1x256xf32>
    %56 = vector.broadcast %54 : vector<4x1xf32> to vector<4x256xf32>
    %57 = vector.broadcast %55 : vector<1x256xf32> to vector<4x256xf32>
    %58 = arith.mulf %56, %57 : vector<4x256xf32>
    %59 = arith.addf %53, %58 : vector<4x256xf32>
    %60 = vector.extract_strided_slice %9 {offsets = [0, 15], sizes = [4, 1], strides = [1, 1]} : vector<4x36xf32> to vector<4x1xf32>
    %61 = vector.extract_strided_slice %41 {offsets = [3, 0], sizes = [1, 256], strides = [1, 1]} : vector<4x256xf32> to vector<1x256xf32>
    %62 = vector.broadcast %60 : vector<4x1xf32> to vector<4x256xf32>
    %63 = vector.broadcast %61 : vector<1x256xf32> to vector<4x256xf32>
    %64 = arith.mulf %62, %63 : vector<4x256xf32>
    %65 = arith.addf %59, %64 : vector<4x256xf32>
    %c0_17 = arith.constant 0 : index
    %c143 = arith.constant 143 : index
    %66 = vector.load %arg11[%c0_17, %c143] : memref<8x512xf32, #tpu.memory_space<vmem>>, vector<4x256xf32>
    %67 = vector.extract_strided_slice %9 {offsets = [0, 24], sizes = [4, 1], strides = [1, 1]} : vector<4x36xf32> to vector<4x1xf32>
    %68 = vector.extract_strided_slice %66 {offsets = [0, 0], sizes = [1, 256], strides = [1, 1]} : vector<4x256xf32> to vector<1x256xf32>
    %69 = vector.broadcast %67 : vector<4x1xf32> to vector<4x256xf32>
    %70 = vector.broadcast %68 : vector<1x256xf32> to vector<4x256xf32>
    %71 = arith.mulf %69, %70 : vector<4x256xf32>
    %72 = arith.addf %65, %71 : vector<4x256xf32>
    %73 = vector.extract_strided_slice %9 {offsets = [0, 25], sizes = [4, 1], strides = [1, 1]} : vector<4x36xf32> to vector<4x1xf32>
    %74 = vector.extract_strided_slice %66 {offsets = [1, 0], sizes = [1, 256], strides = [1, 1]} : vector<4x256xf32> to vector<1x256xf32>
    %75 = vector.broadcast %73 : vector<4x1xf32> to vector<4x256xf32>
    %76 = vector.broadcast %74 : vector<1x256xf32> to vector<4x256xf32>
    %77 = arith.mulf %75, %76 : vector<4x256xf32>
    %78 = arith.addf %72, %77 : vector<4x256xf32>
    %79 = vector.extract_strided_slice %9 {offsets = [0, 26], sizes = [4, 1], strides = [1, 1]} : vector<4x36xf32> to vector<4x1xf32>
    %80 = vector.extract_strided_slice %66 {offsets = [2, 0], sizes = [1, 256], strides = [1, 1]} : vector<4x256xf32> to vector<1x256xf32>
    %81 = vector.broadcast %79 : vector<4x1xf32> to vector<4x256xf32>
    %82 = vector.broadcast %80 : vector<1x256xf32> to vector<4x256xf32>
    %83 = arith.mulf %81, %82 : vector<4x256xf32>
    %84 = arith.addf %78, %83 : vector<4x256xf32>
    %85 = vector.extract_strided_slice %9 {offsets = [0, 27], sizes = [4, 1], strides = [1, 1]} : vector<4x36xf32> to vector<4x1xf32>
    %86 = vector.extract_strided_slice %66 {offsets = [3, 0], sizes = [1, 256], strides = [1, 1]} : vector<4x256xf32> to vector<1x256xf32>
    %87 = vector.broadcast %85 : vector<4x1xf32> to vector<4x256xf32>
    %88 = vector.broadcast %86 : vector<1x256xf32> to vector<4x256xf32>
    %89 = arith.mulf %87, %88 : vector<4x256xf32>
    %90 = arith.addf %84, %89 : vector<4x256xf32>
    %91 = vector.extract_strided_slice %11 {offsets = [0, 0], sizes = [1, 256], strides = [1, 1]} : vector<3x256xf32> to vector<1x256xf32>
    %92 = vector.broadcast %91 : vector<1x256xf32> to vector<4x256xf32>
    %93 = arith.mulf %90, %92 : vector<4x256xf32>
    %94 = arith.addf %14, %93 : vector<4x256xf32>
    %cst_18 = arith.constant 0.000000e+00 : f32
    %95 = vector.broadcast %cst_18 : f32 to vector<4x256xf32>
    %c0_19 = arith.constant 0 : index
    %c112 = arith.constant 112 : index
    %96 = vector.load %arg11[%c0_19, %c112] : memref<8x512xf32, #tpu.memory_space<vmem>>, vector<4x256xf32>
    %97 = vector.extract_strided_slice %9 {offsets = [0, 4], sizes = [4, 1], strides = [1, 1]} : vector<4x36xf32> to vector<4x1xf32>
    %98 = vector.extract_strided_slice %96 {offsets = [0, 0], sizes = [1, 256], strides = [1, 1]} : vector<4x256xf32> to vector<1x256xf32>
    %99 = vector.broadcast %97 : vector<4x1xf32> to vector<4x256xf32>
    %100 = vector.broadcast %98 : vector<1x256xf32> to vector<4x256xf32>
    %101 = arith.mulf %99, %100 : vector<4x256xf32>
    %102 = arith.addf %95, %101 : vector<4x256xf32>
    %103 = vector.extract_strided_slice %9 {offsets = [0, 5], sizes = [4, 1], strides = [1, 1]} : vector<4x36xf32> to vector<4x1xf32>
    %104 = vector.extract_strided_slice %96 {offsets = [1, 0], sizes = [1, 256], strides = [1, 1]} : vector<4x256xf32> to vector<1x256xf32>
    %105 = vector.broadcast %103 : vector<4x1xf32> to vector<4x256xf32>
    %106 = vector.broadcast %104 : vector<1x256xf32> to vector<4x256xf32>
    %107 = arith.mulf %105, %106 : vector<4x256xf32>
    %108 = arith.addf %102, %107 : vector<4x256xf32>
    %109 = vector.extract_strided_slice %9 {offsets = [0, 6], sizes = [4, 1], strides = [1, 1]} : vector<4x36xf32> to vector<4x1xf32>
    %110 = vector.extract_strided_slice %96 {offsets = [2, 0], sizes = [1, 256], strides = [1, 1]} : vector<4x256xf32> to vector<1x256xf32>
    %111 = vector.broadcast %109 : vector<4x1xf32> to vector<4x256xf32>
    %112 = vector.broadcast %110 : vector<1x256xf32> to vector<4x256xf32>
    %113 = arith.mulf %111, %112 : vector<4x256xf32>
    %114 = arith.addf %108, %113 : vector<4x256xf32>
    %115 = vector.extract_strided_slice %9 {offsets = [0, 7], sizes = [4, 1], strides = [1, 1]} : vector<4x36xf32> to vector<4x1xf32>
    %116 = vector.extract_strided_slice %96 {offsets = [3, 0], sizes = [1, 256], strides = [1, 1]} : vector<4x256xf32> to vector<1x256xf32>
    %117 = vector.broadcast %115 : vector<4x1xf32> to vector<4x256xf32>
    %118 = vector.broadcast %116 : vector<1x256xf32> to vector<4x256xf32>
    %119 = arith.mulf %117, %118 : vector<4x256xf32>
    %120 = arith.addf %114, %119 : vector<4x256xf32>
    %c0_20 = arith.constant 0 : index
    %c128_21 = arith.constant 128 : index
    %121 = vector.load %arg11[%c0_20, %c128_21] : memref<8x512xf32, #tpu.memory_space<vmem>>, vector<4x256xf32>
    %122 = vector.extract_strided_slice %9 {offsets = [0, 16], sizes = [4, 1], strides = [1, 1]} : vector<4x36xf32> to vector<4x1xf32>
    %123 = vector.extract_strided_slice %121 {offsets = [0, 0], sizes = [1, 256], strides = [1, 1]} : vector<4x256xf32> to vector<1x256xf32>
    %124 = vector.broadcast %122 : vector<4x1xf32> to vector<4x256xf32>
    %125 = vector.broadcast %123 : vector<1x256xf32> to vector<4x256xf32>
    %126 = arith.mulf %124, %125 : vector<4x256xf32>
    %127 = arith.addf %120, %126 : vector<4x256xf32>
    %128 = vector.extract_strided_slice %9 {offsets = [0, 17], sizes = [4, 1], strides = [1, 1]} : vector<4x36xf32> to vector<4x1xf32>
    %129 = vector.extract_strided_slice %121 {offsets = [1, 0], sizes = [1, 256], strides = [1, 1]} : vector<4x256xf32> to vector<1x256xf32>
    %130 = vector.broadcast %128 : vector<4x1xf32> to vector<4x256xf32>
    %131 = vector.broadcast %129 : vector<1x256xf32> to vector<4x256xf32>
    %132 = arith.mulf %130, %131 : vector<4x256xf32>
    %133 = arith.addf %127, %132 : vector<4x256xf32>
    %134 = vector.extract_strided_slice %9 {offsets = [0, 18], sizes = [4, 1], strides = [1, 1]} : vector<4x36xf32> to vector<4x1xf32>
    %135 = vector.extract_strided_slice %121 {offsets = [2, 0], sizes = [1, 256], strides = [1, 1]} : vector<4x256xf32> to vector<1x256xf32>
    %136 = vector.broadcast %134 : vector<4x1xf32> to vector<4x256xf32>
    %137 = vector.broadcast %135 : vector<1x256xf32> to vector<4x256xf32>
    %138 = arith.mulf %136, %137 : vector<4x256xf32>
    %139 = arith.addf %133, %138 : vector<4x256xf32>
    %140 = vector.extract_strided_slice %9 {offsets = [0, 19], sizes = [4, 1], strides = [1, 1]} : vector<4x36xf32> to vector<4x1xf32>
    %141 = vector.extract_strided_slice %121 {offsets = [3, 0], sizes = [1, 256], strides = [1, 1]} : vector<4x256xf32> to vector<1x256xf32>
    %142 = vector.broadcast %140 : vector<4x1xf32> to vector<4x256xf32>
    %143 = vector.broadcast %141 : vector<1x256xf32> to vector<4x256xf32>
    %144 = arith.mulf %142, %143 : vector<4x256xf32>
    %145 = arith.addf %139, %144 : vector<4x256xf32>
    %c0_22 = arith.constant 0 : index
    %c144 = arith.constant 144 : index
    %146 = vector.load %arg11[%c0_22, %c144] : memref<8x512xf32, #tpu.memory_space<vmem>>, vector<4x256xf32>
    %147 = vector.extract_strided_slice %9 {offsets = [0, 28], sizes = [4, 1], strides = [1, 1]} : vector<4x36xf32> to vector<4x1xf32>
    %148 = vector.extract_strided_slice %146 {offsets = [0, 0], sizes = [1, 256], strides = [1, 1]} : vector<4x256xf32> to vector<1x256xf32>
    %149 = vector.broadcast %147 : vector<4x1xf32> to vector<4x256xf32>
    %150 = vector.broadcast %148 : vector<1x256xf32> to vector<4x256xf32>
    %151 = arith.mulf %149, %150 : vector<4x256xf32>
    %152 = arith.addf %145, %151 : vector<4x256xf32>
    %153 = vector.extract_strided_slice %9 {offsets = [0, 29], sizes = [4, 1], strides = [1, 1]} : vector<4x36xf32> to vector<4x1xf32>
    %154 = vector.extract_strided_slice %146 {offsets = [1, 0], sizes = [1, 256], strides = [1, 1]} : vector<4x256xf32> to vector<1x256xf32>
    %155 = vector.broadcast %153 : vector<4x1xf32> to vector<4x256xf32>
    %156 = vector.broadcast %154 : vector<1x256xf32> to vector<4x256xf32>
    %157 = arith.mulf %155, %156 : vector<4x256xf32>
    %158 = arith.addf %152, %157 : vector<4x256xf32>
    %159 = vector.extract_strided_slice %9 {offsets = [0, 30], sizes = [4, 1], strides = [1, 1]} : vector<4x36xf32> to vector<4x1xf32>
    %160 = vector.extract_strided_slice %146 {offsets = [2, 0], sizes = [1, 256], strides = [1, 1]} : vector<4x256xf32> to vector<1x256xf32>
    %161 = vector.broadcast %159 : vector<4x1xf32> to vector<4x256xf32>
    %162 = vector.broadcast %160 : vector<1x256xf32> to vector<4x256xf32>
    %163 = arith.mulf %161, %162 : vector<4x256xf32>
    %164 = arith.addf %158, %163 : vector<4x256xf32>
    %165 = vector.extract_strided_slice %9 {offsets = [0, 31], sizes = [4, 1], strides = [1, 1]} : vector<4x36xf32> to vector<4x1xf32>
    %166 = vector.extract_strided_slice %146 {offsets = [3, 0], sizes = [1, 256], strides = [1, 1]} : vector<4x256xf32> to vector<1x256xf32>
    %167 = vector.broadcast %165 : vector<4x1xf32> to vector<4x256xf32>
    %168 = vector.broadcast %166 : vector<1x256xf32> to vector<4x256xf32>
    %169 = arith.mulf %167, %168 : vector<4x256xf32>
    %170 = arith.addf %164, %169 : vector<4x256xf32>
    %171 = arith.addf %94, %170 : vector<4x256xf32>
    %cst_23 = arith.constant 0.000000e+00 : f32
    %172 = vector.broadcast %cst_23 : f32 to vector<4x256xf32>
    %c0_24 = arith.constant 0 : index
    %c113 = arith.constant 113 : index
    %173 = vector.load %arg11[%c0_24, %c113] : memref<8x512xf32, #tpu.memory_space<vmem>>, vector<4x256xf32>
    %174 = vector.extract_strided_slice %9 {offsets = [0, 8], sizes = [4, 1], strides = [1, 1]} : vector<4x36xf32> to vector<4x1xf32>
    %175 = vector.extract_strided_slice %173 {offsets = [0, 0], sizes = [1, 256], strides = [1, 1]} : vector<4x256xf32> to vector<1x256xf32>
    %176 = vector.broadcast %174 : vector<4x1xf32> to vector<4x256xf32>
    %177 = vector.broadcast %175 : vector<1x256xf32> to vector<4x256xf32>
    %178 = arith.mulf %176, %177 : vector<4x256xf32>
    %179 = arith.addf %172, %178 : vector<4x256xf32>
    %180 = vector.extract_strided_slice %9 {offsets = [0, 9], sizes = [4, 1], strides = [1, 1]} : vector<4x36xf32> to vector<4x1xf32>
    %181 = vector.extract_strided_slice %173 {offsets = [1, 0], sizes = [1, 256], strides = [1, 1]} : vector<4x256xf32> to vector<1x256xf32>
    %182 = vector.broadcast %180 : vector<4x1xf32> to vector<4x256xf32>
    %183 = vector.broadcast %181 : vector<1x256xf32> to vector<4x256xf32>
    %184 = arith.mulf %182, %183 : vector<4x256xf32>
    %185 = arith.addf %179, %184 : vector<4x256xf32>
    %186 = vector.extract_strided_slice %9 {offsets = [0, 10], sizes = [4, 1], strides = [1, 1]} : vector<4x36xf32> to vector<4x1xf32>
    %187 = vector.extract_strided_slice %173 {offsets = [2, 0], sizes = [1, 256], strides = [1, 1]} : vector<4x256xf32> to vector<1x256xf32>
    %188 = vector.broadcast %186 : vector<4x1xf32> to vector<4x256xf32>
    %189 = vector.broadcast %187 : vector<1x256xf32> to vector<4x256xf32>
    %190 = arith.mulf %188, %189 : vector<4x256xf32>
    %191 = arith.addf %185, %190 : vector<4x256xf32>
    %192 = vector.extract_strided_slice %9 {offsets = [0, 11], sizes = [4, 1], strides = [1, 1]} : vector<4x36xf32> to vector<4x1xf32>
    %193 = vector.extract_strided_slice %173 {offsets = [3, 0], sizes = [1, 256], strides = [1, 1]} : vector<4x256xf32> to vector<1x256xf32>
    %194 = vector.broadcast %192 : vector<4x1xf32> to vector<4x256xf32>
    %195 = vector.broadcast %193 : vector<1x256xf32> to vector<4x256xf32>
    %196 = arith.mulf %194, %195 : vector<4x256xf32>
    %197 = arith.addf %191, %196 : vector<4x256xf32>
    %c0_25 = arith.constant 0 : index
    %c129 = arith.constant 129 : index
    %198 = vector.load %arg11[%c0_25, %c129] : memref<8x512xf32, #tpu.memory_space<vmem>>, vector<4x256xf32>
    %199 = vector.extract_strided_slice %9 {offsets = [0, 20], sizes = [4, 1], strides = [1, 1]} : vector<4x36xf32> to vector<4x1xf32>
    %200 = vector.extract_strided_slice %198 {offsets = [0, 0], sizes = [1, 256], strides = [1, 1]} : vector<4x256xf32> to vector<1x256xf32>
    %201 = vector.broadcast %199 : vector<4x1xf32> to vector<4x256xf32>
    %202 = vector.broadcast %200 : vector<1x256xf32> to vector<4x256xf32>
    %203 = arith.mulf %201, %202 : vector<4x256xf32>
    %204 = arith.addf %197, %203 : vector<4x256xf32>
    %205 = vector.extract_strided_slice %9 {offsets = [0, 21], sizes = [4, 1], strides = [1, 1]} : vector<4x36xf32> to vector<4x1xf32>
    %206 = vector.extract_strided_slice %198 {offsets = [1, 0], sizes = [1, 256], strides = [1, 1]} : vector<4x256xf32> to vector<1x256xf32>
    %207 = vector.broadcast %205 : vector<4x1xf32> to vector<4x256xf32>
    %208 = vector.broadcast %206 : vector<1x256xf32> to vector<4x256xf32>
    %209 = arith.mulf %207, %208 : vector<4x256xf32>
    %210 = arith.addf %204, %209 : vector<4x256xf32>
    %211 = vector.extract_strided_slice %9 {offsets = [0, 22], sizes = [4, 1], strides = [1, 1]} : vector<4x36xf32> to vector<4x1xf32>
    %212 = vector.extract_strided_slice %198 {offsets = [2, 0], sizes = [1, 256], strides = [1, 1]} : vector<4x256xf32> to vector<1x256xf32>
    %213 = vector.broadcast %211 : vector<4x1xf32> to vector<4x256xf32>
    %214 = vector.broadcast %212 : vector<1x256xf32> to vector<4x256xf32>
    %215 = arith.mulf %213, %214 : vector<4x256xf32>
    %216 = arith.addf %210, %215 : vector<4x256xf32>
    %217 = vector.extract_strided_slice %9 {offsets = [0, 23], sizes = [4, 1], strides = [1, 1]} : vector<4x36xf32> to vector<4x1xf32>
    %218 = vector.extract_strided_slice %198 {offsets = [3, 0], sizes = [1, 256], strides = [1, 1]} : vector<4x256xf32> to vector<1x256xf32>
    %219 = vector.broadcast %217 : vector<4x1xf32> to vector<4x256xf32>
    %220 = vector.broadcast %218 : vector<1x256xf32> to vector<4x256xf32>
    %221 = arith.mulf %219, %220 : vector<4x256xf32>
    %222 = arith.addf %216, %221 : vector<4x256xf32>
    %c0_26 = arith.constant 0 : index
    %c145 = arith.constant 145 : index
    %223 = vector.load %arg11[%c0_26, %c145] : memref<8x512xf32, #tpu.memory_space<vmem>>, vector<4x256xf32>
    %224 = vector.extract_strided_slice %9 {offsets = [0, 32], sizes = [4, 1], strides = [1, 1]} : vector<4x36xf32> to vector<4x1xf32>
    %225 = vector.extract_strided_slice %223 {offsets = [0, 0], sizes = [1, 256], strides = [1, 1]} : vector<4x256xf32> to vector<1x256xf32>
    %226 = vector.broadcast %224 : vector<4x1xf32> to vector<4x256xf32>
    %227 = vector.broadcast %225 : vector<1x256xf32> to vector<4x256xf32>
    %228 = arith.mulf %226, %227 : vector<4x256xf32>
    %229 = arith.addf %222, %228 : vector<4x256xf32>
    %230 = vector.extract_strided_slice %9 {offsets = [0, 33], sizes = [4, 1], strides = [1, 1]} : vector<4x36xf32> to vector<4x1xf32>
    %231 = vector.extract_strided_slice %223 {offsets = [1, 0], sizes = [1, 256], strides = [1, 1]} : vector<4x256xf32> to vector<1x256xf32>
    %232 = vector.broadcast %230 : vector<4x1xf32> to vector<4x256xf32>
    %233 = vector.broadcast %231 : vector<1x256xf32> to vector<4x256xf32>
    %234 = arith.mulf %232, %233 : vector<4x256xf32>
    %235 = arith.addf %229, %234 : vector<4x256xf32>
    %236 = vector.extract_strided_slice %9 {offsets = [0, 34], sizes = [4, 1], strides = [1, 1]} : vector<4x36xf32> to vector<4x1xf32>
    %237 = vector.extract_strided_slice %223 {offsets = [2, 0], sizes = [1, 256], strides = [1, 1]} : vector<4x256xf32> to vector<1x256xf32>
    %238 = vector.broadcast %236 : vector<4x1xf32> to vector<4x256xf32>
    %239 = vector.broadcast %237 : vector<1x256xf32> to vector<4x256xf32>
    %240 = arith.mulf %238, %239 : vector<4x256xf32>
    %241 = arith.addf %235, %240 : vector<4x256xf32>
    %242 = vector.extract_strided_slice %9 {offsets = [0, 35], sizes = [4, 1], strides = [1, 1]} : vector<4x36xf32> to vector<4x1xf32>
    %243 = vector.extract_strided_slice %223 {offsets = [3, 0], sizes = [1, 256], strides = [1, 1]} : vector<4x256xf32> to vector<1x256xf32>
    %244 = vector.broadcast %242 : vector<4x1xf32> to vector<4x256xf32>
    %245 = vector.broadcast %243 : vector<1x256xf32> to vector<4x256xf32>
    %246 = arith.mulf %244, %245 : vector<4x256xf32>
    %247 = arith.addf %241, %246 : vector<4x256xf32>
    %248 = vector.extract_strided_slice %11 {offsets = [2, 0], sizes = [1, 256], strides = [1, 1]} : vector<3x256xf32> to vector<1x256xf32>
    %249 = vector.broadcast %248 : vector<1x256xf32> to vector<4x256xf32>
    %250 = arith.mulf %247, %249 : vector<4x256xf32>
    %251 = arith.addf %171, %250 : vector<4x256xf32>
    %252 = math.tanh %251 : vector<4x256xf32>
    %c0_27 = arith.constant 0 : index
    %c128_28 = arith.constant 128 : index
    %253 = vector.load %arg11[%c0_27, %c128_28] : memref<8x512xf32, #tpu.memory_space<vmem>>, vector<4x256xf32>
    tpu.vector_store %arg11[%c0_27, %c128_28], %6 {strides = array<i32>} : memref<8x512xf32, #tpu.memory_space<vmem>>, vector<4x256xf32>,
    %c4 = arith.constant 4 : index
    %c128_29 = arith.constant 128 : index
    %254 = vector.load %arg11[%c4, %c128_29] : memref<8x512xf32, #tpu.memory_space<vmem>>, vector<4x256xf32>
    tpu.vector_store %arg11[%c4, %c128_29], %252 {strides = array<i32>} : memref<8x512xf32, #tpu.memory_space<vmem>>, vector<4x256xf32>,
    %c0_30 = arith.constant 0 : index
    %c0_31 = arith.constant 0 : index
    %255 = vector.load %arg6[%c0_30, %c0_31] : memref<4x72xf32, #tpu.memory_space<vmem>>, vector<4x72xf32>
    %c0_32 = arith.constant 0 : index
    %c0_33 = arith.constant 0 : index
    %256 = vector.load %arg7[%c0_32, %c0_33] : memref<4x1xf32, #tpu.memory_space<vmem>>, vector<4x1xf32>
    %c0_34 = arith.constant 0 : index
    %c0_35 = arith.constant 0 : index
    %257 = vector.load %arg3[%c0_34, %c0_35] : memref<3x256xf32, #tpu.memory_space<vmem>>, vector<3x256xf32>
    %cst_36 = arith.constant 0.000000e+00 : f32
    %258 = vector.broadcast %cst_36 : f32 to vector<4x256xf32>
    %259 = vector.broadcast %256 : vector<4x1xf32> to vector<4x256xf32>
    %260 = arith.addf %258, %259 : vector<4x256xf32>
    %cst_37 = arith.constant 0.000000e+00 : f32
    %261 = vector.broadcast %cst_37 : f32 to vector<4x256xf32>
    %c0_38 = arith.constant 0 : index
    %c111_39 = arith.constant 111 : index
    %262 = vector.load %arg11[%c0_38, %c111_39] : memref<8x512xf32, #tpu.memory_space<vmem>>, vector<8x256xf32>
    %263 = vector.extract_strided_slice %255 {offsets = [0, 0], sizes = [4, 1], strides = [1, 1]} : vector<4x72xf32> to vector<4x1xf32>
    %264 = vector.extract_strided_slice %262 {offsets = [0, 0], sizes = [1, 256], strides = [1, 1]} : vector<8x256xf32> to vector<1x256xf32>
    %265 = vector.broadcast %263 : vector<4x1xf32> to vector<4x256xf32>
    %266 = vector.broadcast %264 : vector<1x256xf32> to vector<4x256xf32>
    %267 = arith.mulf %265, %266 : vector<4x256xf32>
    %268 = arith.addf %261, %267 : vector<4x256xf32>
    %269 = vector.extract_strided_slice %255 {offsets = [0, 1], sizes = [4, 1], strides = [1, 1]} : vector<4x72xf32> to vector<4x1xf32>
    %270 = vector.extract_strided_slice %262 {offsets = [1, 0], sizes = [1, 256], strides = [1, 1]} : vector<8x256xf32> to vector<1x256xf32>
    %271 = vector.broadcast %269 : vector<4x1xf32> to vector<4x256xf32>
    %272 = vector.broadcast %270 : vector<1x256xf32> to vector<4x256xf32>
    %273 = arith.mulf %271, %272 : vector<4x256xf32>
    %274 = arith.addf %268, %273 : vector<4x256xf32>
    %275 = vector.extract_strided_slice %255 {offsets = [0, 2], sizes = [4, 1], strides = [1, 1]} : vector<4x72xf32> to vector<4x1xf32>
    %276 = vector.extract_strided_slice %262 {offsets = [2, 0], sizes = [1, 256], strides = [1, 1]} : vector<8x256xf32> to vector<1x256xf32>
    %277 = vector.broadcast %275 : vector<4x1xf32> to vector<4x256xf32>
    %278 = vector.broadcast %276 : vector<1x256xf32> to vector<4x256xf32>
    %279 = arith.mulf %277, %278 : vector<4x256xf32>
    %280 = arith.addf %274, %279 : vector<4x256xf32>
    %281 = vector.extract_strided_slice %255 {offsets = [0, 3], sizes = [4, 1], strides = [1, 1]} : vector<4x72xf32> to vector<4x1xf32>
    %282 = vector.extract_strided_slice %262 {offsets = [3, 0], sizes = [1, 256], strides = [1, 1]} : vector<8x256xf32> to vector<1x256xf32>
    %283 = vector.broadcast %281 : vector<4x1xf32> to vector<4x256xf32>
    %284 = vector.broadcast %282 : vector<1x256xf32> to vector<4x256xf32>
    %285 = arith.mulf %283, %284 : vector<4x256xf32>
    %286 = arith.addf %280, %285 : vector<4x256xf32>
    %287 = vector.extract_strided_slice %255 {offsets = [0, 4], sizes = [4, 1], strides = [1, 1]} : vector<4x72xf32> to vector<4x1xf32>
    %288 = vector.extract_strided_slice %262 {offsets = [4, 0], sizes = [1, 256], strides = [1, 1]} : vector<8x256xf32> to vector<1x256xf32>
    %289 = vector.broadcast %287 : vector<4x1xf32> to vector<4x256xf32>
    %290 = vector.broadcast %288 : vector<1x256xf32> to vector<4x256xf32>
    %291 = arith.mulf %289, %290 : vector<4x256xf32>
    %292 = arith.addf %286, %291 : vector<4x256xf32>
    %293 = vector.extract_strided_slice %255 {offsets = [0, 5], sizes = [4, 1], strides = [1, 1]} : vector<4x72xf32> to vector<4x1xf32>
    %294 = vector.extract_strided_slice %262 {offsets = [5, 0], sizes = [1, 256], strides = [1, 1]} : vector<8x256xf32> to vector<1x256xf32>
    %295 = vector.broadcast %293 : vector<4x1xf32> to vector<4x256xf32>
    %296 = vector.broadcast %294 : vector<1x256xf32> to vector<4x256xf32>
    %297 = arith.mulf %295, %296 : vector<4x256xf32>
    %298 = arith.addf %292, %297 : vector<4x256xf32>
    %299 = vector.extract_strided_slice %255 {offsets = [0, 6], sizes = [4, 1], strides = [1, 1]} : vector<4x72xf32> to vector<4x1xf32>
    %300 = vector.extract_strided_slice %262 {offsets = [6, 0], sizes = [1, 256], strides = [1, 1]} : vector<8x256xf32> to vector<1x256xf32>
    %301 = vector.broadcast %299 : vector<4x1xf32> to vector<4x256xf32>
    %302 = vector.broadcast %300 : vector<1x256xf32> to vector<4x256xf32>
    %303 = arith.mulf %301, %302 : vector<4x256xf32>
    %304 = arith.addf %298, %303 : vector<4x256xf32>
    %305 = vector.extract_strided_slice %255 {offsets = [0, 7], sizes = [4, 1], strides = [1, 1]} : vector<4x72xf32> to vector<4x1xf32>
    %306 = vector.extract_strided_slice %262 {offsets = [7, 0], sizes = [1, 256], strides = [1, 1]} : vector<8x256xf32> to vector<1x256xf32>
    %307 = vector.broadcast %305 : vector<4x1xf32> to vector<4x256xf32>
    %308 = vector.broadcast %306 : vector<1x256xf32> to vector<4x256xf32>
    %309 = arith.mulf %307, %308 : vector<4x256xf32>
    %310 = arith.addf %304, %309 : vector<4x256xf32>
    %c0_40 = arith.constant 0 : index
    %c127_41 = arith.constant 127 : index
    %311 = vector.load %arg11[%c0_40, %c127_41] : memref<8x512xf32, #tpu.memory_space<vmem>>, vector<8x256xf32>
    %312 = vector.extract_strided_slice %255 {offsets = [0, 24], sizes = [4, 1], strides = [1, 1]} : vector<4x72xf32> to vector<4x1xf32>
    %313 = vector.extract_strided_slice %311 {offsets = [0, 0], sizes = [1, 256], strides = [1, 1]} : vector<8x256xf32> to vector<1x256xf32>
    %314 = vector.broadcast %312 : vector<4x1xf32> to vector<4x256xf32>
    %315 = vector.broadcast %313 : vector<1x256xf32> to vector<4x256xf32>
    %316 = arith.mulf %314, %315 : vector<4x256xf32>
    %317 = arith.addf %310, %316 : vector<4x256xf32>
    %318 = vector.extract_strided_slice %255 {offsets = [0, 25], sizes = [4, 1], strides = [1, 1]} : vector<4x72xf32> to vector<4x1xf32>
    %319 = vector.extract_strided_slice %311 {offsets = [1, 0], sizes = [1, 256], strides = [1, 1]} : vector<8x256xf32> to vector<1x256xf32>
    %320 = vector.broadcast %318 : vector<4x1xf32> to vector<4x256xf32>
    %321 = vector.broadcast %319 : vector<1x256xf32> to vector<4x256xf32>
    %322 = arith.mulf %320, %321 : vector<4x256xf32>
    %323 = arith.addf %317, %322 : vector<4x256xf32>
    %324 = vector.extract_strided_slice %255 {offsets = [0, 26], sizes = [4, 1], strides = [1, 1]} : vector<4x72xf32> to vector<4x1xf32>
    %325 = vector.extract_strided_slice %311 {offsets = [2, 0], sizes = [1, 256], strides = [1, 1]} : vector<8x256xf32> to vector<1x256xf32>
    %326 = vector.broadcast %324 : vector<4x1xf32> to vector<4x256xf32>
    %327 = vector.broadcast %325 : vector<1x256xf32> to vector<4x256xf32>
    %328 = arith.mulf %326, %327 : vector<4x256xf32>
    %329 = arith.addf %323, %328 : vector<4x256xf32>
    %330 = vector.extract_strided_slice %255 {offsets = [0, 27], sizes = [4, 1], strides = [1, 1]} : vector<4x72xf32> to vector<4x1xf32>
    %331 = vector.extract_strided_slice %311 {offsets = [3, 0], sizes = [1, 256], strides = [1, 1]} : vector<8x256xf32> to vector<1x256xf32>
    %332 = vector.broadcast %330 : vector<4x1xf32> to vector<4x256xf32>
    %333 = vector.broadcast %331 : vector<1x256xf32> to vector<4x256xf32>
    %334 = arith.mulf %332, %333 : vector<4x256xf32>
    %335 = arith.addf %329, %334 : vector<4x256xf32>
    %336 = vector.extract_strided_slice %255 {offsets = [0, 28], sizes = [4, 1], strides = [1, 1]} : vector<4x72xf32> to vector<4x1xf32>
    %337 = vector.extract_strided_slice %311 {offsets = [4, 0], sizes = [1, 256], strides = [1, 1]} : vector<8x256xf32> to vector<1x256xf32>
    %338 = vector.broadcast %336 : vector<4x1xf32> to vector<4x256xf32>
    %339 = vector.broadcast %337 : vector<1x256xf32> to vector<4x256xf32>
    %340 = arith.mulf %338, %339 : vector<4x256xf32>
    %341 = arith.addf %335, %340 : vector<4x256xf32>
    %342 = vector.extract_strided_slice %255 {offsets = [0, 29], sizes = [4, 1], strides = [1, 1]} : vector<4x72xf32> to vector<4x1xf32>
    %343 = vector.extract_strided_slice %311 {offsets = [5, 0], sizes = [1, 256], strides = [1, 1]} : vector<8x256xf32> to vector<1x256xf32>
    %344 = vector.broadcast %342 : vector<4x1xf32> to vector<4x256xf32>
    %345 = vector.broadcast %343 : vector<1x256xf32> to vector<4x256xf32>
    %346 = arith.mulf %344, %345 : vector<4x256xf32>
    %347 = arith.addf %341, %346 : vector<4x256xf32>
    %348 = vector.extract_strided_slice %255 {offsets = [0, 30], sizes = [4, 1], strides = [1, 1]} : vector<4x72xf32> to vector<4x1xf32>
    %349 = vector.extract_strided_slice %311 {offsets = [6, 0], sizes = [1, 256], strides = [1, 1]} : vector<8x256xf32> to vector<1x256xf32>
    %350 = vector.broadcast %348 : vector<4x1xf32> to vector<4x256xf32>
    %351 = vector.broadcast %349 : vector<1x256xf32> to vector<4x256xf32>
    %352 = arith.mulf %350, %351 : vector<4x256xf32>
    %353 = arith.addf %347, %352 : vector<4x256xf32>
    %354 = vector.extract_strided_slice %255 {offsets = [0, 31], sizes = [4, 1], strides = [1, 1]} : vector<4x72xf32> to vector<4x1xf32>
    %355 = vector.extract_strided_slice %311 {offsets = [7, 0], sizes = [1, 256], strides = [1, 1]} : vector<8x256xf32> to vector<1x256xf32>
    %356 = vector.broadcast %354 : vector<4x1xf32> to vector<4x256xf32>
    %357 = vector.broadcast %355 : vector<1x256xf32> to vector<4x256xf32>
    %358 = arith.mulf %356, %357 : vector<4x256xf32>
    %359 = arith.addf %353, %358 : vector<4x256xf32>
    %c0_42 = arith.constant 0 : index
    %c143_43 = arith.constant 143 : index
    %360 = vector.load %arg11[%c0_42, %c143_43] : memref<8x512xf32, #tpu.memory_space<vmem>>, vector<8x256xf32>
    %361 = vector.extract_strided_slice %255 {offsets = [0, 48], sizes = [4, 1], strides = [1, 1]} : vector<4x72xf32> to vector<4x1xf32>
    %362 = vector.extract_strided_slice %360 {offsets = [0, 0], sizes = [1, 256], strides = [1, 1]} : vector<8x256xf32> to vector<1x256xf32>
    %363 = vector.broadcast %361 : vector<4x1xf32> to vector<4x256xf32>
    %364 = vector.broadcast %362 : vector<1x256xf32> to vector<4x256xf32>
    %365 = arith.mulf %363, %364 : vector<4x256xf32>
    %366 = arith.addf %359, %365 : vector<4x256xf32>
    %367 = vector.extract_strided_slice %255 {offsets = [0, 49], sizes = [4, 1], strides = [1, 1]} : vector<4x72xf32> to vector<4x1xf32>
    %368 = vector.extract_strided_slice %360 {offsets = [1, 0], sizes = [1, 256], strides = [1, 1]} : vector<8x256xf32> to vector<1x256xf32>
    %369 = vector.broadcast %367 : vector<4x1xf32> to vector<4x256xf32>
    %370 = vector.broadcast %368 : vector<1x256xf32> to vector<4x256xf32>
    %371 = arith.mulf %369, %370 : vector<4x256xf32>
    %372 = arith.addf %366, %371 : vector<4x256xf32>
    %373 = vector.extract_strided_slice %255 {offsets = [0, 50], sizes = [4, 1], strides = [1, 1]} : vector<4x72xf32> to vector<4x1xf32>
    %374 = vector.extract_strided_slice %360 {offsets = [2, 0], sizes = [1, 256], strides = [1, 1]} : vector<8x256xf32> to vector<1x256xf32>
    %375 = vector.broadcast %373 : vector<4x1xf32> to vector<4x256xf32>
    %376 = vector.broadcast %374 : vector<1x256xf32> to vector<4x256xf32>
    %377 = arith.mulf %375, %376 : vector<4x256xf32>
    %378 = arith.addf %372, %377 : vector<4x256xf32>
    %379 = vector.extract_strided_slice %255 {offsets = [0, 51], sizes = [4, 1], strides = [1, 1]} : vector<4x72xf32> to vector<4x1xf32>
    %380 = vector.extract_strided_slice %360 {offsets = [3, 0], sizes = [1, 256], strides = [1, 1]} : vector<8x256xf32> to vector<1x256xf32>
    %381 = vector.broadcast %379 : vector<4x1xf32> to vector<4x256xf32>
    %382 = vector.broadcast %380 : vector<1x256xf32> to vector<4x256xf32>
    %383 = arith.mulf %381, %382 : vector<4x256xf32>
    %384 = arith.addf %378, %383 : vector<4x256xf32>
    %385 = vector.extract_strided_slice %255 {offsets = [0, 52], sizes = [4, 1], strides = [1, 1]} : vector<4x72xf32> to vector<4x1xf32>
    %386 = vector.extract_strided_slice %360 {offsets = [4, 0], sizes = [1, 256], strides = [1, 1]} : vector<8x256xf32> to vector<1x256xf32>
    %387 = vector.broadcast %385 : vector<4x1xf32> to vector<4x256xf32>
    %388 = vector.broadcast %386 : vector<1x256xf32> to vector<4x256xf32>
    %389 = arith.mulf %387, %388 : vector<4x256xf32>
    %390 = arith.addf %384, %389 : vector<4x256xf32>
    %391 = vector.extract_strided_slice %255 {offsets = [0, 53], sizes = [4, 1], strides = [1, 1]} : vector<4x72xf32> to vector<4x1xf32>
    %392 = vector.extract_strided_slice %360 {offsets = [5, 0], sizes = [1, 256], strides = [1, 1]} : vector<8x256xf32> to vector<1x256xf32>
    %393 = vector.broadcast %391 : vector<4x1xf32> to vector<4x256xf32>
    %394 = vector.broadcast %392 : vector<1x256xf32> to vector<4x256xf32>
    %395 = arith.mulf %393, %394 : vector<4x256xf32>
    %396 = arith.addf %390, %395 : vector<4x256xf32>
    %397 = vector.extract_strided_slice %255 {offsets = [0, 54], sizes = [4, 1], strides = [1, 1]} : vector<4x72xf32> to vector<4x1xf32>
    %398 = vector.extract_strided_slice %360 {offsets = [6, 0], sizes = [1, 256], strides = [1, 1]} : vector<8x256xf32> to vector<1x256xf32>
    %399 = vector.broadcast %397 : vector<4x1xf32> to vector<4x256xf32>
    %400 = vector.broadcast %398 : vector<1x256xf32> to vector<4x256xf32>
    %401 = arith.mulf %399, %400 : vector<4x256xf32>
    %402 = arith.addf %396, %401 : vector<4x256xf32>
    %403 = vector.extract_strided_slice %255 {offsets = [0, 55], sizes = [4, 1], strides = [1, 1]} : vector<4x72xf32> to vector<4x1xf32>
    %404 = vector.extract_strided_slice %360 {offsets = [7, 0], sizes = [1, 256], strides = [1, 1]} : vector<8x256xf32> to vector<1x256xf32>
    %405 = vector.broadcast %403 : vector<4x1xf32> to vector<4x256xf32>
    %406 = vector.broadcast %404 : vector<1x256xf32> to vector<4x256xf32>
    %407 = arith.mulf %405, %406 : vector<4x256xf32>
    %408 = arith.addf %402, %407 : vector<4x256xf32>
    %409 = vector.extract_strided_slice %257 {offsets = [0, 0], sizes = [1, 256], strides = [1, 1]} : vector<3x256xf32> to vector<1x256xf32>
    %410 = vector.broadcast %409 : vector<1x256xf32> to vector<4x256xf32>
    %411 = arith.mulf %408, %410 : vector<4x256xf32>
    %412 = arith.addf %260, %411 : vector<4x256xf32>
    %cst_44 = arith.constant 0.000000e+00 : f32
    %413 = vector.broadcast %cst_44 : f32 to vector<4x256xf32>
    %c0_45 = arith.constant 0 : index
    %c112_46 = arith.constant 112 : index
    %414 = vector.load %arg11[%c0_45, %c112_46] : memref<8x512xf32, #tpu.memory_space<vmem>>, vector<8x256xf32>
    %415 = vector.extract_strided_slice %255 {offsets = [0, 8], sizes = [4, 1], strides = [1, 1]} : vector<4x72xf32> to vector<4x1xf32>
    %416 = vector.extract_strided_slice %414 {offsets = [0, 0], sizes = [1, 256], strides = [1, 1]} : vector<8x256xf32> to vector<1x256xf32>
    %417 = vector.broadcast %415 : vector<4x1xf32> to vector<4x256xf32>
    %418 = vector.broadcast %416 : vector<1x256xf32> to vector<4x256xf32>
    %419 = arith.mulf %417, %418 : vector<4x256xf32>
    %420 = arith.addf %413, %419 : vector<4x256xf32>
    %421 = vector.extract_strided_slice %255 {offsets = [0, 9], sizes = [4, 1], strides = [1, 1]} : vector<4x72xf32> to vector<4x1xf32>
    %422 = vector.extract_strided_slice %414 {offsets = [1, 0], sizes = [1, 256], strides = [1, 1]} : vector<8x256xf32> to vector<1x256xf32>
    %423 = vector.broadcast %421 : vector<4x1xf32> to vector<4x256xf32>
    %424 = vector.broadcast %422 : vector<1x256xf32> to vector<4x256xf32>
    %425 = arith.mulf %423, %424 : vector<4x256xf32>
    %426 = arith.addf %420, %425 : vector<4x256xf32>
    %427 = vector.extract_strided_slice %255 {offsets = [0, 10], sizes = [4, 1], strides = [1, 1]} : vector<4x72xf32> to vector<4x1xf32>
    %428 = vector.extract_strided_slice %414 {offsets = [2, 0], sizes = [1, 256], strides = [1, 1]} : vector<8x256xf32> to vector<1x256xf32>
    %429 = vector.broadcast %427 : vector<4x1xf32> to vector<4x256xf32>
    %430 = vector.broadcast %428 : vector<1x256xf32> to vector<4x256xf32>
    %431 = arith.mulf %429, %430 : vector<4x256xf32>
    %432 = arith.addf %426, %431 : vector<4x256xf32>
    %433 = vector.extract_strided_slice %255 {offsets = [0, 11], sizes = [4, 1], strides = [1, 1]} : vector<4x72xf32> to vector<4x1xf32>
    %434 = vector.extract_strided_slice %414 {offsets = [3, 0], sizes = [1, 256], strides = [1, 1]} : vector<8x256xf32> to vector<1x256xf32>
    %435 = vector.broadcast %433 : vector<4x1xf32> to vector<4x256xf32>
    %436 = vector.broadcast %434 : vector<1x256xf32> to vector<4x256xf32>
    %437 = arith.mulf %435, %436 : vector<4x256xf32>
    %438 = arith.addf %432, %437 : vector<4x256xf32>
    %439 = vector.extract_strided_slice %255 {offsets = [0, 12], sizes = [4, 1], strides = [1, 1]} : vector<4x72xf32> to vector<4x1xf32>
    %440 = vector.extract_strided_slice %414 {offsets = [4, 0], sizes = [1, 256], strides = [1, 1]} : vector<8x256xf32> to vector<1x256xf32>
    %441 = vector.broadcast %439 : vector<4x1xf32> to vector<4x256xf32>
    %442 = vector.broadcast %440 : vector<1x256xf32> to vector<4x256xf32>
    %443 = arith.mulf %441, %442 : vector<4x256xf32>
    %444 = arith.addf %438, %443 : vector<4x256xf32>
    %445 = vector.extract_strided_slice %255 {offsets = [0, 13], sizes = [4, 1], strides = [1, 1]} : vector<4x72xf32> to vector<4x1xf32>
    %446 = vector.extract_strided_slice %414 {offsets = [5, 0], sizes = [1, 256], strides = [1, 1]} : vector<8x256xf32> to vector<1x256xf32>
    %447 = vector.broadcast %445 : vector<4x1xf32> to vector<4x256xf32>
    %448 = vector.broadcast %446 : vector<1x256xf32> to vector<4x256xf32>
    %449 = arith.mulf %447, %448 : vector<4x256xf32>
    %450 = arith.addf %444, %449 : vector<4x256xf32>
    %451 = vector.extract_strided_slice %255 {offsets = [0, 14], sizes = [4, 1], strides = [1, 1]} : vector<4x72xf32> to vector<4x1xf32>
    %452 = vector.extract_strided_slice %414 {offsets = [6, 0], sizes = [1, 256], strides = [1, 1]} : vector<8x256xf32> to vector<1x256xf32>
    %453 = vector.broadcast %451 : vector<4x1xf32> to vector<4x256xf32>
    %454 = vector.broadcast %452 : vector<1x256xf32> to vector<4x256xf32>
    %455 = arith.mulf %453, %454 : vector<4x256xf32>
    %456 = arith.addf %450, %455 : vector<4x256xf32>
    %457 = vector.extract_strided_slice %255 {offsets = [0, 15], sizes = [4, 1], strides = [1, 1]} : vector<4x72xf32> to vector<4x1xf32>
    %458 = vector.extract_strided_slice %414 {offsets = [7, 0], sizes = [1, 256], strides = [1, 1]} : vector<8x256xf32> to vector<1x256xf32>
    %459 = vector.broadcast %457 : vector<4x1xf32> to vector<4x256xf32>
    %460 = vector.broadcast %458 : vector<1x256xf32> to vector<4x256xf32>
    %461 = arith.mulf %459, %460 : vector<4x256xf32>
    %462 = arith.addf %456, %461 : vector<4x256xf32>
    %c0_47 = arith.constant 0 : index
    %c128_48 = arith.constant 128 : index
    %463 = vector.load %arg11[%c0_47, %c128_48] : memref<8x512xf32, #tpu.memory_space<vmem>>, vector<8x256xf32>
    %464 = vector.extract_strided_slice %255 {offsets = [0, 32], sizes = [4, 1], strides = [1, 1]} : vector<4x72xf32> to vector<4x1xf32>
    %465 = vector.extract_strided_slice %463 {offsets = [0, 0], sizes = [1, 256], strides = [1, 1]} : vector<8x256xf32> to vector<1x256xf32>
    %466 = vector.broadcast %464 : vector<4x1xf32> to vector<4x256xf32>
    %467 = vector.broadcast %465 : vector<1x256xf32> to vector<4x256xf32>
    %468 = arith.mulf %466, %467 : vector<4x256xf32>
    %469 = arith.addf %462, %468 : vector<4x256xf32>
    %470 = vector.extract_strided_slice %255 {offsets = [0, 33], sizes = [4, 1], strides = [1, 1]} : vector<4x72xf32> to vector<4x1xf32>
    %471 = vector.extract_strided_slice %463 {offsets = [1, 0], sizes = [1, 256], strides = [1, 1]} : vector<8x256xf32> to vector<1x256xf32>
    %472 = vector.broadcast %470 : vector<4x1xf32> to vector<4x256xf32>
    %473 = vector.broadcast %471 : vector<1x256xf32> to vector<4x256xf32>
    %474 = arith.mulf %472, %473 : vector<4x256xf32>
    %475 = arith.addf %469, %474 : vector<4x256xf32>
    %476 = vector.extract_strided_slice %255 {offsets = [0, 34], sizes = [4, 1], strides = [1, 1]} : vector<4x72xf32> to vector<4x1xf32>
    %477 = vector.extract_strided_slice %463 {offsets = [2, 0], sizes = [1, 256], strides = [1, 1]} : vector<8x256xf32> to vector<1x256xf32>
    %478 = vector.broadcast %476 : vector<4x1xf32> to vector<4x256xf32>
    %479 = vector.broadcast %477 : vector<1x256xf32> to vector<4x256xf32>
    %480 = arith.mulf %478, %479 : vector<4x256xf32>
    %481 = arith.addf %475, %480 : vector<4x256xf32>
    %482 = vector.extract_strided_slice %255 {offsets = [0, 35], sizes = [4, 1], strides = [1, 1]} : vector<4x72xf32> to vector<4x1xf32>
    %483 = vector.extract_strided_slice %463 {offsets = [3, 0], sizes = [1, 256], strides = [1, 1]} : vector<8x256xf32> to vector<1x256xf32>
    %484 = vector.broadcast %482 : vector<4x1xf32> to vector<4x256xf32>
    %485 = vector.broadcast %483 : vector<1x256xf32> to vector<4x256xf32>
    %486 = arith.mulf %484, %485 : vector<4x256xf32>
    %487 = arith.addf %481, %486 : vector<4x256xf32>
    %488 = vector.extract_strided_slice %255 {offsets = [0, 36], sizes = [4, 1], strides = [1, 1]} : vector<4x72xf32> to vector<4x1xf32>
    %489 = vector.extract_strided_slice %463 {offsets = [4, 0], sizes = [1, 256], strides = [1, 1]} : vector<8x256xf32> to vector<1x256xf32>
    %490 = vector.broadcast %488 : vector<4x1xf32> to vector<4x256xf32>
    %491 = vector.broadcast %489 : vector<1x256xf32> to vector<4x256xf32>
    %492 = arith.mulf %490, %491 : vector<4x256xf32>
    %493 = arith.addf %487, %492 : vector<4x256xf32>
    %494 = vector.extract_strided_slice %255 {offsets = [0, 37], sizes = [4, 1], strides = [1, 1]} : vector<4x72xf32> to vector<4x1xf32>
    %495 = vector.extract_strided_slice %463 {offsets = [5, 0], sizes = [1, 256], strides = [1, 1]} : vector<8x256xf32> to vector<1x256xf32>
    %496 = vector.broadcast %494 : vector<4x1xf32> to vector<4x256xf32>
    %497 = vector.broadcast %495 : vector<1x256xf32> to vector<4x256xf32>
    %498 = arith.mulf %496, %497 : vector<4x256xf32>
    %499 = arith.addf %493, %498 : vector<4x256xf32>
    %500 = vector.extract_strided_slice %255 {offsets = [0, 38], sizes = [4, 1], strides = [1, 1]} : vector<4x72xf32> to vector<4x1xf32>
    %501 = vector.extract_strided_slice %463 {offsets = [6, 0], sizes = [1, 256], strides = [1, 1]} : vector<8x256xf32> to vector<1x256xf32>
    %502 = vector.broadcast %500 : vector<4x1xf32> to vector<4x256xf32>
    %503 = vector.broadcast %501 : vector<1x256xf32> to vector<4x256xf32>
    %504 = arith.mulf %502, %503 : vector<4x256xf32>
    %505 = arith.addf %499, %504 : vector<4x256xf32>
    %506 = vector.extract_strided_slice %255 {offsets = [0, 39], sizes = [4, 1], strides = [1, 1]} : vector<4x72xf32> to vector<4x1xf32>
    %507 = vector.extract_strided_slice %463 {offsets = [7, 0], sizes = [1, 256], strides = [1, 1]} : vector<8x256xf32> to vector<1x256xf32>
    %508 = vector.broadcast %506 : vector<4x1xf32> to vector<4x256xf32>
    %509 = vector.broadcast %507 : vector<1x256xf32> to vector<4x256xf32>
    %510 = arith.mulf %508, %509 : vector<4x256xf32>
    %511 = arith.addf %505, %510 : vector<4x256xf32>
    %c0_49 = arith.constant 0 : index
    %c144_50 = arith.constant 144 : index
    %512 = vector.load %arg11[%c0_49, %c144_50] : memref<8x512xf32, #tpu.memory_space<vmem>>, vector<8x256xf32>
    %513 = vector.extract_strided_slice %255 {offsets = [0, 56], sizes = [4, 1], strides = [1, 1]} : vector<4x72xf32> to vector<4x1xf32>
    %514 = vector.extract_strided_slice %512 {offsets = [0, 0], sizes = [1, 256], strides = [1, 1]} : vector<8x256xf32> to vector<1x256xf32>
    %515 = vector.broadcast %513 : vector<4x1xf32> to vector<4x256xf32>
    %516 = vector.broadcast %514 : vector<1x256xf32> to vector<4x256xf32>
    %517 = arith.mulf %515, %516 : vector<4x256xf32>
    %518 = arith.addf %511, %517 : vector<4x256xf32>
    %519 = vector.extract_strided_slice %255 {offsets = [0, 57], sizes = [4, 1], strides = [1, 1]} : vector<4x72xf32> to vector<4x1xf32>
    %520 = vector.extract_strided_slice %512 {offsets = [1, 0], sizes = [1, 256], strides = [1, 1]} : vector<8x256xf32> to vector<1x256xf32>
    %521 = vector.broadcast %519 : vector<4x1xf32> to vector<4x256xf32>
    %522 = vector.broadcast %520 : vector<1x256xf32> to vector<4x256xf32>
    %523 = arith.mulf %521, %522 : vector<4x256xf32>
    %524 = arith.addf %518, %523 : vector<4x256xf32>
    %525 = vector.extract_strided_slice %255 {offsets = [0, 58], sizes = [4, 1], strides = [1, 1]} : vector<4x72xf32> to vector<4x1xf32>
    %526 = vector.extract_strided_slice %512 {offsets = [2, 0], sizes = [1, 256], strides = [1, 1]} : vector<8x256xf32> to vector<1x256xf32>
    %527 = vector.broadcast %525 : vector<4x1xf32> to vector<4x256xf32>
    %528 = vector.broadcast %526 : vector<1x256xf32> to vector<4x256xf32>
    %529 = arith.mulf %527, %528 : vector<4x256xf32>
    %530 = arith.addf %524, %529 : vector<4x256xf32>
    %531 = vector.extract_strided_slice %255 {offsets = [0, 59], sizes = [4, 1], strides = [1, 1]} : vector<4x72xf32> to vector<4x1xf32>
    %532 = vector.extract_strided_slice %512 {offsets = [3, 0], sizes = [1, 256], strides = [1, 1]} : vector<8x256xf32> to vector<1x256xf32>
    %533 = vector.broadcast %531 : vector<4x1xf32> to vector<4x256xf32>
    %534 = vector.broadcast %532 : vector<1x256xf32> to vector<4x256xf32>
    %535 = arith.mulf %533, %534 : vector<4x256xf32>
    %536 = arith.addf %530, %535 : vector<4x256xf32>
    %537 = vector.extract_strided_slice %255 {offsets = [0, 60], sizes = [4, 1], strides = [1, 1]} : vector<4x72xf32> to vector<4x1xf32>
    %538 = vector.extract_strided_slice %512 {offsets = [4, 0], sizes = [1, 256], strides = [1, 1]} : vector<8x256xf32> to vector<1x256xf32>
    %539 = vector.broadcast %537 : vector<4x1xf32> to vector<4x256xf32>
    %540 = vector.broadcast %538 : vector<1x256xf32> to vector<4x256xf32>
    %541 = arith.mulf %539, %540 : vector<4x256xf32>
    %542 = arith.addf %536, %541 : vector<4x256xf32>
    %543 = vector.extract_strided_slice %255 {offsets = [0, 61], sizes = [4, 1], strides = [1, 1]} : vector<4x72xf32> to vector<4x1xf32>
    %544 = vector.extract_strided_slice %512 {offsets = [5, 0], sizes = [1, 256], strides = [1, 1]} : vector<8x256xf32> to vector<1x256xf32>
    %545 = vector.broadcast %543 : vector<4x1xf32> to vector<4x256xf32>
    %546 = vector.broadcast %544 : vector<1x256xf32> to vector<4x256xf32>
    %547 = arith.mulf %545, %546 : vector<4x256xf32>
    %548 = arith.addf %542, %547 : vector<4x256xf32>
    %549 = vector.extract_strided_slice %255 {offsets = [0, 62], sizes = [4, 1], strides = [1, 1]} : vector<4x72xf32> to vector<4x1xf32>
    %550 = vector.extract_strided_slice %512 {offsets = [6, 0], sizes = [1, 256], strides = [1, 1]} : vector<8x256xf32> to vector<1x256xf32>
    %551 = vector.broadcast %549 : vector<4x1xf32> to vector<4x256xf32>
    %552 = vector.broadcast %550 : vector<1x256xf32> to vector<4x256xf32>
    %553 = arith.mulf %551, %552 : vector<4x256xf32>
    %554 = arith.addf %548, %553 : vector<4x256xf32>
    %555 = vector.extract_strided_slice %255 {offsets = [0, 63], sizes = [4, 1], strides = [1, 1]} : vector<4x72xf32> to vector<4x1xf32>
    %556 = vector.extract_strided_slice %512 {offsets = [7, 0], sizes = [1, 256], strides = [1, 1]} : vector<8x256xf32> to vector<1x256xf32>
    %557 = vector.broadcast %555 : vector<4x1xf32> to vector<4x256xf32>
    %558 = vector.broadcast %556 : vector<1x256xf32> to vector<4x256xf32>
    %559 = arith.mulf %557, %558 : vector<4x256xf32>
    %560 = arith.addf %554, %559 : vector<4x256xf32>
    %561 = arith.addf %412, %560 : vector<4x256xf32>
    %cst_51 = arith.constant 0.000000e+00 : f32
    %562 = vector.broadcast %cst_51 : f32 to vector<4x256xf32>
    %c0_52 = arith.constant 0 : index
    %c113_53 = arith.constant 113 : index
    %563 = vector.load %arg11[%c0_52, %c113_53] : memref<8x512xf32, #tpu.memory_space<vmem>>, vector<8x256xf32>
    %564 = vector.extract_strided_slice %255 {offsets = [0, 16], sizes = [4, 1], strides = [1, 1]} : vector<4x72xf32> to vector<4x1xf32>
    %565 = vector.extract_strided_slice %563 {offsets = [0, 0], sizes = [1, 256], strides = [1, 1]} : vector<8x256xf32> to vector<1x256xf32>
    %566 = vector.broadcast %564 : vector<4x1xf32> to vector<4x256xf32>
    %567 = vector.broadcast %565 : vector<1x256xf32> to vector<4x256xf32>
    %568 = arith.mulf %566, %567 : vector<4x256xf32>
    %569 = arith.addf %562, %568 : vector<4x256xf32>
    %570 = vector.extract_strided_slice %255 {offsets = [0, 17], sizes = [4, 1], strides = [1, 1]} : vector<4x72xf32> to vector<4x1xf32>
    %571 = vector.extract_strided_slice %563 {offsets = [1, 0], sizes = [1, 256], strides = [1, 1]} : vector<8x256xf32> to vector<1x256xf32>
    %572 = vector.broadcast %570 : vector<4x1xf32> to vector<4x256xf32>
    %573 = vector.broadcast %571 : vector<1x256xf32> to vector<4x256xf32>
    %574 = arith.mulf %572, %573 : vector<4x256xf32>
    %575 = arith.addf %569, %574 : vector<4x256xf32>
    %576 = vector.extract_strided_slice %255 {offsets = [0, 18], sizes = [4, 1], strides = [1, 1]} : vector<4x72xf32> to vector<4x1xf32>
    %577 = vector.extract_strided_slice %563 {offsets = [2, 0], sizes = [1, 256], strides = [1, 1]} : vector<8x256xf32> to vector<1x256xf32>
    %578 = vector.broadcast %576 : vector<4x1xf32> to vector<4x256xf32>
    %579 = vector.broadcast %577 : vector<1x256xf32> to vector<4x256xf32>
    %580 = arith.mulf %578, %579 : vector<4x256xf32>
    %581 = arith.addf %575, %580 : vector<4x256xf32>
    %582 = vector.extract_strided_slice %255 {offsets = [0, 19], sizes = [4, 1], strides = [1, 1]} : vector<4x72xf32> to vector<4x1xf32>
    %583 = vector.extract_strided_slice %563 {offsets = [3, 0], sizes = [1, 256], strides = [1, 1]} : vector<8x256xf32> to vector<1x256xf32>
    %584 = vector.broadcast %582 : vector<4x1xf32> to vector<4x256xf32>
    %585 = vector.broadcast %583 : vector<1x256xf32> to vector<4x256xf32>
    %586 = arith.mulf %584, %585 : vector<4x256xf32>
    %587 = arith.addf %581, %586 : vector<4x256xf32>
    %588 = vector.extract_strided_slice %255 {offsets = [0, 20], sizes = [4, 1], strides = [1, 1]} : vector<4x72xf32> to vector<4x1xf32>
    %589 = vector.extract_strided_slice %563 {offsets = [4, 0], sizes = [1, 256], strides = [1, 1]} : vector<8x256xf32> to vector<1x256xf32>
    %590 = vector.broadcast %588 : vector<4x1xf32> to vector<4x256xf32>
    %591 = vector.broadcast %589 : vector<1x256xf32> to vector<4x256xf32>
    %592 = arith.mulf %590, %591 : vector<4x256xf32>
    %593 = arith.addf %587, %592 : vector<4x256xf32>
    %594 = vector.extract_strided_slice %255 {offsets = [0, 21], sizes = [4, 1], strides = [1, 1]} : vector<4x72xf32> to vector<4x1xf32>
    %595 = vector.extract_strided_slice %563 {offsets = [5, 0], sizes = [1, 256], strides = [1, 1]} : vector<8x256xf32> to vector<1x256xf32>
    %596 = vector.broadcast %594 : vector<4x1xf32> to vector<4x256xf32>
    %597 = vector.broadcast %595 : vector<1x256xf32> to vector<4x256xf32>
    %598 = arith.mulf %596, %597 : vector<4x256xf32>
    %599 = arith.addf %593, %598 : vector<4x256xf32>
    %600 = vector.extract_strided_slice %255 {offsets = [0, 22], sizes = [4, 1], strides = [1, 1]} : vector<4x72xf32> to vector<4x1xf32>
    %601 = vector.extract_strided_slice %563 {offsets = [6, 0], sizes = [1, 256], strides = [1, 1]} : vector<8x256xf32> to vector<1x256xf32>
    %602 = vector.broadcast %600 : vector<4x1xf32> to vector<4x256xf32>
    %603 = vector.broadcast %601 : vector<1x256xf32> to vector<4x256xf32>
    %604 = arith.mulf %602, %603 : vector<4x256xf32>
    %605 = arith.addf %599, %604 : vector<4x256xf32>
    %606 = vector.extract_strided_slice %255 {offsets = [0, 23], sizes = [4, 1], strides = [1, 1]} : vector<4x72xf32> to vector<4x1xf32>
    %607 = vector.extract_strided_slice %563 {offsets = [7, 0], sizes = [1, 256], strides = [1, 1]} : vector<8x256xf32> to vector<1x256xf32>
    %608 = vector.broadcast %606 : vector<4x1xf32> to vector<4x256xf32>
    %609 = vector.broadcast %607 : vector<1x256xf32> to vector<4x256xf32>
    %610 = arith.mulf %608, %609 : vector<4x256xf32>
    %611 = arith.addf %605, %610 : vector<4x256xf32>
    %c0_54 = arith.constant 0 : index
    %c129_55 = arith.constant 129 : index
    %612 = vector.load %arg11[%c0_54, %c129_55] : memref<8x512xf32, #tpu.memory_space<vmem>>, vector<8x256xf32>
    %613 = vector.extract_strided_slice %255 {offsets = [0, 40], sizes = [4, 1], strides = [1, 1]} : vector<4x72xf32> to vector<4x1xf32>
    %614 = vector.extract_strided_slice %612 {offsets = [0, 0], sizes = [1, 256], strides = [1, 1]} : vector<8x256xf32> to vector<1x256xf32>
    %615 = vector.broadcast %613 : vector<4x1xf32> to vector<4x256xf32>
    %616 = vector.broadcast %614 : vector<1x256xf32> to vector<4x256xf32>
    %617 = arith.mulf %615, %616 : vector<4x256xf32>
    %618 = arith.addf %611, %617 : vector<4x256xf32>
    %619 = vector.extract_strided_slice %255 {offsets = [0, 41], sizes = [4, 1], strides = [1, 1]} : vector<4x72xf32> to vector<4x1xf32>
    %620 = vector.extract_strided_slice %612 {offsets = [1, 0], sizes = [1, 256], strides = [1, 1]} : vector<8x256xf32> to vector<1x256xf32>
    %621 = vector.broadcast %619 : vector<4x1xf32> to vector<4x256xf32>
    %622 = vector.broadcast %620 : vector<1x256xf32> to vector<4x256xf32>
    %623 = arith.mulf %621, %622 : vector<4x256xf32>
    %624 = arith.addf %618, %623 : vector<4x256xf32>
    %625 = vector.extract_strided_slice %255 {offsets = [0, 42], sizes = [4, 1], strides = [1, 1]} : vector<4x72xf32> to vector<4x1xf32>
    %626 = vector.extract_strided_slice %612 {offsets = [2, 0], sizes = [1, 256], strides = [1, 1]} : vector<8x256xf32> to vector<1x256xf32>
    %627 = vector.broadcast %625 : vector<4x1xf32> to vector<4x256xf32>
    %628 = vector.broadcast %626 : vector<1x256xf32> to vector<4x256xf32>
    %629 = arith.mulf %627, %628 : vector<4x256xf32>
    %630 = arith.addf %624, %629 : vector<4x256xf32>
    %631 = vector.extract_strided_slice %255 {offsets = [0, 43], sizes = [4, 1], strides = [1, 1]} : vector<4x72xf32> to vector<4x1xf32>
    %632 = vector.extract_strided_slice %612 {offsets = [3, 0], sizes = [1, 256], strides = [1, 1]} : vector<8x256xf32> to vector<1x256xf32>
    %633 = vector.broadcast %631 : vector<4x1xf32> to vector<4x256xf32>
    %634 = vector.broadcast %632 : vector<1x256xf32> to vector<4x256xf32>
    %635 = arith.mulf %633, %634 : vector<4x256xf32>
    %636 = arith.addf %630, %635 : vector<4x256xf32>
    %637 = vector.extract_strided_slice %255 {offsets = [0, 44], sizes = [4, 1], strides = [1, 1]} : vector<4x72xf32> to vector<4x1xf32>
    %638 = vector.extract_strided_slice %612 {offsets = [4, 0], sizes = [1, 256], strides = [1, 1]} : vector<8x256xf32> to vector<1x256xf32>
    %639 = vector.broadcast %637 : vector<4x1xf32> to vector<4x256xf32>
    %640 = vector.broadcast %638 : vector<1x256xf32> to vector<4x256xf32>
    %641 = arith.mulf %639, %640 : vector<4x256xf32>
    %642 = arith.addf %636, %641 : vector<4x256xf32>
    %643 = vector.extract_strided_slice %255 {offsets = [0, 45], sizes = [4, 1], strides = [1, 1]} : vector<4x72xf32> to vector<4x1xf32>
    %644 = vector.extract_strided_slice %612 {offsets = [5, 0], sizes = [1, 256], strides = [1, 1]} : vector<8x256xf32> to vector<1x256xf32>
    %645 = vector.broadcast %643 : vector<4x1xf32> to vector<4x256xf32>
    %646 = vector.broadcast %644 : vector<1x256xf32> to vector<4x256xf32>
    %647 = arith.mulf %645, %646 : vector<4x256xf32>
    %648 = arith.addf %642, %647 : vector<4x256xf32>
    %649 = vector.extract_strided_slice %255 {offsets = [0, 46], sizes = [4, 1], strides = [1, 1]} : vector<4x72xf32> to vector<4x1xf32>
    %650 = vector.extract_strided_slice %612 {offsets = [6, 0], sizes = [1, 256], strides = [1, 1]} : vector<8x256xf32> to vector<1x256xf32>
    %651 = vector.broadcast %649 : vector<4x1xf32> to vector<4x256xf32>
    %652 = vector.broadcast %650 : vector<1x256xf32> to vector<4x256xf32>
    %653 = arith.mulf %651, %652 : vector<4x256xf32>
    %654 = arith.addf %648, %653 : vector<4x256xf32>
    %655 = vector.extract_strided_slice %255 {offsets = [0, 47], sizes = [4, 1], strides = [1, 1]} : vector<4x72xf32> to vector<4x1xf32>
    %656 = vector.extract_strided_slice %612 {offsets = [7, 0], sizes = [1, 256], strides = [1, 1]} : vector<8x256xf32> to vector<1x256xf32>
    %657 = vector.broadcast %655 : vector<4x1xf32> to vector<4x256xf32>
    %658 = vector.broadcast %656 : vector<1x256xf32> to vector<4x256xf32>
    %659 = arith.mulf %657, %658 : vector<4x256xf32>
    %660 = arith.addf %654, %659 : vector<4x256xf32>
    %c0_56 = arith.constant 0 : index
    %c145_57 = arith.constant 145 : index
    %661 = vector.load %arg11[%c0_56, %c145_57] : memref<8x512xf32, #tpu.memory_space<vmem>>, vector<8x256xf32>
    %662 = vector.extract_strided_slice %255 {offsets = [0, 64], sizes = [4, 1], strides = [1, 1]} : vector<4x72xf32> to vector<4x1xf32>
    %663 = vector.extract_strided_slice %661 {offsets = [0, 0], sizes = [1, 256], strides = [1, 1]} : vector<8x256xf32> to vector<1x256xf32>
    %664 = vector.broadcast %662 : vector<4x1xf32> to vector<4x256xf32>
    %665 = vector.broadcast %663 : vector<1x256xf32> to vector<4x256xf32>
    %666 = arith.mulf %664, %665 : vector<4x256xf32>
    %667 = arith.addf %660, %666 : vector<4x256xf32>
    %668 = vector.extract_strided_slice %255 {offsets = [0, 65], sizes = [4, 1], strides = [1, 1]} : vector<4x72xf32> to vector<4x1xf32>
    %669 = vector.extract_strided_slice %661 {offsets = [1, 0], sizes = [1, 256], strides = [1, 1]} : vector<8x256xf32> to vector<1x256xf32>
    %670 = vector.broadcast %668 : vector<4x1xf32> to vector<4x256xf32>
    %671 = vector.broadcast %669 : vector<1x256xf32> to vector<4x256xf32>
    %672 = arith.mulf %670, %671 : vector<4x256xf32>
    %673 = arith.addf %667, %672 : vector<4x256xf32>
    %674 = vector.extract_strided_slice %255 {offsets = [0, 66], sizes = [4, 1], strides = [1, 1]} : vector<4x72xf32> to vector<4x1xf32>
    %675 = vector.extract_strided_slice %661 {offsets = [2, 0], sizes = [1, 256], strides = [1, 1]} : vector<8x256xf32> to vector<1x256xf32>
    %676 = vector.broadcast %674 : vector<4x1xf32> to vector<4x256xf32>
    %677 = vector.broadcast %675 : vector<1x256xf32> to vector<4x256xf32>
    %678 = arith.mulf %676, %677 : vector<4x256xf32>
    %679 = arith.addf %673, %678 : vector<4x256xf32>
    %680 = vector.extract_strided_slice %255 {offsets = [0, 67], sizes = [4, 1], strides = [1, 1]} : vector<4x72xf32> to vector<4x1xf32>
    %681 = vector.extract_strided_slice %661 {offsets = [3, 0], sizes = [1, 256], strides = [1, 1]} : vector<8x256xf32> to vector<1x256xf32>
    %682 = vector.broadcast %680 : vector<4x1xf32> to vector<4x256xf32>
    %683 = vector.broadcast %681 : vector<1x256xf32> to vector<4x256xf32>
    %684 = arith.mulf %682, %683 : vector<4x256xf32>
    %685 = arith.addf %679, %684 : vector<4x256xf32>
    %686 = vector.extract_strided_slice %255 {offsets = [0, 68], sizes = [4, 1], strides = [1, 1]} : vector<4x72xf32> to vector<4x1xf32>
    %687 = vector.extract_strided_slice %661 {offsets = [4, 0], sizes = [1, 256], strides = [1, 1]} : vector<8x256xf32> to vector<1x256xf32>
    %688 = vector.broadcast %686 : vector<4x1xf32> to vector<4x256xf32>
    %689 = vector.broadcast %687 : vector<1x256xf32> to vector<4x256xf32>
    %690 = arith.mulf %688, %689 : vector<4x256xf32>
    %691 = arith.addf %685, %690 : vector<4x256xf32>
    %692 = vector.extract_strided_slice %255 {offsets = [0, 69], sizes = [4, 1], strides = [1, 1]} : vector<4x72xf32> to vector<4x1xf32>
    %693 = vector.extract_strided_slice %661 {offsets = [5, 0], sizes = [1, 256], strides = [1, 1]} : vector<8x256xf32> to vector<1x256xf32>
    %694 = vector.broadcast %692 : vector<4x1xf32> to vector<4x256xf32>
    %695 = vector.broadcast %693 : vector<1x256xf32> to vector<4x256xf32>
    %696 = arith.mulf %694, %695 : vector<4x256xf32>
    %697 = arith.addf %691, %696 : vector<4x256xf32>
    %698 = vector.extract_strided_slice %255 {offsets = [0, 70], sizes = [4, 1], strides = [1, 1]} : vector<4x72xf32> to vector<4x1xf32>
    %699 = vector.extract_strided_slice %661 {offsets = [6, 0], sizes = [1, 256], strides = [1, 1]} : vector<8x256xf32> to vector<1x256xf32>
    %700 = vector.broadcast %698 : vector<4x1xf32> to vector<4x256xf32>
    %701 = vector.broadcast %699 : vector<1x256xf32> to vector<4x256xf32>
    %702 = arith.mulf %700, %701 : vector<4x256xf32>
    %703 = arith.addf %697, %702 : vector<4x256xf32>
    %704 = vector.extract_strided_slice %255 {offsets = [0, 71], sizes = [4, 1], strides = [1, 1]} : vector<4x72xf32> to vector<4x1xf32>
    %705 = vector.extract_strided_slice %661 {offsets = [7, 0], sizes = [1, 256], strides = [1, 1]} : vector<8x256xf32> to vector<1x256xf32>
    %706 = vector.broadcast %704 : vector<4x1xf32> to vector<4x256xf32>
    %707 = vector.broadcast %705 : vector<1x256xf32> to vector<4x256xf32>
    %708 = arith.mulf %706, %707 : vector<4x256xf32>
    %709 = arith.addf %703, %708 : vector<4x256xf32>
    %710 = vector.extract_strided_slice %257 {offsets = [2, 0], sizes = [1, 256], strides = [1, 1]} : vector<3x256xf32> to vector<1x256xf32>
    %711 = vector.broadcast %710 : vector<1x256xf32> to vector<4x256xf32>
    %712 = arith.mulf %709, %711 : vector<4x256xf32>
    %713 = arith.addf %561, %712 : vector<4x256xf32>
    %c0_58 = arith.constant 0 : index
    %c0_59 = arith.constant 0 : index
    %714 = vector.load %arg8[%c0_58, %c0_59] : memref<8x8xf32, #tpu.memory_space<vmem>>, vector<8x8xf32>
    %cst_60 = arith.constant 0.000000e+00 : f32
    %715 = vector.broadcast %cst_60 : f32 to vector<8x256xf32>
    %c0_61 = arith.constant 0 : index
    %c0_62 = arith.constant 0 : index
    %716 = vector.load %arg9[%c0_61, %c0_62] : memref<8x1xf32, #tpu.memory_space<vmem>>, vector<8x1xf32>
    %717 = vector.broadcast %716 : vector<8x1xf32> to vector<8x256xf32>
    %718 = arith.addf %715, %717 : vector<8x256xf32>
    %719 = vector.extract_strided_slice %714 {offsets = [0, 0], sizes = [8, 1], strides = [1, 1]} : vector<8x8xf32> to vector<8x1xf32>
    %720 = vector.extract_strided_slice %713 {offsets = [0, 0], sizes = [1, 256], strides = [1, 1]} : vector<4x256xf32> to vector<1x256xf32>
    %721 = vector.broadcast %719 : vector<8x1xf32> to vector<8x256xf32>
    %722 = vector.broadcast %720 : vector<1x256xf32> to vector<8x256xf32>
    %723 = arith.mulf %721, %722 : vector<8x256xf32>
    %724 = arith.addf %718, %723 : vector<8x256xf32>
    %725 = vector.extract_strided_slice %714 {offsets = [0, 1], sizes = [8, 1], strides = [1, 1]} : vector<8x8xf32> to vector<8x1xf32>
    %726 = vector.extract_strided_slice %713 {offsets = [1, 0], sizes = [1, 256], strides = [1, 1]} : vector<4x256xf32> to vector<1x256xf32>
    %727 = vector.broadcast %725 : vector<8x1xf32> to vector<8x256xf32>
    %728 = vector.broadcast %726 : vector<1x256xf32> to vector<8x256xf32>
    %729 = arith.mulf %727, %728 : vector<8x256xf32>
    %730 = arith.addf %724, %729 : vector<8x256xf32>
    %731 = vector.extract_strided_slice %714 {offsets = [0, 2], sizes = [8, 1], strides = [1, 1]} : vector<8x8xf32> to vector<8x1xf32>
    %732 = vector.extract_strided_slice %713 {offsets = [2, 0], sizes = [1, 256], strides = [1, 1]} : vector<4x256xf32> to vector<1x256xf32>
    %733 = vector.broadcast %731 : vector<8x1xf32> to vector<8x256xf32>
    %734 = vector.broadcast %732 : vector<1x256xf32> to vector<8x256xf32>
    %735 = arith.mulf %733, %734 : vector<8x256xf32>
    %736 = arith.addf %730, %735 : vector<8x256xf32>
    %737 = vector.extract_strided_slice %714 {offsets = [0, 3], sizes = [8, 1], strides = [1, 1]} : vector<8x8xf32> to vector<8x1xf32>
    %738 = vector.extract_strided_slice %713 {offsets = [3, 0], sizes = [1, 256], strides = [1, 1]} : vector<4x256xf32> to vector<1x256xf32>
    %739 = vector.broadcast %737 : vector<8x1xf32> to vector<8x256xf32>
    %740 = vector.broadcast %738 : vector<1x256xf32> to vector<8x256xf32>
    %741 = arith.mulf %739, %740 : vector<8x256xf32>
    %742 = arith.addf %736, %741 : vector<8x256xf32>
    %743 = vector.extract_strided_slice %714 {offsets = [0, 4], sizes = [8, 1], strides = [1, 1]} : vector<8x8xf32> to vector<8x1xf32>
    %744 = vector.extract_strided_slice %7 {offsets = [0, 0], sizes = [1, 256], strides = [1, 1]} : vector<4x256xf32> to vector<1x256xf32>
    %745 = vector.broadcast %743 : vector<8x1xf32> to vector<8x256xf32>
    %746 = vector.broadcast %744 : vector<1x256xf32> to vector<8x256xf32>
    %747 = arith.mulf %745, %746 : vector<8x256xf32>
    %748 = arith.addf %742, %747 : vector<8x256xf32>
    %749 = vector.extract_strided_slice %714 {offsets = [0, 5], sizes = [8, 1], strides = [1, 1]} : vector<8x8xf32> to vector<8x1xf32>
    %750 = vector.extract_strided_slice %7 {offsets = [1, 0], sizes = [1, 256], strides = [1, 1]} : vector<4x256xf32> to vector<1x256xf32>
    %751 = vector.broadcast %749 : vector<8x1xf32> to vector<8x256xf32>
    %752 = vector.broadcast %750 : vector<1x256xf32> to vector<8x256xf32>
    %753 = arith.mulf %751, %752 : vector<8x256xf32>
    %754 = arith.addf %748, %753 : vector<8x256xf32>
    %755 = vector.extract_strided_slice %714 {offsets = [0, 6], sizes = [8, 1], strides = [1, 1]} : vector<8x8xf32> to vector<8x1xf32>
    %756 = vector.extract_strided_slice %7 {offsets = [2, 0], sizes = [1, 256], strides = [1, 1]} : vector<4x256xf32> to vector<1x256xf32>
    %757 = vector.broadcast %755 : vector<8x1xf32> to vector<8x256xf32>
    %758 = vector.broadcast %756 : vector<1x256xf32> to vector<8x256xf32>
    %759 = arith.mulf %757, %758 : vector<8x256xf32>
    %760 = arith.addf %754, %759 : vector<8x256xf32>
    %761 = vector.extract_strided_slice %714 {offsets = [0, 7], sizes = [8, 1], strides = [1, 1]} : vector<8x8xf32> to vector<8x1xf32>
    %762 = vector.extract_strided_slice %7 {offsets = [3, 0], sizes = [1, 256], strides = [1, 1]} : vector<4x256xf32> to vector<1x256xf32>
    %763 = vector.broadcast %761 : vector<8x1xf32> to vector<8x256xf32>
    %764 = vector.broadcast %762 : vector<1x256xf32> to vector<8x256xf32>
    %765 = arith.mulf %763, %764 : vector<8x256xf32>
    %766 = arith.addf %760, %765 : vector<8x256xf32>
    %c0_63 = arith.constant 0 : index
    %c0_64 = arith.constant 0 : index
    %c0_65 = arith.constant 0 : index
    %767 = vector.load %arg10[%c0_63, %c0_64, %c0_65] : memref<1x8x256xf32, #tpu.memory_space<vmem>>, vector<1x8x256xf32>
    %768 = vector.shape_cast %767 : vector<1x8x256xf32> to vector<8x256xf32>
    %769 = vector.shape_cast %766 : vector<8x256xf32> to vector<1x8x256xf32>
    tpu.vector_store %arg10[%c0_63, %c0_64, %c0_65], %769 {strides = array<i32>} : memref<1x8x256xf32, #tpu.memory_space<vmem>>, vector<1x8x256xf32>,
    return
  }
  func.func @transform_0(%arg0: i32) -> (i32, i32, i32) {
    %c0_i32 = arith.constant 0 : i32
    %c0_i32_0 = arith.constant 0 : i32
    %c0_i32_1 = arith.constant 0 : i32
    return %arg0, %c0_i32, %c0_i32_0 : i32, i32, i32
  }
  func.func @transform_1(%arg0: i32) -> (i32, i32) {
    %c0_i32 = arith.constant 0 : i32
    %c0_i32_0 = arith.constant 0 : i32
    %c0_i32_1 = arith.constant 0 : i32
    return %c0_i32, %c0_i32_0 : i32, i32
  }
  func.func @transform_2(%arg0: i32) -> (i32, i32) {
    %c0_i32 = arith.constant 0 : i32
    %c0_i32_0 = arith.constant 0 : i32
    %c0_i32_1 = arith.constant 0 : i32
    return %c0_i32, %c0_i32_0 : i32, i32
  }
  func.func @transform_3(%arg0: i32) -> (i32, i32) {
    %c0_i32 = arith.constant 0 : i32
    %c0_i32_0 = arith.constant 0 : i32
    %c0_i32_1 = arith.constant 0 : i32
    return %c0_i32, %c0_i32_0 : i32, i32
  }
  func.func @transform_4(%arg0: i32) -> (i32, i32) {
    %c0_i32 = arith.constant 0 : i32
    %c0_i32_0 = arith.constant 0 : i32
    %c0_i32_1 = arith.constant 0 : i32
    return %c0_i32, %c0_i32_0 : i32, i32
  }
  func.func @transform_5(%arg0: i32) -> (i32, i32) {
    %c0_i32 = arith.constant 0 : i32
    %c0_i32_0 = arith.constant 0 : i32
    %c0_i32_1 = arith.constant 0 : i32
    return %c0_i32, %c0_i32_0 : i32, i32
  }
  func.func @transform_6(%arg0: i32) -> (i32, i32) {
    %c0_i32 = arith.constant 0 : i32
    %c0_i32_0 = arith.constant 0 : i32
    %c0_i32_1 = arith.constant 0 : i32
    return %c0_i32, %c0_i32_0 : i32, i32
  }
  func.func @transform_7(%arg0: i32) -> (i32, i32) {
    %c0_i32 = arith.constant 0 : i32
    %c0_i32_0 = arith.constant 0 : i32
    %c0_i32_1 = arith.constant 0 : i32
    return %c0_i32, %c0_i32_0 : i32, i32
  }
  func.func @transform_8(%arg0: i32) -> (i32, i32) {
    %c0_i32 = arith.constant 0 : i32
    %c0_i32_0 = arith.constant 0 : i32
    %c0_i32_1 = arith.constant 0 : i32
    return %c0_i32, %c0_i32_0 : i32, i32
  }
  func.func @transform_9(%arg0: i32) -> (i32, i32, i32) {
    %c0_i32 = arith.constant 0 : i32
    %c0_i32_0 = arith.constant 0 : i32
    %c0_i32_1 = arith.constant 0 : i32
    return %arg0, %c0_i32, %c0_i32_0 : i32, i32, i32
  }
}

</mosaic_0001>

<bundles_post_ra>
// kernel: tpu_custom_call.1
= control target key start
LH: loop header
LB: loop body
LE: loop exit
PB: predicated region body
PF: predicated region fallthrough
CT: control target
= control target key end

     0   :  { %14 = vsyncpa [#allocation4], 0  ;;  %s6057_s0 = inlined_call_operand.hbm [shape: f32[2,8,256], index: 0, kind: input, shape index: {}]   ;;  %s6058_s1 = inlined_call_operand.vmem [shape: f32[3,256], index: 1, kind: input, shape index: {}]   ;;  %s6059_s2 = inlined_call_operand.vmem [shape: f32[3,256], index: 2, kind: input, shape index: {}]   ;;  %s6060_s3 = inlined_call_operand.vmem [shape: f32[4,36], index: 3, kind: input, shape index: {}]   ;;  %s6061_s4 = inlined_call_operand.vmem [shape: f32[4,1], index: 4, kind: input, shape index: {}]   ;;  %s6062_s5 = inlined_call_operand.vmem [shape: f32[4,72], index: 5, kind: input, shape index: {}]   ;;  %s6063_s6 = inlined_call_operand.vmem [shape: f32[4,1], index: 6, kind: input, shape index: {}]   ;;  %s6064_s7 = inlined_call_operand.vmem [shape: f32[8,8], index: 7, kind: input, shape index: {}]   ;;  %s6065_s8 = inlined_call_operand.vmem [shape: f32[8,1], index: 8, kind: input, shape index: {}]   ;;  %s6066_s9 = inlined_call_operand.hbm [shape: f32[2,8,256], index: 9, kind: output, shape index: {}]  }
   0x1   :  { %16 = vsyncpa [#allocation4 + $0x1], 0 }
   0x2   :  { %17 = vsyncpa [#allocation5], 0 }
   0x3   :  { %19 = vsyncpa [#allocation5 + $0x1], 0  ;;  %s3741_s30 = smov 0   ;;  %s3743_s10 = smov 0  }
   0x4   :  { %s3745_s11 = smov 0   ;;  %s3747_s12 = smov 0  }
   0x5 LB: > { %s3762_s13 = sadd.s32 4294967295, %s3607_s12   ;;  %s3244_s14 = sadd.s32 4294967294, %s3607_s12   ;;  %s3607_s12 = sphi %s3747_s12, %s6637_s12   ;;  %s3603_s11 = sphi %s3745_s11, %s6636_s11   ;;  %s3599_s10 = sphi %s3743_s10, %s6635_s10   ;;  %s3595_s30 = sphi %s3741_s30, %s6634_s30  }
   0x6   : > { %s3766_s15 = sadd.s32 1, %s3607_s12   ;;  %s32_s16 = sadd.s32 1, %s3603_s11 }
   0x7   : > { %s29_s17 = ssub.s32 %s3607_s12, %s3766_s15  ;;  %p39_p0 = scmp.ne.s32.totalorder %s3603_s11, %s3599_s10 }
   0x8   : > { %p30_p1 = scmp.eq.s32.totalorder %s29_s17, 0  ;;  %p40_p2 = scmp.eq.s32.totalorder %s3607_s12, 0 }
   0x9   : > { %p45_p3 = scmp.ne.s32.totalorder %s3599_s10, %s3595_s30  ;;  %p46_p4 = scmp.eq.s32.totalorder %s3762_s13, 0 }
   0xa   : > { %s3778_s18 = scalar_select %p30_p1, %s3603_s11, %s32_s16  }
   0xb   : > { %p3780_p5 = por %p40_p2, %p39_p0  ;;  %p3784_p6 = por %p46_p4, %p45_p3 }
   0xc   : > { %p237_p7 = scmp.eq.s32.totalorder %s3762_s13, 1  ;;  %p243_p8 = scmp.eq.s32.totalorder %s3244_s14, 1 }
   0xd   : > { %p3272_p10 = scmp.lt.s32.totalorder %s3607_s12, 2  ;;  %s287_s23 = sand.u32 1, %s3603_s11  }
   0xe   : > { %p3791_p11 = por %p237_p7, %p39_p0  ;;  %p3795_p12 = por %p243_p8, %p45_p3 }
   0xf   : > { %s3258_s24 = sshll.u32 %s3607_s12, 8  ;;  %s3247_s25 = sshll.u32 %s287_s23, 4 }
  0x10   : > { %s6263_s21 = scalar_select %p3791_p11, 1, 0 }
  0x11   : > { %s6264_s22 = scalar_select %p3795_p12, 1, 0 }
  0x12   : > { %s3804_s28 = scalar_lea.hbm %s6057_s0, %s3258_s24  ;;  %s291_s29 = scalar_lea.vmem [#allocation3], %s3247_s25 }
  0x13   : > { %s299_s14 = sshll.u32 %s291_s29, 4  ;;  %p3808_p13 = pnand %p3272_p10, %p3780_p5  ;;  %s3812_s14 = int_to_ptr.vmem [resolvable:$true] %s299_s14 }
  0x14   : > { %s288_s17 = scalar_lea.sflag [#allocation4], %s287_s23  ;;  %s3511_s24 = scalar_lea.hbm %s3804_s28, 256 }
  0x15   : > { %p3512_p2 = scmp.ne.s32.totalorder %s3804_s28, %s3511_s24  ;;  %p3513_p3 = pneg %p3808_p13 }
  0x16   : > { %s3516_s26 = scalar_lea.hbm %s6057_s0, 512  ;;  %p3517_p5 = scmp.lt.u32.totalorder %s3804_s28, %s6057_s0 }
  0x17   : > { %p3514_p4 = pnand %p3513_p3, %p3512_p2  ;;  %p3518_p8 = scmp.lt.u32.totalorder %s3516_s26, %s3511_s24 }
  0x18   : > { %p3520_p9 = scmp.lt.u32.totalorder %s3511_s24, %s3804_s28 }
  0x19   : > { %p3515_p7 = pneg %p3514_p4  ;;  %p3519_p10 = por %p3518_p8, %p3517_p5 }
  0x1b   : > { %p3521_p0 = por %p3520_p9, %p3519_p10 }
  0x1d   : > { %p3522_p1 = pnand %p3521_p0, %p3515_p7 }
  0x1f   : > { %3525 = shalt.err (!%p3522_p1)
}
  0x20   : > { %s3526_s23 = scalar_lea.vmem %s3812_s14, 256  ;;  %s3609_s19 = smov [#allocation3]  }
  0x21   : > { %p3527_p2 = scmp.ne.s32.totalorder %s3812_s14, %s3526_s23  ;;  %s3531_s25 = sshll.u32 %s3609_s19, 4  ;;  %s3532_s25 = int_to_ptr.vmem [resolvable:$false] %s3531_s25 }
  0x22   : > { %s3533_s27 = scalar_lea.vmem %s3532_s25, 512  ;;  %p3534_p11 = scmp.lt.s32.totalorder %s3812_s14, %s3532_s25 }
  0x23   : > { %p3529_p4 = pnand %p3527_p2, %p3513_p3  ;;  %p3535_p5 = scmp.lt.s32.totalorder %s3533_s27, %s3526_s23 }
  0x25   : > { %p3530_p12 = pneg %p3529_p4  ;;  %p3536_p8 = por %p3535_p5, %p3534_p11 }
  0x27   : > { %p3537_p9 = pnand %p3536_p8, %p3530_p12 }
  0x29   : > { %3540 = shalt.err (!%p3537_p9)
}
  0x2a   : > { %3267 = dma.hbm_to_vmem [thread:$0]  (!%p3808_p13), %s3804_s28, 256, %s3812_s14, %s288_s17  }
  0x2b   : > { %p6266_p0 = scmp.lt.s32.totalorder %s3607_s12, 3  ;;  %p6267_p1 = scmp.ge.s32.totalorder %s3607_s12, 1 }
  0x2d   : > { %p305_p3 = pnand %p6267_p1, %p6266_p0 }
  0x2f   : > { %308 = sbr.rel (%p305_p3) target bundleno = 2949 (0xb85), region = 56 }
  0x36   : > { %s3846_s24 = sand.u32 1, %s3599_s10  }
  0x37   : > { %s3251_s26 = sshll.u32 %s3846_s24, 4  ;;  %s311_s29 = scalar_lea.sflag [#allocation4], %s3846_s24 }
  0x38   : > { %s314_s16 = scalar_lea.vmem [#allocation3], %s3251_s26 }
  0x39   : > { %3586 = dma.done.wait (%p3784_p6), %s311_s29, 256  }
  0x3a   : > { %3588 = vsyncadd (%p3784_p6), %s311_s29, 4294967040  ;;  %v6094_v0 = vmov 1   ;;  %v6075_v1 = vmov 13   ;;  %v378_v2 = vlaneseq  ;;  %v3612_v5 = vmov 0.0   ;;  %v3866_v6 = vld [vmem:[%s6060_s3] sm:$0xf] }
  0x3b   : > { %3386 = vset.pattern.permute.xlu1 %v6094_v0  ;;  %3389 = vset.pattern.permute.xlu0 %v6075_v1  ;;  %349 = vst [vmem:[#allocation2] sm:$0xff] %v3612_v5  ;;  %350 = vst [vmem:[#allocation2 + $0x18] sm:$0xff] %v3612_v5  ;;  %v3871_v7 = vld [vmem:[%s6058_s1] sm:$0x77]  ;;  %v3880_v10 = vld [vmem:[%s314_s16 + $0x8] sm:$0xff]  ;;  %v6092_v15 = vmov 2  }
  0x3c   : > { %v3858_v3 = vshrl.u32 %v378_v2, 7  ;;  %v3876_v9 = vld [vmem:[%s314_s16] sm:$0xff]  ;;  %397 = vperm.xlu1 %3386, %v3866_v6   ;;  %488 = vperm.xlu0 %3389, %v3866_v6   ;;  %6271 = vst [vmem:[#allocation12_spill] sm:$0xff] %v3880_v10  ;;  %v356_v13 = vrot.slane %v3880_v10, 4  ;;  %v6086_v16 = vmov 5   ;;  %s3615_s23 = smov 111  }
  0x3d   : > { %6270 = vst [vmem:[#allocation11_spill] sm:$0xff] %v3876_v9  ;;  %v355_v11 = vrot.slane %v3876_v9, 4  ;;  %v6073_v17 = vmov 12   ;;  %v6071_v18 = vmov 16   ;;  %v6074_v19 = vmov 14   ;;  %s3633_s19 = smov 112  }
  0x3e   : > { %v3861_v4 = vsub.s32 0, %v3858_v3  ;;  %v3874_v8 = vsub.s32 4, %v3858_v3  ;;  %360 = vst [vmem:[#allocation2 + $0x10] sm:$0xf] %v356_v13  ;;  %v6069_v20 = vmov 17   ;;  %v6072_v21 = vmov 15  }
  0x3f   : > { %359 = vst [vmem:[#allocation2 + $0x8] sm:$0xf] %v355_v11  ;;  %v6068_v22 = vmov 18   ;;  %v6083_v23 = vmov 24   ;;  %v6070_v25 = vmov 19   ;;  %v6082_v29 = vmov 25  }
  0x40   : > { %6268 = vst [vmem:[#allocation9_spill] sm:$0xff] %v3861_v4  ;;  %6269 = vst [vmem:[#allocation10_spill] sm:$0xff] %v3874_v8  ;;  %v715_v12 = vrot.slane %v3871_v7, %v3874_v8  ;;  %3387 = vset.pattern.permute.xlu1 %v6092_v15  ;;  %3397 = vset.pattern.permute.xlu0 %v6086_v16  ;;  %v6078_v30 = vmov 28   ;;  %v6081_v31 = vmov 26   ;;  %v711_v32 = vrot.slane %v3871_v7, %v3861_v4  ;;  %s3634_s25 = smov 96   ;;  %s3649_s16 = smov 113  }
  0x41   : > { %419 = vperm.xlu1 %3387, %v3866_v6   ;;  %v6080_v33 = vmov 27   ;;  %v6090_v35 = vmov 4   ;;  %v6088_v36 = vmov 6   ;;  %v6084_v37 = vmov 7   ;;  %s3651_s27 = smov 127   ;;  %s3652_s29 = smov 126  }
  0x42   : > { %v725_v14 = vrot.slane %v715_v12, %v3861_v4  ;;  %v721_v34 = vrot.slane %v711_v32, %v3861_v4  ;;  %v6077_v38 = vmov 29   ;;  %v6076_v39 = vmov 30   ;;  %v370_v42 = vld [vmem:[#allocation2] sm:$0xf]  ;;  %s3665_s20 = smov 17   ;;  %p6631_p11 = scmp.ne.s32.totalorder %s6263_s21, 0 }
  0x43   : > { %v3944_v43 = vsub.s32 1, %v3858_v3  ;;  %v3951_v45 = vrot.slane %v370_v42, %v3861_v4  ;;  %v3954_v46 = vsub.s32 2, %v3858_v3  ;;  %v3977_v58 = vsub.s32 3, %v3858_v3 }
  0x44   : > { %730 = vrot.lane.b32.xlu0 %v725_v14, %s3615_s23  ;;  %v6107_v8 = vmov 8   ;;  %vm478_vm0 = vcmask 916480   ;;  %vm590_vm1 = vcmask 785408   ;;  %vm1229_vm2 = vcmask 924672  }
  0x45   : > { %3388 = vset.pattern.permute.xlu1 %v6073_v17  ;;  %v3909_v26 = vld [vmem:[#allocation2 + $0x10] sm:$0xf]  ;;  %6274 = vst [vmem:[#allocation15_spill] sm:$0xff] %v3944_v43  ;;  %6275 = vst [vmem:[#allocation16_spill] sm:$0xff] %v3954_v46  ;;  %v3970_v54 = vrot.slane %v370_v42, %v3944_v43  ;;  %v3973_v55 = vrot.slane %v370_v42, %v3954_v46  ;;  %v3995_v5 = vrot.slane %v370_v42, %v3977_v58  ;;  %vm732_vm3 = vcmask 908288  }
  0x46   : > { %463 = vperm.xlu1 %3388, %v3866_v6   ;;  %v3906_v24 = vld [vmem:[#allocation2 + $0x8] sm:$0xf]  ;;  %v3913_v28 = vld [vmem:[#allocation2 + $0x10] sm:$0xf]  ;;  %v3958_v49 = vrot.slane %v3909_v26, %v3944_v43  ;;  %v3964_v52 = vrot.slane %v3909_v26, %v3861_v4  ;;  %6276 = vst [vmem:[#allocation17_spill] sm:$0xff] %v3977_v58  ;;  %v3985_v61 = vrot.slane %v3909_v26, %v3954_v46  ;;  %vm964_vm4 = vcmask 1039360  }
  0x47   : > { %v3911_v27 = vld [vmem:[#allocation2 + $0x8] sm:$0xf]  ;;  %1259 = vst [vmem:[#allocation2 + $0x10] sm:$0xf] %v3880_v10  ;;  %v3948_v44 = vrot.slane %v3906_v24, %v3861_v4  ;;  %v3989_v63 = vrot.slane %v3906_v24, %v3944_v43  ;;  %v4000_v12 = vrot.slane %v3906_v24, %v3954_v46  ;;  %v4012_v42 = vrot.slane %v3906_v24, %v3977_v58 }
  0x48   : > { %754 = vperm.xlu0 %3397, %v3866_v6   ;;  %1258 = vst [vmem:[#allocation2 + $0x8] sm:$0xf] %v3876_v9  ;;  %vm1246_vm5 = vcmask 1031168   ;;  %vm1272_vm6 = vcmask 138240  }
  0x4a   : > { %3390 = vset.pattern.permute.xlu1 %v6074_v19 }
  0x4b   : > { %512 = vperm.xlu1 %3390, %v3866_v6  }
  0x4c   : > { %3400 = vset.pattern.permute.xlu0 %v6071_v18 }
  0x4d   : > { %784 = vperm.xlu0 %3400, %v3866_v6  }
  0x4f   : > { %3391 = vset.pattern.permute.xlu1 %v6072_v21 }
  0x50   : > { %536 = vperm.xlu1 %3391, %v3866_v6  }
  0x51   : > { %3401 = vset.pattern.permute.xlu0 %v6069_v20 }
  0x52   : > { %803 = vperm.xlu0 %3401, %v3866_v6  }
  0x54   : > { %3392 = vset.pattern.permute.xlu1 %v6083_v23 }
  0x55   : > { %563 = vperm.xlu1 %3392, %v3866_v6  }
  0x56   : > { %3402 = vset.pattern.permute.xlu0 %v6068_v22 }
  0x57   : > { %822 = vperm.xlu0 %3402, %v3866_v6  }
  0x59   : > { %3393 = vset.pattern.permute.xlu1 %v6082_v29 }
  0x5a   : > { %600 = vperm.xlu1 %3393, %v3866_v6  }
  0x5b   : > { %3403 = vset.pattern.permute.xlu0 %v6070_v25 }
  0x5c   : > { %841 = vperm.xlu0 %3403, %v3866_v6  }
  0x5e   : > { %3394 = vset.pattern.permute.xlu1 %v6081_v31 }
  0x5f   : > { %636 = vperm.xlu1 %3394, %v3866_v6  }
  0x60   : > { %3404 = vset.pattern.permute.xlu0 %v6078_v30 }
  0x61   : > { %860 = vperm.xlu0 %3404, %v3866_v6  }
  0x63   : > { %3395 = vset.pattern.permute.xlu1 %v6080_v33 }
  0x64   : > { %672 = vperm.xlu1 %3395, %v3866_v6  }
  0x65   : > { %3408 = vset.pattern.permute.xlu0 %v6107_v8  ;;  %v6111_v8 = vmov 20  }
  0x68   : > { %728 = vrot.lane.b32.xlu1 %v721_v34, %s3615_s23  ;;  %v4008_v34 = vrot.slane %v3909_v26, %v3977_v58  ;;  %v4024_v26 = vrot.slane %v3913_v28, %v3861_v4 }
  0x69   : > { %3396 = vset.pattern.permute.xlu1 %v6090_v35 }
  0x6c   : > { %744 = vperm.xlu1 %3396, %v3866_v6  }
  0x70   : > { %3398 = vset.pattern.permute.xlu1 %v6088_v36 }
  0x71   : > { %764 = vperm.xlu1 %3398, %v3866_v6  }
  0x75   : > { %3399 = vset.pattern.permute.xlu1 %v6084_v37 }
  0x76   : > { %774 = vperm.xlu1 %3399, %v3866_v6  }
  0x7a   : > { %3405 = vset.pattern.permute.xlu1 %v6077_v38 }
  0x7b   : > { %884 = vperm.xlu1 %3405, %v3866_v6  }
  0x7f   : > { %3406 = vset.pattern.permute.xlu1 %v6076_v39 }
  0xbb   : > { %v3939_v40 = vpop.permute.xlu1 %397  ;;  %v489_v48 = vpop.permute.xlu0 %488 }
  0xbc   : > { %6272 = vst [vmem:[#allocation13_spill] sm:$0xff] %v3939_v40  ;;  %v493_v53 = vmul.f32 %v489_v48, %v3958_v49  ;;  %v491_v60 = vmul.f32 %v489_v48, %v3970_v54  ;;  %v492_v11 = vmul.f32 %v489_v48, %v3989_v63 }
  0xc0   : > { %v3941_v41 = vpop.permute.xlu1 %419 }
  0xc1   : > { %6273 = vst [vmem:[#allocation14_spill] sm:$0xff] %v3941_v41 }
  0xc5   : > { %v464_v47 = vpop.permute.xlu1 %463 }
  0xc6   : > { %v467_v50 = vmul.f32 %v464_v47, %v3948_v44  ;;  %v466_v51 = vmul.f32 %v464_v47, %v3951_v45  ;;  %v468_v56 = vmul.f32 %v464_v47, %v3964_v52 }
  0xc8   : > { %474 = vrot.lane.b32.xlu0 %v467_v50, %s3633_s19  ;;  %472 = vrot.lane.b32.xlu1 %v466_v51, %s3633_s19  ;;  %v4020_v51 = vrot.slane %v3911_v27, %v3861_v4 }
  0xca   : > { %v513_v57 = vpop.permute.xlu1 %512 }
  0xcb   : > { %v515_v59 = vmul.f32 %v513_v57, %v3973_v55  ;;  %v517_v2 = vmul.f32 %v513_v57, %v3985_v61  ;;  %v516_v32 = vmul.f32 %v513_v57, %v4000_v12 }
  0xcc   : > { %501 = vrot.lane.b32.xlu0 %v493_v53, %s3633_s19  ;;  %476 = vrot.lane.b32.xlu1 %v468_v56, %s3633_s19  ;;  %v561_v53 = vld [vmem:[#allocation2 + $0x18] sm:$0xf] }
  0xcd   : > { %v4062_v22 = vrot.slane %v561_v53, %v3944_v43  ;;  %v4081_v17 = vrot.slane %v561_v53, %v3954_v46  ;;  %v4098_v38 = vrot.slane %v561_v53, %v3977_v58 }
  0xcf   : > { %v537_v62 = vpop.permute.xlu1 %536 }
  0xd0   : > { %521 = vrot.lane.b32.xlu0 %v515_v59, %s3633_s19  ;;  %497 = vrot.lane.b32.xlu1 %v491_v60, %s3633_s19  ;;  %v539_v14 = vmul.f32 %v537_v62, %v3995_v5  ;;  %v541_v48 = vmul.f32 %v537_v62, %v4008_v34  ;;  %v540_v50 = vmul.f32 %v537_v62, %v4012_v42  ;;  %v4037_v62 = vpop.permute.xlu0 %730 }
  0xd1   : > { %v4031_v59 = vrot.slane %v561_v53, %v3861_v4  ;;  %v4035_v60 = vrot.slane %v3913_v28, %v3944_v43  ;;  %6277 = vst [vmem:[#allocation18_spill] sm:$0xff] %v4037_v62  ;;  %v6139_v4 = vmov 23  }
  0xd4   : > { %525 = vrot.lane.b32.xlu0 %v517_v2, %s3633_s19  ;;  %499 = vrot.lane.b32.xlu1 %v492_v11, %s3633_s19  ;;  %v564_v13 = vpop.permute.xlu1 %563  ;;  %v4043_v2 = vrot.slane %v3913_v28, %v3954_v46 }
  0xd5   : > { %v578_v56 = vmul.f32 %v4020_v51, %v564_v13  ;;  %v579_v57 = vmul.f32 %v4024_v26, %v564_v13  ;;  %v580_v11 = vmul.f32 %v4031_v59, %v564_v13 }
  0xd8   : > { %545 = vrot.lane.b32.xlu0 %v539_v14, %s3633_s19  ;;  %523 = vrot.lane.b32.xlu1 %v516_v32, %s3633_s19  ;;  %v4049_v32 = vrot.slane %v3911_v27, %v3944_v43 }
  0xd9   : > { %v601_v47 = vpop.permute.xlu1 %600 }
  0xda   : > { %v616_v14 = vmul.f32 %v4035_v60, %v601_v47  ;;  %v615_v13 = vmul.f32 %v4049_v32, %v601_v47  ;;  %v617_v25 = vmul.f32 %v4062_v22, %v601_v47 }
  0xdc   : > { %549 = vrot.lane.b32.xlu0 %v541_v48, %s3633_s19  ;;  %547 = vrot.lane.b32.xlu1 %v540_v50, %s3633_s19  ;;  %v4051_v50 = vpop.permute.xlu0 %754 }
  0xde   : > { %v637_v24 = vpop.permute.xlu1 %636 }
  0xe0   : > { %584 = vrot.lane.b32.xlu0 %v578_v56, %s3634_s25  ;;  %586 = vrot.lane.b32.xlu1 %v579_v57, %s3634_s25  ;;  %v652_v56 = vmul.f32 %v4043_v2, %v637_v24  ;;  %v4058_v57 = vrot.slane %v3913_v28, %v3977_v58  ;;  %v4072_v28 = vrot.slane %v3911_v27, %v3954_v46 }
  0xe3   : > { %v673_v48 = vpop.permute.xlu1 %672 }
  0xe4   : > { %588 = vrot.lane.b32.xlu0 %v580_v11, %s3634_s25  ;;  %623 = vrot.lane.b32.xlu1 %v616_v14, %s3634_s25  ;;  %v688_v11 = vmul.f32 %v4058_v57, %v673_v48  ;;  %v785_v14 = vpop.permute.xlu0 %784 }
  0xe5   : > { %v787_v18 = vmul.f32 %v785_v14, %v3948_v44  ;;  %v788_v19 = vmul.f32 %v785_v14, %v3964_v52 }
  0xe7   : > { %v4064_v20 = vpop.permute.xlu1 %728 }
  0xe8   : > { %6278 = vst [vmem:[#allocation19_spill] sm:$0xff] %v4064_v20  ;;  %621 = vrot.lane.b32.xlu0 %v615_v13, %s3634_s25  ;;  %659 = vrot.lane.b32.xlu1 %v652_v56, %s3634_s25  ;;  %v804_v13 = vpop.permute.xlu0 %803  ;;  %v651_v56 = vmul.f32 %v4072_v28, %v637_v24 }
  0xe9   : > { %v806_v39 = vmul.f32 %v804_v13, %v3989_v63  ;;  %v807_v14 = vmul.f32 %v804_v13, %v3958_v49 }
  0xeb   : > { %v4077_v21 = vpop.permute.xlu1 %744 }
  0xec   : > { %625 = vrot.lane.b32.xlu0 %v617_v25, %s3634_s25  ;;  %695 = vrot.lane.b32.xlu1 %v688_v11, %s3634_s25  ;;  %v823_v47 = vpop.permute.xlu0 %822  ;;  %v653_v25 = vmul.f32 %v4081_v17, %v637_v24  ;;  %v4089_v11 = vrot.slane %v3911_v27, %v3977_v58 }
  0xf0   : > { %657 = vrot.lane.b32.xlu0 %v651_v56, %s3634_s25  ;;  %791 = vrot.lane.b32.xlu1 %v787_v18, %s3633_s19  ;;  %v4091_v1 = vpop.permute.xlu1 %764  ;;  %v842_v56 = vpop.permute.xlu0 %841  ;;  %v687_v18 = vmul.f32 %v4089_v11, %v673_v48 }
  0xf4   : > { %661 = vrot.lane.b32.xlu0 %v653_v25, %s3634_s25  ;;  %793 = vrot.lane.b32.xlu1 %v788_v19, %s3633_s19  ;;  %v861_v24 = vpop.permute.xlu0 %860  ;;  %v689_v25 = vmul.f32 %v4098_v38, %v673_v48  ;;  %v825_v19 = vmul.f32 %v823_v47, %v4000_v12  ;;  %v844_v48 = vmul.f32 %v842_v56, %v4012_v42 }
  0xf5   : > { %v4102_v27 = vpop.permute.xlu1 %774  ;;  %v865_v53 = vmul.f32 %v861_v24, %v4031_v59 }
  0xf8   : > { %693 = vrot.lane.b32.xlu0 %v687_v18, %s3634_s25  ;;  %810 = vrot.lane.b32.xlu1 %v806_v39, %s3633_s19  ;;  %v826_v18 = vmul.f32 %v823_v47, %v3985_v61  ;;  %v864_v47 = vmul.f32 %v861_v24, %v4024_v26 }
  0xfa   : > { %v885_v30 = vpop.permute.xlu1 %884 }
  0xfb   : > { %v887_v39 = vmul.f32 %v885_v30, %v4049_v32  ;;  %v889_v13 = vmul.f32 %v885_v30, %v4062_v22 }
  0xfc   : > { %697 = vrot.lane.b32.xlu0 %v689_v25, %s3634_s25  ;;  %812 = vrot.lane.b32.xlu1 %v807_v14, %s3633_s19  ;;  %v845_v14 = vmul.f32 %v842_v56, %v4008_v34  ;;  %v863_v25 = vmul.f32 %v861_v24, %v4020_v51 }
 0x100   : > { %829 = vrot.lane.b32.xlu1 %v825_v19, %s3633_s19  ;;  %873 = vrot.lane.b32.xlu0 %v865_v53, %s3634_s25  ;;  %v888_v19 = vmul.f32 %v885_v30, %v4035_v60  ;;  %v6079_v53 = vmov 31  }
 0x104   : > { %831 = vrot.lane.b32.xlu1 %v826_v18, %s3633_s19  ;;  %893 = vrot.lane.b32.xlu0 %v887_v39, %s3634_s25 }
 0x108   : > { %848 = vrot.lane.b32.xlu1 %v844_v48, %s3633_s19  ;;  %897 = vrot.lane.b32.xlu0 %v889_v13, %s3634_s25 }
 0x10c   : > { %850 = vrot.lane.b32.xlu1 %v845_v14, %s3633_s19 }
 0x110   : > { %869 = vrot.lane.b32.xlu1 %v863_v25, %s3634_s25 }
 0x114   : > { %871 = vrot.lane.b32.xlu1 %v864_v47, %s3634_s25 }
 0x118   : > { %895 = vrot.lane.b32.xlu1 %v888_v19, %s3634_s25 }
 0x11c   : > { %908 = vperm.xlu1 %3406, %v3866_v6  }
 0x120   : > { %3407 = vset.pattern.permute.xlu1 %v6079_v53 }
 0x13a   : > { %v4130_v56 = vpop.permute.xlu1 %472 }
 0x13b   : > { %6279 = vst [vmem:[#allocation20_spill] sm:$0xff] %v4130_v56  ;;  %v6109_v56 = vmov 9  }
 0x13e   : > { %v4132_v39 = vpop.permute.xlu1 %476 }
 0x13f   : > { %6280 = vst [vmem:[#allocation21_spill] sm:$0xff] %v4132_v39 }
 0x142   : > { %v4134_v18 = vpop.permute.xlu1 %497 }
 0x143   : > { %6281 = vst [vmem:[#allocation22_spill] sm:$0xff] %v4134_v18 }
 0x146   : > { %v4136_v48 = vpop.permute.xlu1 %499 }
 0x147   : > { %6282 = vst [vmem:[#allocation23_spill] sm:$0xff] %v4136_v48 }
 0x14a   : > { %v4138_v24 = vpop.permute.xlu1 %523 }
 0x14b   : > { %6283 = vst [vmem:[#allocation24_spill] sm:$0xff] %v4138_v24 }
 0x14e   : > { %v4140_v13 = vpop.permute.xlu1 %547 }
 0x14f   : > { %6284 = vst [vmem:[#allocation25_spill] sm:$0xff] %v4140_v13 }
 0x152   : > { %v4142_v30 = vpop.permute.xlu1 %586 }
 0x153   : > { %6285 = vst [vmem:[#allocation26_spill] sm:$0xff] %v4142_v30 }
 0x156   : > { %v4144_v14 = vpop.permute.xlu1 %623 }
 0x157   : > { %6286 = vst [vmem:[#allocation27_spill] sm:$0xff] %v4144_v14 }
 0x15a   : > { %v4146_v25 = vpop.permute.xlu1 %659 }
 0x15b   : > { %6287 = vst [vmem:[#allocation28_spill] sm:$0xff] %v4146_v25  ;;  %v6120_v25 = vmov 0  }
 0x15e   : > { %v4148_v47 = vpop.permute.xlu1 %695 }
 0x15f   : > { %6288 = vst [vmem:[#allocation29_spill] sm:$0xff] %v4148_v47 }
 0x162   : > { %v4150_v19 = vpop.permute.xlu1 %791 }
 0x166   : > { %v4152_v53 = vpop.permute.xlu1 %793 }
 0x16a   : > { %v4154_v33 = vpop.permute.xlu1 %810 }
 0x16e   : > { %v4156_v31 = vpop.permute.xlu1 %812 }
 0x172   : > { %v4158_v29 = vpop.permute.xlu1 %829 }
 0x176   : > { %v4160_v23 = vpop.permute.xlu1 %831 }
 0x17a   : > { %v4162_v37 = vpop.permute.xlu1 %848 }
 0x17e   : > { %v4164_v16 = vpop.permute.xlu1 %850 }
 0x182   : > { %v4166_v36 = vpop.permute.xlu1 %869 }
 0x186   : > { %v4168_v35 = vpop.permute.xlu1 %871 }
 0x18a   : > { %v4170_v15 = vpop.permute.xlu1 %895 }
 0x19b   : > { %v909_v0 = vpop.permute.xlu1 %908 }
 0x19c   : > { %v912_v10 = vmul.f32 %v909_v0, %v4043_v2  ;;  %v911_v9 = vmul.f32 %v909_v0, %v4072_v28  ;;  %v913_v18 = vmul.f32 %v909_v0, %v4081_v17 }
 0x19e   : > { %919 = vrot.lane.b32.xlu1 %v912_v10, %s3634_s25  ;;  %917 = vrot.lane.b32.xlu0 %v911_v9, %s3634_s25  ;;  %v6108_v9 = vmov 10  }
 0x1a2   : > { %932 = vperm.xlu1 %3407, %v3866_v6   ;;  %921 = vrot.lane.b32.xlu0 %v913_v18, %s3634_s25  ;;  %v6110_v18 = vmov 11  }
 0x1a6   : > { %3409 = vset.pattern.permute.xlu1 %v6109_v56 }
 0x210   : > { %v4181_v58 = vpop.permute.xlu1 %919 }
 0x221   : > { %v933_v43 = vpop.permute.xlu1 %932 }
 0x222   : > { %v936_v20 = vmul.f32 %v933_v43, %v4058_v57  ;;  %v935_v10 = vmul.f32 %v933_v43, %v4089_v11  ;;  %v937_v0 = vmul.f32 %v933_v43, %v4098_v38 }
 0x224   : > { %943 = vrot.lane.b32.xlu1 %v936_v20, %s3634_s25  ;;  %941 = vrot.lane.b32.xlu0 %v935_v10, %s3634_s25  ;;  %v6113_v20 = vmov 21  }
 0x228   : > { %984 = vperm.xlu1 %3409, %v3866_v6   ;;  %945 = vrot.lane.b32.xlu0 %v937_v0, %s3634_s25 }
 0x22c   : > { %3410 = vset.pattern.permute.xlu1 %v6108_v9  ;;  %974 = vperm.xlu0 %3408, %v3866_v6  }
 0x22d   : > { %994 = vperm.xlu1 %3410, %v3866_v6  }
 0x230   : > { %3411 = vset.pattern.permute.xlu0 %v6110_v18 }
 0x231   : > { %3412 = vset.pattern.permute.xlu1 %v6111_v8  ;;  %1004 = vperm.xlu0 %3411, %v3866_v6   ;;  %v4208_v8 = vpop.permute.xlu0 %474 }
 0x232   : > { %1014 = vperm.xlu1 %3412, %v3866_v6   ;;  %6289 = vst [vmem:[#allocation30_spill] sm:$0xff] %v4208_v8 }
 0x235   : > { %3413 = vset.pattern.permute.xlu0 %v6113_v20  ;;  %v362_v20 = vld [vmem:[%s6061_s4] sm:$0xf]  ;;  %v4216_v47 = vpop.permute.xlu0 %501 }
 0x236   : > { %6290 = vst [vmem:[#allocation31_spill] sm:$0xff] %v4216_v47 }
 0x296   : > { %v4198_v43 = vpop.permute.xlu1 %943 }
 0x2a7   : > { %v4200_v10 = vpop.permute.xlu1 %984 }
 0x2ac   : > { %v4202_v0 = vpop.permute.xlu1 %994 }
 0x2b1   : > { %v1015_v9 = vpop.permute.xlu1 %1014 }
 0x2b2   : > { %v1017_v56 = vmul.f32 %v1015_v9, %v4020_v51  ;;  %v1018_v18 = vmul.f32 %v1015_v9, %v4024_v26  ;;  %v1019_v62 = vmul.f32 %v1015_v9, %v4031_v59 }
 0x2b4   : > { %1023 = vrot.lane.b32.xlu1 %v1017_v56, %s3633_s19  ;;  %1025 = vrot.lane.b32.xlu0 %v1018_v18, %s3633_s19  ;;  %v4219_v56 = vpop.permute.xlu0 %521  ;;  %v6123_v18 = vmov 22  }
 0x2b5   : > { %6291 = vst [vmem:[#allocation32_spill] sm:$0xff] %v4219_v56  ;;  %3415 = vset.pattern.permute.xlu1 %v6123_v18 }
 0x2b8   : > { %1027 = vrot.lane.b32.xlu1 %v1019_v62, %s3633_s19  ;;  %1038 = vperm.xlu0 %3413, %v3866_v6   ;;  %v4223_v62 = vpop.permute.xlu0 %525 }
 0x2b9   : > { %6292 = vst [vmem:[#allocation33_spill] sm:$0xff] %v4223_v62 }
 0x2bc   : > { %3414 = vset.pattern.permute.xlu0 %v6120_v25  ;;  %v4225_v9 = vpop.permute.xlu0 %545 }
 0x2bd   : > { %366 = vperm.xlu0 %3414, %v362_v20   ;;  %6293 = vst [vmem:[#allocation34_spill] sm:$0xff] %v4225_v9 }
 0x2c0   : > { %v4227_v14 = vpop.permute.xlu0 %549 }
 0x2c1   : > { %375 = vperm.xlu0 %3414, %v3866_v6   ;;  %6294 = vst [vmem:[#allocation35_spill] sm:$0xff] %v4227_v14 }
 0x2c4   : > { %v4229_v30 = vpop.permute.xlu0 %584 }
 0x2c5   : > { %6295 = vst [vmem:[#allocation36_spill] sm:$0xff] %v4229_v30 }
 0x2c8   : > { %v4231_v13 = vpop.permute.xlu0 %588 }
 0x2c9   : > { %6296 = vst [vmem:[#allocation37_spill] sm:$0xff] %v4231_v13 }
 0x2cc   : > { %v4233_v24 = vpop.permute.xlu0 %621 }
 0x2cd   : > { %6297 = vst [vmem:[#allocation38_spill] sm:$0xff] %v4233_v24 }
 0x2d0   : > { %v4235_v20 = vpop.permute.xlu0 %625 }
 0x2d1   : > { %6298 = vst [vmem:[#allocation39_spill] sm:$0xff] %v4235_v20 }
 0x2d4   : > { %v4237_v25 = vpop.permute.xlu0 %657 }
 0x2d5   : > { %6299 = vst [vmem:[#allocation40_spill] sm:$0xff] %v4237_v25 }
 0x2d8   : > { %v4239_v56 = vpop.permute.xlu0 %661 }
 0x2d9   : > { %6300 = vst [vmem:[#allocation41_spill] sm:$0xff] %v4239_v56 }
 0x2dc   : > { %v4241_v48 = vpop.permute.xlu0 %693 }
 0x2dd   : > { %6301 = vst [vmem:[#allocation42_spill] sm:$0xff] %v4241_v48 }
 0x2e0   : > { %v4243_v18 = vpop.permute.xlu0 %697 }
 0x2e1   : > { %6302 = vst [vmem:[#allocation43_spill] sm:$0xff] %v4243_v18 }
 0x2e4   : > { %v4245_v62 = vpop.permute.xlu0 %873 }
 0x2e8   : > { %v4247_v9 = vpop.permute.xlu0 %893 }
 0x2ec   : > { %v4249_v14 = vpop.permute.xlu0 %897 }
 0x2f0   : > { %v4251_v30 = vpop.permute.xlu0 %917 }
 0x2f4   : > { %v4253_v13 = vpop.permute.xlu0 %921 }
 0x2f8   : > { %v4255_v24 = vpop.permute.xlu0 %941 }
 0x2fc   : > { %v4257_v20 = vpop.permute.xlu0 %945 }
 0x300   : > { %v4259_v25 = vpop.permute.xlu0 %974 }
 0x304   : > { %v4261_v56 = vpop.permute.xlu0 %1004 }
 0x305   : > { %6303 = vst [vmem:[#allocation44_spill] sm:$0xff] %v4261_v56 }
 0x326   : > { %v4263_v48 = vpop.permute.xlu0 %1025  ;;  %v4273_v41 = vpop.permute.xlu1 %1023 }
 0x327   : > { %6304 = vst [vmem:[#allocation45_spill] sm:$0xff] %v4263_v48  ;;  %6305 = vst [vmem:[#allocation46_spill] sm:$0xff] %v4273_v41 }
 0x32a   : > { %v4275_v40 = vpop.permute.xlu1 %1027 }
 0x32b   : > { %6306 = vst [vmem:[#allocation47_spill] sm:$0xff] %v4275_v40 }
 0x337   : > { %v1039_v18 = vpop.permute.xlu0 %1038 }
 0x338   : > { %v1043_v47 = vmul.f32 %v1039_v18, %v4062_v22  ;;  %v1041_v8 = vmul.f32 %v1039_v18, %v4049_v32  ;;  %v1042_v39 = vmul.f32 %v1039_v18, %v4035_v60 }
 0x33a   : > { %1051 = vrot.lane.b32.xlu0 %v1043_v47, %s3633_s19  ;;  %1047 = vrot.lane.b32.xlu1 %v1041_v8, %s3633_s19 }
 0x33e   : > { %1049 = vrot.lane.b32.xlu1 %v1042_v39, %s3633_s19 }
 0x342   : > { %1062 = vperm.xlu1 %3415, %v3866_v6  }
 0x346   : > { %3416 = vset.pattern.permute.xlu1 %v6139_v4  ;;  %v6143_v4 = vmov 32  }
 0x3ac   : > { %v4277_v48 = vpop.permute.xlu1 %1047 }
 0x3ad   : > { %6307 = vst [vmem:[#allocation48_spill] sm:$0xff] %v4277_v48 }
 0x3b0   : > { %v4279_v56 = vpop.permute.xlu1 %1049 }
 0x3b1   : > { %6308 = vst [vmem:[#allocation49_spill] sm:$0xff] %v4279_v56 }
 0x3c1   : > { %v1063_v47 = vpop.permute.xlu1 %1062 }
 0x3c2   : > { %v1066_v8 = vmul.f32 %v1063_v47, %v4043_v2  ;;  %v1065_v18 = vmul.f32 %v1063_v47, %v4072_v28  ;;  %v1067_v39 = vmul.f32 %v1063_v47, %v4081_v17 }
 0x3c4   : > { %1073 = vrot.lane.b32.xlu1 %v1066_v8, %s3633_s19  ;;  %1071 = vrot.lane.b32.xlu0 %v1065_v18, %s3633_s19  ;;  %v6147_v8 = vmov 33  }
 0x3c8   : > { %1086 = vperm.xlu1 %3416, %v3866_v6   ;;  %1075 = vrot.lane.b32.xlu0 %v1067_v39, %s3633_s19 }
 0x3cc   : > { %3417 = vset.pattern.permute.xlu1 %v6143_v4 }
 0x436   : > { %v4289_v48 = vpop.permute.xlu1 %1073 }
 0x437   : > { %6309 = vst [vmem:[#allocation50_spill] sm:$0xff] %v4289_v48 }
 0x447   : > { %v1087_v56 = vpop.permute.xlu1 %1086 }
 0x448   : > { %v1090_v40 = vmul.f32 %v1087_v56, %v4058_v57  ;;  %v1089_v41 = vmul.f32 %v1087_v56, %v4089_v11  ;;  %v1091_v47 = vmul.f32 %v1087_v56, %v4098_v38 }
 0x44a   : > { %1097 = vrot.lane.b32.xlu1 %v1090_v40, %s3633_s19  ;;  %1095 = vrot.lane.b32.xlu0 %v1089_v41, %s3633_s19  ;;  %v6146_v41 = vmov 34  }
 0x44e   : > { %1110 = vperm.xlu1 %3417, %v3866_v6   ;;  %1099 = vrot.lane.b32.xlu0 %v1091_v47, %s3633_s19 }
 0x452   : > { %3418 = vset.pattern.permute.xlu1 %v6147_v8  ;;  %v769_v8 = vmul.f32 %v4091_v1, %v3985_v61 }
 0x4bc   : > { %v4299_v18 = vpop.permute.xlu1 %1097 }
 0x4cd   : > { %v1111_v39 = vpop.permute.xlu1 %1110 }
 0x4ce   : > { %v1114_v4 = vmul.f32 %v1111_v39, %v4024_v26  ;;  %v1113_v48 = vmul.f32 %v1111_v39, %v4020_v51  ;;  %v1115_v40 = vmul.f32 %v1111_v39, %v4031_v59  ;;  %v6145_v59 = vmov 35  }
 0x4d0   : > { %1121 = vrot.lane.b32.xlu1 %v1114_v4, %s3634_s25  ;;  %1119 = vrot.lane.b32.xlu0 %v1113_v48, %s3634_s25 }
 0x4d4   : > { %1134 = vperm.xlu1 %3418, %v3866_v6   ;;  %1123 = vrot.lane.b32.xlu0 %v1115_v40, %s3634_s25  ;;  %v6310_v40 = vmov 0  }
 0x4d8   : > { %3419 = vset.pattern.permute.xlu1 %v6146_v41 }
 0x542   : > { %v4309_v56 = vpop.permute.xlu1 %1121 }
 0x553   : > { %v1135_v47 = vpop.permute.xlu1 %1134 }
 0x554   : > { %v1138_v26 = vmul.f32 %v1135_v47, %v4035_v60  ;;  %v1137_v51 = vmul.f32 %v1135_v47, %v4049_v32  ;;  %v1139_v4 = vmul.f32 %v1135_v47, %v4062_v22 }
 0x556   : > { %1145 = vrot.lane.b32.xlu1 %v1138_v26, %s3634_s25  ;;  %1143 = vrot.lane.b32.xlu0 %v1137_v51, %s3634_s25  ;;  %v1208_v26 = vrot.slane %v3871_v7, %v3954_v46 }
 0x55a   : > { %1158 = vperm.xlu1 %3419, %v3866_v6   ;;  %1147 = vrot.lane.b32.xlu0 %v1139_v4, %s3634_s25 }
 0x55e   : > { %3420 = vset.pattern.permute.xlu1 %v6145_v59  ;;  %v749_v59 = vmul.f32 %v4077_v21, %v3964_v52 }
 0x5c8   : > { %v4319_v48 = vpop.permute.xlu1 %1145 }
 0x5d9   : > { %v1159_v39 = vpop.permute.xlu1 %1158 }
 0x5da   : > { %v1162_v60 = vmul.f32 %v1159_v39, %v4043_v2  ;;  %v1161_v32 = vmul.f32 %v1159_v39, %v4072_v28  ;;  %v1163_v22 = vmul.f32 %v1159_v39, %v4081_v17  ;;  %v4334_v2 = vsub.s32 6, %v3858_v3 }
 0x5db   : > { %v1218_v17 = vrot.slane %v1208_v26, %v3954_v46  ;;  %v778_v26 = vmul.f32 %v4102_v27, %v4012_v42 }
 0x5dc   : > { %1169 = vrot.lane.b32.xlu1 %v1162_v60, %s3634_s25  ;;  %1167 = vrot.lane.b32.xlu0 %v1161_v32, %s3634_s25  ;;  %6311 = vst [vmem:[#allocation51_spill] sm:$0xff] %v4334_v2  ;;  %v1212_v39 = vrot.slane %v3871_v7, %v4334_v2  ;;  %v748_v32 = vmul.f32 %v4077_v21, %v3948_v44 }
 0x5dd   : > { %v768_v7 = vmul.f32 %v4091_v1, %v4000_v12 }
 0x5e0   : > { %1182 = vperm.xlu1 %3420, %v3866_v6   ;;  %1171 = vrot.lane.b32.xlu0 %v1163_v22, %s3634_s25  ;;  %v758_v22 = vmul.f32 %v4051_v50, %v3989_v63 }
 0x5e4   : > { %3421 = vset.pattern.permute.xlu1 %v6310_v40 }
 0x64e   : > { %v4329_v47 = vpop.permute.xlu1 %1169 }
 0x65f   : > { %v1183_v28 = vpop.permute.xlu1 %1182 }
 0x660   : > { %v1186_v51 = vmul.f32 %v1183_v28, %v4058_v57  ;;  %v1185_v4 = vmul.f32 %v1183_v28, %v4089_v11  ;;  %v1187_v60 = vmul.f32 %v1183_v28, %v4098_v38  ;;  %v1222_v57 = vrot.slane %v1212_v39, %v3954_v46  ;;  %v1280_v11 = vld [vmem:[%s6063_s6] sm:$0xf] }
 0x661   : > { %v761_v38 = vadd.f32 %v758_v22, %v748_v32  ;;  %v747_v28 = vmul.f32 %v4077_v21, %v3951_v45  ;;  %v767_v39 = vmul.f32 %v4091_v1, %v3973_v55  ;;  %v777_v22 = vmul.f32 %v4102_v27, %v3995_v5 }
 0x662   : > { %1193 = vrot.lane.b32.xlu1 %v1186_v51, %s3634_s25  ;;  %1191 = vrot.lane.b32.xlu0 %v1185_v4, %s3634_s25  ;;  %v4364_v51 = vld [vmem:[%s6062_s5] sm:$0xf]  ;;  %v852_v21 = vsel %vm478_vm0, %v4162_v37, %v4164_v16  ;;  %v875_v1 = vsel %vm590_vm1, %v4166_v36, %v4168_v35 }
 0x663   : > { %v771_v4 = vadd.f32 %v768_v7, %v761_v38  ;;  %v814_v7 = vsel %vm478_vm0, %v4154_v33, %v4156_v31 }
 0x665   : > { %v781_v32 = vadd.f32 %v778_v26, %v771_v4  ;;  %v833_v26 = vsel %vm478_vm0, %v4158_v29, %v4160_v23 }
 0x666   : > { %1225 = vrot.lane.b32.xlu1 %v1218_v17, %s3649_s16  ;;  %1195 = vrot.lane.b32.xlu0 %v1187_v60, %s3634_s25  ;;  %v757_v17 = vmul.f32 %v4051_v50, %v3970_v54  ;;  %v795_v60 = vsel %vm478_vm0, %v4150_v19, %v4152_v53 }
 0x667   : > { %v800_v38 = vadd.f32 %v795_v60, %v781_v32  ;;  %v779_v32 = vmul.f32 %v4102_v27, %v4008_v34 }
 0x669   : > { %v819_v4 = vadd.f32 %v814_v7, %v800_v38  ;;  %v6314_v38 = vmov 4  }
 0x66a   : > { %1284 = vperm.xlu1 %3421, %v1280_v11   ;;  %1227 = vrot.lane.b32.xlu0 %v1222_v57, %s3649_s16  ;;  %v6312_v57 = vmov 1   ;;  %v760_v11 = vadd.f32 %v757_v17, %v747_v28  ;;  %v759_v28 = vmul.f32 %v4051_v50, %v3958_v49  ;;  %v6148_v17 = vmov 3  }
 0x66b   : > { %v838_v60 = vadd.f32 %v833_v26, %v819_v4  ;;  %v6315_v4 = vmov 6  }
 0x66c   : > { %v770_v41 = vadd.f32 %v767_v39, %v760_v11  ;;  %v6313_v39 = vmov 2   ;;  %v762_v50 = vadd.f32 %v759_v28, %v749_v59  ;;  %v947_v28 = vsel %vm590_vm1, %v4255_v24, %v4198_v43 }
 0x66e   : > { %3423 = vset.pattern.permute.xlu1 %v6312_v57  ;;  %1293 = vperm.xlu0 %3414, %v4364_v51   ;;  %v780_v40 = vadd.f32 %v777_v22, %v770_v41  ;;  %v857_v41 = vadd.f32 %v852_v21, %v838_v60  ;;  %v772_v22 = vadd.f32 %v769_v8, %v762_v50  ;;  %v6316_v50 = vmov 5  }
 0x66f   : > { %1315 = vperm.xlu1 %3423, %v4364_v51  }
 0x670   : > { %v799_v11 = vadd.f32 %v4150_v19, %v780_v40  ;;  %v881_v59 = vadd.f32 %v875_v1, %v857_v41  ;;  %v782_v27 = vadd.f32 %v779_v32, %v772_v22  ;;  %v923_v40 = vsel %vm590_vm1, %v4251_v30, %v4181_v58 }
 0x671   : > { %v6317_v1 = vmov 9   ;;  %v6318_v41 = vmov 7  }
 0x672   : > { %3422 = vset.pattern.permute.xlu0 %v6148_v17  ;;  %v818_v7 = vadd.f32 %v4154_v33, %v799_v11  ;;  %v801_v33 = vadd.f32 %v4152_v53, %v782_v27  ;;  %v876_v53 = vsel %vm590_vm1, %v4168_v35, %v4245_v62  ;;  %v924_v35 = vsel %vm590_vm1, %v4181_v58, %v4253_v13 }
 0x673   : > { %3424 = vset.pattern.permute.xlu1 %v6313_v39  ;;  %441 = vperm.xlu0 %3422, %v3866_v6   ;;  %v899_v6 = vsel %vm590_vm1, %v4247_v9, %v4170_v15 }
 0x674   : > { %1337 = vperm.xlu1 %3424, %v4364_v51   ;;  %v837_v19 = vadd.f32 %v4158_v29, %v818_v7  ;;  %v905_v8 = vadd.f32 %v899_v6, %v881_v59  ;;  %v820_v29 = vadd.f32 %v4156_v31, %v801_v33 }
 0x676   : > { %v856_v26 = vadd.f32 %v4162_v37, %v837_v19  ;;  %v929_v21 = vadd.f32 %v923_v40, %v905_v8  ;;  %v839_v37 = vadd.f32 %v4160_v23, %v820_v29  ;;  %v987_v40 = vmul.f32 %v4200_v10, %v3970_v54 }
 0x677   : > { %1359 = vperm.xlu0 %3422, %v4364_v51   ;;  %v979_v8 = vmul.f32 %v4259_v25, %v3964_v52 }
 0x678   : > { %3425 = vset.pattern.permute.xlu1 %v6314_v38  ;;  %v880_v60 = vadd.f32 %v4166_v36, %v856_v26  ;;  %v953_v32 = vadd.f32 %v947_v28, %v929_v21  ;;  %v858_v11 = vadd.f32 %v4164_v16, %v839_v37  ;;  %v900_v36 = vsel %vm590_vm1, %v4170_v15, %v4249_v14 }
 0x679   : > { %1381 = vperm.xlu1 %3425, %v4364_v51   ;;  %v6319_v15 = vmov 24   ;;  %v997_v26 = vmul.f32 %v4202_v0, %v3973_v55  ;;  %v989_v28 = vmul.f32 %v4200_v10, %v3958_v49  ;;  %v978_v21 = vmul.f32 %v4259_v25, %v3948_v44 }
 0x67a   : > { %v904_v31 = vadd.f32 %v4247_v9, %v880_v60  ;;  %v882_v23 = vadd.f32 %v876_v53, %v858_v11  ;;  %v948_v9 = vsel %vm590_vm1, %v4198_v43, %v4257_v20  ;;  %v977_v43 = vmul.f32 %v4259_v25, %v3951_v45  ;;  %v6320_v53 = vld [vmem:[#allocation44_spill] sm:$0xff] }
 0x67b   : > { %3427 = vset.pattern.permute.xlu0 %v6315_v4  ;;  %v988_v60 = vmul.f32 %v4200_v10, %v3989_v63  ;;  %v999_v37 = vmul.f32 %v4202_v0, %v3985_v61  ;;  %v1007_v11 = vmul.f32 %v6320_v53, %v3995_v5  ;;  %v1008_v10 = vmul.f32 %v6320_v53, %v4012_v42 }
 0x67c   : > { %1425 = vperm.xlu0 %3427, %v4364_v51   ;;  %v928_v22 = vadd.f32 %v4251_v30, %v904_v31  ;;  %v906_v16 = vadd.f32 %v900_v36, %v882_v23  ;;  %v4449_v30 = vpop.permute.xlu0 %366  ;;  %v990_v33 = vadd.f32 %v987_v40, %v977_v43  ;;  %v998_v36 = vmul.f32 %v4202_v0, %v4000_v12 }
 0x67d   : > { %3426 = vset.pattern.permute.xlu1 %v6316_v50  ;;  %v1009_v23 = vmul.f32 %v6320_v53, %v4008_v34  ;;  %v6326_v53 = vld [vmem:[#allocation50_spill] sm:$0xff]  ;;  %v4696_v38 = vsub.s32 7, %v3858_v3 }
 0x67e   : > { %1403 = vperm.xlu1 %3426, %v4364_v51   ;;  %v952_v62 = vadd.f32 %v4255_v24, %v928_v22  ;;  %v930_v7 = vadd.f32 %v924_v35, %v906_v16  ;;  %v1000_v31 = vadd.f32 %v997_v26, %v990_v33  ;;  %v6325_v26 = vld [vmem:[#allocation49_spill] sm:$0xff] }
 0x680   : > { %960 = vrot.lane.b32.xlu0 %v953_v32, %s3651_s27  ;;  %v954_v14 = vadd.f32 %v948_v9, %v930_v7  ;;  %v4451_v6 = vpop.permute.xlu0 %375  ;;  %v992_v32 = vadd.f32 %v989_v28, %v979_v8  ;;  %v1010_v35 = vadd.f32 %v1007_v11, %v1000_v31  ;;  %v6322_v7 = vld [vmem:[#allocation47_spill] sm:$0xff]  ;;  %v6324_v8 = vld [vmem:[#allocation48_spill] sm:$0xff] }
 0x681   : > { %3446 = vset.pattern.permute.xlu0 %v6317_v1  ;;  %v991_v1 = vadd.f32 %v988_v60, %v978_v21 }
 0x682   : > { %3428 = vset.pattern.permute.xlu1 %v6318_v41  ;;  %v1002_v25 = vadd.f32 %v999_v37, %v992_v32  ;;  %v1053_v32 = vsel %vm478_vm0, %v6324_v8, %v6325_v26 }
 0x683   : > { %1447 = vperm.xlu1 %3428, %v4364_v51   ;;  %v1001_v16 = vadd.f32 %v998_v36, %v991_v1 }
 0x684   : > { %v1052_v58 = vpop.permute.xlu0 %1051  ;;  %v1012_v43 = vadd.f32 %v1009_v23, %v1002_v25 }
 0x685   : > { %v1054_v28 = vsel %vm478_vm0, %v6325_v26, %v1052_v58  ;;  %v1011_v21 = vadd.f32 %v1008_v10, %v1001_v16 }
 0x687   : > { %958 = vrot.lane.b32.xlu1 %v952_v62, %s3651_s27  ;;  %v6321_v62 = vld [vmem:[#allocation46_spill] sm:$0xff] }
 0x688   : > { %3429 = vset.pattern.permute.xlu1 %v6319_v15  ;;  %v1072_v13 = vpop.permute.xlu0 %1071  ;;  %v1034_v9 = vadd.f32 %v6321_v62, %v1010_v35  ;;  %v6323_v15 = vld [vmem:[#allocation45_spill] sm:$0xff] }
 0x689   : > { %v1029_v0 = vsel %vm478_vm0, %v6321_v62, %v6323_v15  ;;  %v1077_v36 = vsel %vm478_vm0, %v1072_v13, %v6326_v53 }
 0x68a   : > { %v1058_v33 = vadd.f32 %v6324_v8, %v1034_v9  ;;  %v1035_v31 = vadd.f32 %v1029_v0, %v1011_v21 }
 0x68b   : > { %962 = vrot.lane.b32.xlu1 %v954_v14, %s3651_s27  ;;  %v1030_v14 = vsel %vm478_vm0, %v6323_v15, %v6322_v7 }
 0x68c   : > { %v1076_v59 = vpop.permute.xlu0 %1075  ;;  %v1036_v60 = vadd.f32 %v1030_v14, %v1012_v43  ;;  %v1082_v37 = vadd.f32 %v1072_v13, %v1058_v33  ;;  %v1059_v58 = vadd.f32 %v1053_v32, %v1035_v31 }
 0x68d   : > { %v1078_v11 = vsel %vm478_vm0, %v6326_v53, %v1076_v59 }
 0x68e   : > { %v1060_v1 = vadd.f32 %v1054_v28, %v1036_v60  ;;  %v1083_v59 = vadd.f32 %v1077_v36, %v1059_v58  ;;  %v6327_v36 = vmov 25   ;;  %v6330_v58 = vmov 28  }
 0x690   : > { %v1096_v24 = vpop.permute.xlu0 %1095  ;;  %v1084_v35 = vadd.f32 %v1078_v11, %v1060_v1 }
 0x691   : > { %v1106_v23 = vadd.f32 %v1096_v24, %v1082_v37  ;;  %v1101_v10 = vsel %vm478_vm0, %v1096_v24, %v4299_v18 }
 0x694   : > { %v1100_v27 = vpop.permute.xlu0 %1099 }
 0x695   : > { %v1102_v25 = vsel %vm478_vm0, %v4299_v18, %v1100_v27  ;;  %v1107_v27 = vadd.f32 %v1101_v10, %v1083_v59  ;;  %v6333_v10 = vmov 31   ;;  %v3655_v59 = vmov 50  }
 0x696   : > { %v1108_v7 = vadd.f32 %v1102_v25, %v1084_v35  ;;  %v6329_v25 = vmov 27   ;;  %v6331_v35 = vmov 29  }
 0x698   : > { %v1120_v19 = vpop.permute.xlu0 %1119 }
 0x699   : > { %v1130_v62 = vadd.f32 %v1120_v19, %v1106_v23  ;;  %v1125_v15 = vsel %vm590_vm1, %v1120_v19, %v4309_v56  ;;  %v6328_v23 = vmov 26  }
 0x69a   : > { %v1131_v33 = vadd.f32 %v1125_v15, %v1107_v27  ;;  %v391_v27 = vmul.f32 %v3948_v44, %v4451_v6  ;;  %v4556_v44 = vld [vmem:[%s6059_s2] sm:$0x77] }
 0x69c   : > { %v1124_v20 = vpop.permute.xlu0 %1123 }
 0x69d   : > { %v1126_v9 = vsel %vm590_vm1, %v4309_v56, %v1124_v20 }
 0x69e   : > { %v1132_v43 = vadd.f32 %v1126_v9, %v1108_v7  ;;  %v3654_v9 = vmov 49   ;;  %v3656_v7 = vmov 51  }
 0x6a0   : > { %v1144_v29 = vpop.permute.xlu0 %1143 }
 0x6a1   : > { %v1154_v13 = vadd.f32 %v1144_v29, %v1130_v62  ;;  %v1149_v18 = vsel %vm590_vm1, %v1144_v29, %v4319_v48  ;;  %v3653_v62 = vmov 48  }
 0x6a2   : > { %v1155_v28 = vadd.f32 %v1149_v18, %v1131_v33  ;;  %v6338_v33 = vld [vmem:[#allocation14_spill] sm:$0xff] }
 0x6a4   : > { %v1148_v22 = vpop.permute.xlu0 %1147 }
 0x6a5   : > { %v1150_v14 = vsel %vm590_vm1, %v4319_v48, %v1148_v22 }
 0x6a6   : > { %v1156_v26 = vadd.f32 %v1150_v14, %v1132_v43  ;;  %v6336_v43 = vld [vmem:[#allocation13_spill] sm:$0xff] }
 0x6a8   : > { %v1168_v40 = vpop.permute.xlu0 %1167 }
 0x6a9   : > { %v1178_v24 = vadd.f32 %v1168_v40, %v1154_v13  ;;  %v1173_v56 = vsel %vm590_vm1, %v1168_v40, %v4329_v47  ;;  %v3657_v13 = vmov 52  }
 0x6aa   : > { %v1179_v48 = vadd.f32 %v1173_v56, %v1155_v28  ;;  %v6339_v28 = vld [vmem:[#allocation9_spill] sm:$0xff] }
 0x6ac   : > { %v1172_v16 = vpop.permute.xlu0 %1171 }
 0x6ad   : > { %v1174_v20 = vsel %vm590_vm1, %v4329_v47, %v1172_v16  ;;  %v6332_v16 = vmov 30  }
 0x6ae   : > { %v1180_v21 = vadd.f32 %v1174_v20, %v1156_v26  ;;  %v435_v26 = vmul.f32 %v4000_v12, %v6338_v33  ;;  %v3660_v12 = vmov 55  }
 0x6d4   : > { %v1194_v0 = vpop.permute.xlu1 %1193  ;;  %v1192_v8 = vpop.permute.xlu0 %1191 }
 0x6d5   : > { %v1202_v19 = vadd.f32 %v1192_v8, %v1178_v24  ;;  %v1197_v32 = vsel %vm590_vm1, %v1192_v8, %v1194_v0  ;;  %v3658_v8 = vmov 53  }
 0x6d6   : > { %v1203_v11 = vadd.f32 %v1197_v32, %v1179_v48  ;;  %v6341_v32 = vld [vmem:[#allocation21_spill] sm:$0xff] }
 0x6d8   : > { %v1226_v22 = vpop.permute.xlu1 %1225  ;;  %v1196_v60 = vpop.permute.xlu0 %1195 }
 0x6d9   : > { %v1234_v37 = vmul.f32 %v1226_v22, %v1202_v19  ;;  %v1198_v53 = vsel %vm590_vm1, %v1194_v0, %v1196_v60  ;;  %v413_v0 = vmul.f32 %v3989_v63, %v6336_v43  ;;  %v3659_v63 = vmov 54  }
 0x6da   : > { %v1204_v29 = vadd.f32 %v1198_v53, %v1180_v21  ;;  %v1955_v21 = vrot.slane %v4556_v44, %v6339_v28 }
 0x6db   : > { %1240 = vrot.lane.b32.xlu1 %v1234_v37, %s3652_s29  ;;  %v416_v24 = vadd.f32 %v413_v0, %v391_v27  ;;  %v6355_v27 = vld [vmem:[#allocation36_spill] sm:$0xff] }
 0x6dc   : > { %v1228_v31 = vpop.permute.xlu0 %1227  ;;  %v1965_v53 = vrot.slane %v1955_v21, %v6339_v28  ;;  %6383 = vst [vmem:[#allocation36_spill] sm:$0xff] %v4696_v38 }
 0x6dd   : > { %v1230_v47 = vsel %vm1229_vm2, %v1226_v22, %v1228_v31  ;;  %v1236_v40 = vmul.f32 %v1228_v31, %v1204_v29  ;;  %v438_v19 = vadd.f32 %v435_v26, %v416_v24  ;;  %v6345_v31 = vld [vmem:[#allocation23_spill] sm:$0xff]  ;;  %v6356_v24 = vmov 11  }
 0x6de   : > { %v1235_v1 = vmul.f32 %v1230_v47, %v1203_v11  ;;  %v6344_v11 = vld [vmem:[#allocation31_spill] sm:$0xff] }
 0x6df   : > { %1244 = vrot.lane.b32.xlu1 %v1236_v40, %s3652_s29  ;;  %v504_v47 = vsel %vm478_vm0, %v6345_v31, %v6344_v11  ;;  %v6357_v26 = vld [vmem:[#allocation27_spill] sm:$0xff] }
 0x6e0   : > { %1242 = vrot.lane.b32.xlu0 %v1235_v1, %s3652_s29  ;;  %v6346_v1 = vmov 8  }
 0x6e3   : > { %1469 = vperm.xlu1 %3429, %v4364_v51  }
 0x6e7   : > { %3430 = vset.pattern.permute.xlu1 %v6327_v36  ;;  %v6347_v36 = vld [vmem:[#allocation33_spill] sm:$0xff] }
 0x6e8   : > { %1493 = vperm.xlu1 %3430, %v4364_v51  }
 0x6e9   : > { %v4537_v14 = vpop.permute.xlu1 %1284 }
 0x6ea   : > { %6335 = vst [vmem:[#allocation46_spill] sm:$0xff] %v4537_v14 }
 0x6ec   : > { %3431 = vset.pattern.permute.xlu1 %v6328_v23  ;;  %v6348_v23 = vld [vmem:[#allocation24_spill] sm:$0xff] }
 0x6ed   : > { %1517 = vperm.xlu1 %3431, %v4364_v51   ;;  %v4535_v15 = vpop.permute.xlu0 %1293 }
 0x6ee   : > { %6334 = vst [vmem:[#allocation44_spill] sm:$0xff] %v4535_v15  ;;  %v4547_v20 = vpop.permute.xlu1 %1315 }
 0x6ef   : > { %6337 = vst [vmem:[#allocation47_spill] sm:$0xff] %v4547_v20 }
 0x6f1   : > { %3432 = vset.pattern.permute.xlu1 %v6329_v25  ;;  %v528_v25 = vsel %vm478_vm0, %v6348_v23, %v6347_v36 }
 0x6f2   : > { %1541 = vperm.xlu1 %3432, %v4364_v51   ;;  %v4544_v18 = vpop.permute.xlu0 %441 }
 0x6f3   : > { %v457_v56 = vmul.f32 %v4012_v42, %v4544_v18  ;;  %v4561_v60 = vpop.permute.xlu1 %1337  ;;  %v6342_v42 = vld [vmem:[#allocation30_spill] sm:$0xff] }
 0x6f4   : > { %6340 = vst [vmem:[#allocation45_spill] sm:$0xff] %v4561_v60  ;;  %v480_v37 = vsel %vm478_vm0, %v6342_v42, %v6341_v32  ;;  %v6373_v60 = vld [vmem:[#allocation17_spill] sm:$0xff] }
 0x6f5   : > { %v460_v22 = vadd.f32 %v457_v56, %v438_v19  ;;  %v6358_v56 = vld [vmem:[#allocation38_spill] sm:$0xff] }
 0x6f6   : > { %3433 = vset.pattern.permute.xlu1 %v6330_v58  ;;  %v4596_v19 = vpop.permute.xlu0 %1359 }
 0x6f7   : > { %1565 = vperm.xlu1 %3433, %v4364_v51   ;;  %v485_v48 = vadd.f32 %v480_v37, %v460_v22  ;;  %6359 = vst [vmem:[#allocation13_spill] sm:$0xff] %v4596_v19  ;;  %v6361_v37 = vld [vmem:[#allocation28_spill] sm:$0xff] }
 0x6f8   : > { %v4568_v29 = vpop.permute.xlu1 %1381 }
 0x6f9   : > { %6343 = vst [vmem:[#allocation48_spill] sm:$0xff] %v4568_v29  ;;  %v509_v40 = vadd.f32 %v504_v47, %v485_v48 }
 0x6fb   : > { %3434 = vset.pattern.permute.xlu1 %v6331_v35  ;;  %v533_v58 = vadd.f32 %v528_v25, %v509_v40  ;;  %v4605_v40 = vpop.permute.xlu0 %1425  ;;  %v6364_v25 = vmov 14  }
 0x6fc   : > { %1589 = vperm.xlu1 %3434, %v4364_v51   ;;  %6363 = vst [vmem:[#allocation14_spill] sm:$0xff] %v4605_v40 }
 0x6fd   : > { %v4579_v35 = vpop.permute.xlu1 %1403 }
 0x6fe   : > { %6349 = vst [vmem:[#allocation49_spill] sm:$0xff] %v4579_v35  ;;  %v3663_v35 = vmov 59  }
 0x700   : > { %3435 = vset.pattern.permute.xlu1 %v6332_v16  ;;  %v6350_v16 = vld [vmem:[#allocation35_spill] sm:$0xff] }
 0x701   : > { %1613 = vperm.xlu1 %3435, %v4364_v51  }
 0x705   : > { %3436 = vset.pattern.permute.xlu1 %v6333_v10  ;;  %v6351_v10 = vld [vmem:[#allocation25_spill] sm:$0xff] }
 0x706   : > { %1637 = vperm.xlu1 %3436, %v4364_v51  }
 0x70a   : > { %3437 = vset.pattern.permute.xlu1 %v3653_v62  ;;  %v552_v62 = vsel %vm478_vm0, %v6351_v10, %v6350_v16 }
 0x70b   : > { %1664 = vperm.xlu1 %3437, %v4364_v51  }
 0x70f   : > { %3438 = vset.pattern.permute.xlu1 %v3654_v9  ;;  %v6352_v9 = vmov 10  }
 0x710   : > { %1700 = vperm.xlu1 %3438, %v4364_v51  }
 0x714   : > { %3439 = vset.pattern.permute.xlu1 %v3655_v59  ;;  %v557_v59 = vadd.f32 %v552_v62, %v533_v58  ;;  %v6365_v58 = vld [vmem:[#allocation29_spill] sm:$0xff]  ;;  %v6366_v62 = vld [vmem:[#allocation42_spill] sm:$0xff] }
 0x715   : > { %1736 = vperm.xlu1 %3439, %v4364_v51  }
 0x719   : > { %3440 = vset.pattern.permute.xlu1 %v3656_v7  ;;  %v4586_v7 = vpop.permute.xlu1 %1447 }
 0x71a   : > { %1772 = vperm.xlu1 %3440, %v4364_v51   ;;  %6353 = vst [vmem:[#allocation50_spill] sm:$0xff] %v4586_v7  ;;  %v3662_v7 = vmov 58  }
 0x71d   : > { %v4598_v21 = vpop.permute.xlu1 %958 }
 0x71e   : > { %3441 = vset.pattern.permute.xlu1 %v3657_v13  ;;  %v6354_v13 = vld [vmem:[#allocation26_spill] sm:$0xff] }
 0x71f   : > { %1808 = vperm.xlu1 %3441, %v4364_v51   ;;  %v591_v0 = vsel %vm590_vm1, %v6355_v27, %v6354_v13 }
 0x723   : > { %3442 = vset.pattern.permute.xlu1 %v3658_v8  ;;  %v597_v8 = vadd.f32 %v591_v0, %v557_v59 }
 0x724   : > { %1844 = vperm.xlu1 %3442, %v4364_v51  }
 0x728   : > { %3443 = vset.pattern.permute.xlu1 %v3659_v63  ;;  %v627_v63 = vsel %vm590_vm1, %v6358_v56, %v6357_v26 }
 0x729   : > { %1880 = vperm.xlu1 %3443, %v4364_v51   ;;  %v633_v22 = vadd.f32 %v627_v63, %v597_v8  ;;  %v6367_v8 = vld [vmem:[#allocation18_spill] sm:$0xff] }
 0x72d   : > { %3444 = vset.pattern.permute.xlu1 %v3660_v12  ;;  %v6360_v12 = vmov 13  }
 0x72e   : > { %1916 = vperm.xlu1 %3444, %v4364_v51  }
 0x732   : > { %1972 = vrot.lane.b32.xlu1 %v1965_v53, %s3615_s23  ;;  %v6362_v53 = vld [vmem:[#allocation40_spill] sm:$0xff] }
 0x733   : > { %3445 = vset.pattern.permute.xlu1 %v6346_v1  ;;  %v663_v48 = vsel %vm590_vm1, %v6362_v53, %v6361_v37  ;;  %v4607_v1 = vpop.permute.xlu1 %962 }
 0x734   : > { %v669_v47 = vadd.f32 %v663_v48, %v633_v22  ;;  %v6369_v22 = vmov 32  }
 0x736   : > { %1987 = vperm.xlu1 %3445, %v4364_v51  }
 0x73a   : > { %3447 = vset.pattern.permute.xlu1 %v6352_v9  ;;  %v699_v9 = vsel %vm590_vm1, %v6366_v62, %v6365_v58 }
 0x73b   : > { %2007 = vperm.xlu1 %3447, %v4364_v51   ;;  %v705_v59 = vadd.f32 %v699_v9, %v669_v47  ;;  %v6370_v9 = vmov 33  }
 0x73f   : > { %3448 = vset.pattern.permute.xlu1 %v6356_v24  ;;  %v6368_v24 = vld [vmem:[#allocation19_spill] sm:$0xff] }
 0x740   : > { %2017 = vperm.xlu1 %3448, %v4364_v51   ;;  %v733_v63 = vsel %vm732_vm3, %v6368_v24, %v6367_v8 }
 0x741   : > { %v738_v48 = vmul.f32 %v733_v63, %v705_v59 }
 0x744   : > { %3450 = vset.pattern.permute.xlu1 %v6360_v12  ;;  %v4620_v12 = vpop.permute.xlu0 %960 }
 0x745   : > { %2037 = vperm.xlu1 %3450, %v4364_v51   ;;  %v966_v14 = vsel %vm964_vm4, %v4620_v12, %v4607_v1 }
 0x749   : > { %3451 = vset.pattern.permute.xlu1 %v6364_v25  ;;  %v741_v25 = vadd.f32 %v738_v48, %v4449_v30 }
 0x74a   : > { %2047 = vperm.xlu1 %3451, %v4364_v51  }
 0x74b   : > { %v971_v63 = vadd.f32 %v966_v14, %v741_v25  ;;  %v6371_v25 = vld [vmem:[#allocation15_spill] sm:$0xff] }
 0x74d   : > { %v4614_v0 = vpop.permute.xlu1 %1240 }
 0x74e   : > { %3453 = vset.pattern.permute.xlu1 %v6369_v22  ;;  %v3661_v22 = vmov 57  }
 0x74f   : > { %2067 = vperm.xlu1 %3453, %v4364_v51  }
 0x751   : > { %v4624_v17 = vpop.permute.xlu1 %1244 }
 0x752   : > { %v4626_v47 = vpop.permute.xlu0 %1242 }
 0x753   : > { %3454 = vset.pattern.permute.xlu1 %v6370_v9  ;;  %v1248_v59 = vsel %vm1246_vm5, %v4626_v47, %v4624_v17  ;;  %v3508_v9 = vld [vmem:[#allocation2] sm:$0xff] }
 0x754   : > { %2086 = vperm.xlu1 %3454, %v4364_v51   ;;  %v1253_v48 = vadd.f32 %v1248_v59, %v971_v63  ;;  %v4639_v40 = vrot.slane %v3508_v9, %v6339_v28  ;;  %v4648_v59 = vrot.slane %v3508_v9, %v6371_v25  ;;  %v3664_v63 = vmov 60  }
 0x755   : > { %v4657_v19 = vrot.slane %v3508_v9, %v3954_v46  ;;  %v4666_v20 = vrot.slane %v3508_v9, %v6373_v60  ;;  %v4693_v50 = vrot.slane %v3508_v9, %v4334_v2 }
 0x756   : > { %3502 = vtanh.f32 %v1253_v48 }
 0x757   : > { %6372 = vst [vmem:[#allocation21_spill] sm:$0xff] %v4657_v19  ;;  %6374 = vst [vmem:[#allocation30_spill] sm:$0xff] %v4666_v20 }
 0x758   : > { %3462 = vset.pattern.permute.xlu1 %v3661_v22  ;;  %6382 = vst [vmem:[#allocation26_spill] sm:$0xff] %v4693_v50 }
 0x759   : > { %2243 = vperm.xlu1 %3462, %v4364_v51  }
 0x75d   : > { %3463 = vset.pattern.permute.xlu1 %v3662_v7 }
 0x75e   : > { %2267 = vperm.xlu1 %3463, %v4364_v51  }
 0x760   : > { %v3503_v7 = vpop.eup %3502 }
 0x761   : > { %v1264_v48 = vrot.slane %v3503_v7, 4 }
 0x762   : > { %3464 = vset.pattern.permute.xlu1 %v3663_v35  ;;  %v4641_v29 = vpop.permute.xlu1 %1469 }
 0x763   : > { %v1472_v14 = vmul.f32 %v4641_v29, %v4639_v40  ;;  %2291 = vperm.xlu1 %3464, %v4364_v51  }
 0x765   : > { %1478 = vrot.lane.b32.xlu0 %v1472_v14, %s3633_s19 }
 0x767   : > { %3465 = vset.pattern.permute.xlu1 %v3664_v63  ;;  %v4650_v22 = vpop.permute.xlu1 %1493 }
 0x768   : > { %v1496_v35 = vmul.f32 %v4650_v22, %v4648_v59  ;;  %2315 = vperm.xlu1 %3465, %v4364_v51  }
 0x76a   : > { %1502 = vrot.lane.b32.xlu0 %v1496_v35, %s3633_s19  ;;  %v6376_v35 = vld [vmem:[#allocation10_spill] sm:$0xff] }
 0x76b   : > { %v4674_v39 = vrot.slane %v3508_v9, %v6376_v35 }
 0x76c   : > { %v4659_v14 = vpop.permute.xlu1 %1517  ;;  %1268 = vrot.lane.b32.xlu1 %v1264_v48, %s3665_s20  ;;  %v4677_v48 = vsub.s32 5, %v3858_v3  ;;  %v392_v3 = vmul.f32 %v3964_v52, %v4451_v6  ;;  %v436_v52 = vmul.f32 %v3985_v61, %v6338_v33 }
 0x76d   : > { %v1520_v63 = vmul.f32 %v4659_v14, %v4657_v19  ;;  %6377 = vst [vmem:[#allocation23_spill] sm:$0xff] %v4674_v39 }
 0x76e   : > { %6378 = vst [vmem:[#allocation33_spill] sm:$0xff] %v4677_v48  ;;  %v4685_v4 = vrot.slane %v3508_v9, %v4677_v48 }
 0x76f   : > { %1526 = vrot.lane.b32.xlu0 %v1520_v63, %s3633_s19 }
 0x770   : > { %6380 = vst [vmem:[#allocation35_spill] sm:$0xff] %v4685_v4 }
 0x771   : > { %v4668_v15 = vpop.permute.xlu1 %1541 }
 0x772   : > { %6375 = vst [vmem:[#allocation31_spill] sm:$0xff] %v4668_v15  ;;  %v1544_v7 = vmul.f32 %v4668_v15, %v4666_v20 }
 0x774   : > { %1550 = vrot.lane.b32.xlu0 %v1544_v7, %s3633_s19 }
 0x776   : > { %v4679_v57 = vpop.permute.xlu1 %1565 }
 0x777   : > { %6379 = vst [vmem:[#allocation24_spill] sm:$0xff] %v4679_v57  ;;  %v1568_v63 = vmul.f32 %v4679_v57, %v4674_v39  ;;  %v4704_v57 = vrot.slane %v3508_v9, %v4696_v38  ;;  %v390_v9 = vmul.f32 %v3951_v45, %v4451_v6  ;;  %v434_v45 = vmul.f32 %v3973_v55, %v6338_v33  ;;  %v6388_v33 = vld [vmem:[#allocation20_spill] sm:$0xff] }
 0x778   : > { %v456_v6 = vmul.f32 %v3995_v5, %v4544_v18  ;;  %v479_v5 = vsel %vm478_vm0, %v6388_v33, %v6342_v42  ;;  %v6390_v42 = vld [vmem:[#allocation32_spill] sm:$0xff] }
 0x779   : > { %1574 = vrot.lane.b32.xlu0 %v1568_v63, %s3633_s19  ;;  %6385 = vst [vmem:[#allocation38_spill] sm:$0xff] %v4704_v57 }
 0x77b   : > { %v4687_v41 = vpop.permute.xlu1 %1589 }
 0x77c   : > { %6381 = vst [vmem:[#allocation25_spill] sm:$0xff] %v4687_v41  ;;  %v1592_v7 = vmul.f32 %v4687_v41, %v4685_v4 }
 0x77e   : > { %1598 = vrot.lane.b32.xlu0 %v1592_v7, %s3633_s19 }
 0x780   : > { %v4698_v15 = vpop.permute.xlu1 %1613 }
 0x781   : > { %6384 = vst [vmem:[#allocation27_spill] sm:$0xff] %v4698_v15  ;;  %v1616_v63 = vmul.f32 %v4698_v15, %v4693_v50 }
 0x783   : > { %1622 = vrot.lane.b32.xlu0 %v1616_v63, %s3633_s19  ;;  %v414_v63 = vmul.f32 %v3958_v49, %v6336_v43 }
 0x785   : > { %v4706_v48 = vpop.permute.xlu1 %1637  ;;  %v417_v38 = vadd.f32 %v414_v63, %v392_v3 }
 0x786   : > { %6386 = vst [vmem:[#allocation28_spill] sm:$0xff] %v4706_v48  ;;  %v1640_v7 = vmul.f32 %v4706_v48, %v4704_v57 }
 0x788   : > { %1646 = vrot.lane.b32.xlu0 %v1640_v7, %s3633_s19  ;;  %v412_v7 = vmul.f32 %v3970_v54, %v6336_v43 }
 0x78a   : > { %v4713_v41 = vpop.permute.xlu1 %1664  ;;  %v415_v2 = vadd.f32 %v412_v7, %v390_v9  ;;  %v6389_v9 = vld [vmem:[#allocation22_spill] sm:$0xff] }
 0x78b   : > { %6387 = vst [vmem:[#allocation40_spill] sm:$0xff] %v4713_v41  ;;  %v1681_v15 = vmul.f32 %v4713_v41, %v4639_v40  ;;  %v458_v41 = vmul.f32 %v4008_v34, %v4544_v18 }
 0x78c   : > { %v437_v34 = vadd.f32 %v434_v45, %v415_v2 }
 0x78d   : > { %1689 = vrot.lane.b32.xlu0 %v1681_v15, %s3634_s25  ;;  %v439_v15 = vadd.f32 %v436_v52, %v417_v38 }
 0x78e   : > { %v459_v3 = vadd.f32 %v456_v6, %v437_v34 }
 0x78f   : > { %v4722_v48 = vpop.permute.xlu1 %1700  ;;  %v461_v54 = vadd.f32 %v458_v41, %v439_v15 }
 0x790   : > { %v1717_v49 = vmul.f32 %v4722_v48, %v4648_v59  ;;  %v484_v41 = vadd.f32 %v479_v5, %v459_v3 }
 0x791   : > { %v486_v38 = vadd.f32 %v6341_v32, %v461_v54  ;;  %v503_v32 = vsel %vm478_vm0, %v6389_v9, %v6345_v31  ;;  %v6391_v54 = vld [vmem:[#allocation34_spill] sm:$0xff]  ;;  %v6394_v9 = vld [vmem:[#allocation41_spill] sm:$0xff] }
 0x792   : > { %1725 = vrot.lane.b32.xlu0 %v1717_v49, %s3634_s25  ;;  %v508_v52 = vadd.f32 %v503_v32, %v484_v41  ;;  %v1959_v41 = vrot.slane %v4556_v44, %v6376_v35  ;;  %v664_v32 = vsel %vm590_vm1, %v6361_v37, %v6394_v9 }
 0x793   : > { %v510_v18 = vadd.f32 %v6344_v11, %v486_v38  ;;  %v527_v11 = vsel %vm478_vm0, %v6390_v42, %v6348_v23 }
 0x794   : > { %v4737_v43 = vpop.permute.xlu1 %1736  ;;  %v532_v45 = vadd.f32 %v527_v11, %v508_v52  ;;  %v6395_v52 = vld [vmem:[#allocation43_spill] sm:$0xff] }
 0x795   : > { %v1753_v61 = vmul.f32 %v4737_v43, %v4657_v19  ;;  %v534_v49 = vadd.f32 %v6347_v36, %v510_v18  ;;  %v551_v36 = vsel %vm478_vm0, %v6391_v54, %v6351_v10  ;;  %v700_v44 = vsel %vm590_vm1, %v6365_v58, %v6395_v52 }
 0x796   : > { %v556_v3 = vadd.f32 %v551_v36, %v532_v45 }
 0x797   : > { %1761 = vrot.lane.b32.xlu0 %v1753_v61, %s3634_s25  ;;  %v558_v6 = vadd.f32 %v6350_v16, %v534_v49  ;;  %v6392_v61 = vld [vmem:[#allocation37_spill] sm:$0xff] }
 0x798   : > { %v592_v34 = vsel %vm590_vm1, %v6354_v13, %v6392_v61  ;;  %v596_v5 = vadd.f32 %v6355_v27, %v556_v3  ;;  %v1969_v27 = vrot.slane %v1959_v41, %v6339_v28  ;;  %v3666_v61 = vmov 36  }
 0x799   : > { %v4743_v63 = vpop.permute.xlu1 %1772  ;;  %v598_v23 = vadd.f32 %v592_v34, %v558_v6  ;;  %v6396_v6 = vmov 12  }
 0x79a   : > { %v1789_v55 = vmul.f32 %v4743_v63, %v4666_v20 }
 0x79c   : > { %1797 = vrot.lane.b32.xlu0 %v1789_v55, %s3634_s25  ;;  %v6393_v55 = vld [vmem:[#allocation39_spill] sm:$0xff] }
 0x79d   : > { %v628_v33 = vsel %vm590_vm1, %v6357_v26, %v6393_v55  ;;  %v3669_v55 = vmov 39  }
 0x79e   : > { %v4752_v2 = vpop.permute.xlu1 %1808  ;;  %v634_v10 = vadd.f32 %v628_v33, %v598_v23  ;;  %v3668_v23 = vmov 38  }
 0x79f   : > { %v1825_v7 = vmul.f32 %v4752_v2, %v4674_v39 }
 0x7a0   : > { %v670_v26 = vadd.f32 %v664_v32, %v634_v10 }
 0x7a1   : > { %1833 = vrot.lane.b32.xlu0 %v1825_v7, %s3634_s25  ;;  %v632_v7 = vadd.f32 %v6358_v56, %v596_v5  ;;  %v3670_v5 = vmov 56  }
 0x7a2   : > { %v706_v42 = vadd.f32 %v700_v44, %v670_v26 }
 0x7a3   : > { %v4764_v15 = vpop.permute.xlu1 %1844  ;;  %v668_v49 = vadd.f32 %v6362_v53, %v632_v7 }
 0x7a4   : > { %v1861_v31 = vmul.f32 %v4764_v15, %v4685_v4  ;;  %v739_v37 = vmul.f32 %v6367_v8, %v706_v42  ;;  %v965_v8 = vsel %vm964_vm4, %v4598_v21, %v4620_v12 }
 0x7a5   : > { %v704_v11 = vadd.f32 %v6366_v62, %v668_v49 }
 0x7a6   : > { %1869 = vrot.lane.b32.xlu0 %v1861_v31, %s3634_s25  ;;  %v742_v45 = vadd.f32 %v739_v37, %v4449_v30  ;;  %v6397_v31 = vmov 15  }
 0x7a7   : > { %v737_v56 = vmul.f32 %v6368_v24, %v704_v11  ;;  %v1247_v24 = vsel %vm1246_vm5, %v4614_v0, %v4626_v47  ;;  %v3667_v0 = vmov 37  }
 0x7a8   : > { %v4776_v38 = vpop.permute.xlu1 %1880  ;;  %v972_v53 = vadd.f32 %v4607_v1, %v742_v45  ;;  %v6399_v1 = vmov 35  }
 0x7a9   : > { %v1897_v16 = vmul.f32 %v4776_v38, %v4693_v50  ;;  %v740_v58 = vadd.f32 %v737_v56, %v4449_v30  ;;  %v6398_v30 = vmov 34  }
 0x7aa   : > { %v1254_v62 = vadd.f32 %v4624_v17, %v972_v53 }
 0x7ab   : > { %1905 = vrot.lane.b32.xlu0 %v1897_v16, %s3634_s25  ;;  %v970_v54 = vadd.f32 %v965_v8, %v740_v58 }
 0x7ac   : > { %3504 = vtanh.f32 %v1254_v62 }
 0x7ad   : > { %v4787_v13 = vpop.permute.xlu1 %1916  ;;  %v1252_v36 = vadd.f32 %v1247_v24, %v970_v54 }
 0x7ae   : > { %v1933_v18 = vmul.f32 %v4787_v13, %v4704_v57 }
 0x7af   : > { %3506 = vtanh.f32 %v1252_v36 }
 0x7b0   : > { %1941 = vrot.lane.b32.xlu0 %v1933_v18, %s3634_s25 }
 0x7b1   : > { %v4851_v26 = vpop.permute.xlu1 %1972 }
 0x7b2   : > { %6410 = vst [vmem:[#allocation41_spill] sm:$0xff] %v4851_v26 }
 0x7b4   : > { %1974 = vrot.lane.b32.xlu0 %v1969_v27, %s3615_s23 }
 0x7b5   : > { %v4855_v52 = vpop.permute.xlu1 %1987 }
 0x7b6   : > { %v3505_v17 = vpop.eup %3504 }
 0x7b7   : > { %v1265_v21 = vrot.slane %v3505_v17, 4 }
 0x7b8   : > { %1997 = vperm.xlu0 %3446, %v4364_v51  }
 0x7b9   : > { %v3507_v12 = vpop.eup %3506 }
 0x7ba   : > { %v1263_v34 = vrot.slane %v3507_v12, 4  ;;  %v4859_v49 = vpop.permute.xlu1 %2007  ;;  %v3671_v12 = vmov 41  }
 0x7bc   : > { %3449 = vset.pattern.permute.xlu0 %v6396_v6 }
 0x7bd   : > { %2027 = vperm.xlu0 %3449, %v4364_v51  }
 0x7bf   : > { %v4863_v42 = vpop.permute.xlu1 %2017 }
 0x7c1   : > { %3452 = vset.pattern.permute.xlu0 %v6397_v31 }
 0x7c2   : > { %2057 = vperm.xlu0 %3452, %v4364_v51  }
 0x7c4   : > { %v4867_v37 = vpop.permute.xlu1 %2037 }
 0x7c5   : > { %6415 = vst [vmem:[#allocation55_spill] sm:$0xff] %v4867_v37 }
 0x7c6   : > { %3455 = vset.pattern.permute.xlu0 %v6398_v30 }
 0x7c7   : > { %2105 = vperm.xlu0 %3455, %v4364_v51  }
 0x7c9   : > { %v4871_v45 = vpop.permute.xlu1 %2047 }
 0x7ca   : > { %6417 = vst [vmem:[#allocation57_spill] sm:$0xff] %v4871_v45 }
 0x7cb   : > { %3456 = vset.pattern.permute.xlu0 %v6399_v1 }
 0x7cc   : > { %2124 = vperm.xlu0 %3456, %v4364_v51  }
 0x7ce   : > { %v4875_v58 = vpop.permute.xlu1 %2067 }
 0x7d0   : > { %3457 = vset.pattern.permute.xlu0 %v3666_v61 }
 0x7d1   : > { %2143 = vperm.xlu0 %3457, %v4364_v51  }
 0x7d3   : > { %v4879_v31 = vpop.permute.xlu1 %2086 }
 0x7d5   : > { %1270 = vrot.lane.b32.xlu0 %v1265_v21, %s3665_s20 }
 0x7d6   : > { %3458 = vset.pattern.permute.xlu0 %v3667_v0 }
 0x7d7   : > { %v4826_v47 = vpop.permute.xlu0 %1478 }
 0x7d8   : > { %6400 = vst [vmem:[#allocation29_spill] sm:$0xff] %v4826_v47  ;;  %v4883_v8 = vpop.permute.xlu1 %2243  ;;  %v6433_v47 = vld [vmem:[#allocation36_spill] sm:$0xff] }
 0x7d9   : > { %1266 = vrot.lane.b32.xlu0 %v1263_v34, %s3665_s20 }
 0x7dc   : > { %v4829_v3 = vpop.permute.xlu0 %1502 }
 0x7dd   : > { %6401 = vst [vmem:[#allocation42_spill] sm:$0xff] %v4829_v3  ;;  %2162 = vperm.xlu0 %3458, %v4364_v51   ;;  %v4889_v36 = vpop.permute.xlu1 %2267 }
 0x7e1   : > { %3459 = vset.pattern.permute.xlu0 %v3668_v23  ;;  %v4832_v16 = vpop.permute.xlu0 %1526 }
 0x7e2   : > { %6402 = vst [vmem:[#allocation18_spill] sm:$0xff] %v4832_v16  ;;  %2181 = vperm.xlu0 %3459, %v4364_v51   ;;  %v4893_v1 = vpop.permute.xlu1 %2291  ;;  %v6432_v16 = vld [vmem:[#allocation25_spill] sm:$0xff] }
 0x7e6   : > { %3460 = vset.pattern.permute.xlu0 %v3669_v55  ;;  %v4835_v33 = vpop.permute.xlu0 %1550 }
 0x7e7   : > { %6403 = vst [vmem:[#allocation19_spill] sm:$0xff] %v4835_v33  ;;  %2200 = vperm.xlu0 %3460, %v4364_v51   ;;  %v4897_v61 = vpop.permute.xlu1 %2315 }
 0x7eb   : > { %3461 = vset.pattern.permute.xlu0 %v3670_v5  ;;  %v4838_v10 = vpop.permute.xlu0 %1574  ;;  %v1269_v0 = vpop.permute.xlu1 %1268 }
 0x7ec   : > { %6404 = vst [vmem:[#allocation20_spill] sm:$0xff] %v4838_v10  ;;  %2219 = vperm.xlu0 %3461, %v4364_v51  }
 0x7f0   : > { %v4841_v41 = vpop.permute.xlu0 %1598  ;;  %3467 = vset.pattern.permute.xlu0 %v3671_v12 }
 0x7f1   : > { %6405 = vst [vmem:[#allocation22_spill] sm:$0xff] %v4841_v41 }
 0x7f5   : > { %v4843_v18 = vpop.permute.xlu0 %1622 }
 0x7f6   : > { %6406 = vst [vmem:[#allocation32_spill] sm:$0xff] %v4843_v18  ;;  %v6427_v18 = vld [vmem:[#allocation33_spill] sm:$0xff] }
 0x7fa   : > { %v4845_v9 = vpop.permute.xlu0 %1646 }
 0x7fb   : > { %6407 = vst [vmem:[#allocation34_spill] sm:$0xff] %v4845_v9  ;;  %v3672_v9 = vmov 40  }
 0x7fc   : > { %3466 = vset.pattern.permute.xlu1 %v3672_v9 }
 0x7ff   : > { %v4847_v32 = vpop.permute.xlu0 %1689 }
 0x800   : > { %6408 = vst [vmem:[#allocation37_spill] sm:$0xff] %v4847_v32  ;;  %v6429_v32 = vld [vmem:[#allocation24_spill] sm:$0xff] }
 0x804   : > { %v4849_v7 = vpop.permute.xlu0 %1725 }
 0x805   : > { %6409 = vst [vmem:[#allocation39_spill] sm:$0xff] %v4849_v7 }
 0x809   : > { %v4853_v27 = vpop.permute.xlu0 %1761 }
 0x80a   : > { %6411 = vst [vmem:[#allocation43_spill] sm:$0xff] %v4853_v27 }
 0x80e   : > { %v4857_v44 = vpop.permute.xlu0 %1797 }
 0x80f   : > { %6412 = vst [vmem:[#allocation52_spill] sm:$0xff] %v4857_v44  ;;  %v2248_v44 = vmul.f32 %v4883_v8, %v4648_v59 }
 0x813   : > { %v4861_v51 = vpop.permute.xlu0 %1833 }
 0x814   : > { %6413 = vst [vmem:[#allocation53_spill] sm:$0xff] %v4861_v51 }
 0x818   : > { %v4865_v11 = vpop.permute.xlu0 %1869 }
 0x819   : > { %6414 = vst [vmem:[#allocation54_spill] sm:$0xff] %v4865_v11 }
 0x81d   : > { %v4869_v56 = vpop.permute.xlu0 %1905 }
 0x81e   : > { %6416 = vst [vmem:[#allocation56_spill] sm:$0xff] %v4869_v56 }
 0x822   : > { %v4873_v6 = vpop.permute.xlu0 %1941 }
 0x823   : > { %6418 = vst [vmem:[#allocation58_spill] sm:$0xff] %v4873_v6 }
 0x826   : > { %v4877_v53 = vpop.permute.xlu0 %1974 }
 0x827   : > { %6419 = vst [vmem:[#allocation59_spill] sm:$0xff] %v4877_v53 }
 0x837   : > { %v4881_v62 = vpop.permute.xlu0 %1997 }
 0x83c   : > { %v4885_v24 = vpop.permute.xlu0 %2027 }
 0x841   : > { %v4887_v54 = vpop.permute.xlu0 %2057 }
 0x842   : > { %6420 = vst [vmem:[#allocation60_spill] sm:$0xff] %v4887_v54 }
 0x846   : > { %v4891_v30 = vpop.permute.xlu0 %2105 }
 0x84b   : > { %v4895_v17 = vpop.permute.xlu0 %2124 }
 0x850   : > { %v4899_v21 = vpop.permute.xlu0 %2143 }
 0x854   : > { %v1271_v34 = vpop.permute.xlu0 %1270 }
 0x855   : > { %v1274_v23 = vsel %vm1272_vm6, %v1269_v0, %v1271_v34 }
 0x856   : > { %1278 = vst [vmem:[#allocation2 + $0x10] sm:$0xf0] %v1274_v23 }
 0x858   : > { %v1267_v55 = vpop.permute.xlu0 %1266 }
 0x859   : > { %v1273_v5 = vsel %vm1272_vm6, %v1267_v55, %v1269_v0 }
 0x85a   : > { %1277 = vst [vmem:[#allocation2 + $0x8] sm:$0xf0] %v1273_v5 }
 0x85c   : > { %v4903_v53 = vpop.permute.xlu0 %2162 }
 0x85d   : > { %v1290_v10 = vld [vmem:[#allocation2 + $0x10] sm:$0xff] }
 0x85e   : > { %v4959_v9 = vrot.slane %v1290_v10, %v6339_v28  ;;  %v4973_v37 = vrot.slane %v1290_v10, %v6371_v25 }
 0x860   : > { %v1474_v45 = vmul.f32 %v4959_v9, %v4641_v29 }
 0x861   : > { %v1289_v6 = vld [vmem:[#allocation2 + $0x8] sm:$0xff]  ;;  %v4905_v26 = vpop.permute.xlu0 %2181 }
 0x862   : > { %v4908_v56 = vrot.slane %v1289_v6, %v6339_v28  ;;  %v4913_v11 = vrot.slane %v1289_v6, %v6371_v25  ;;  %v4921_v23 = vrot.slane %v1289_v6, %v3954_v46  ;;  %v4940_v7 = vrot.slane %v1289_v6, %v6376_v35 }
 0x864   : > { %6421 = vst [vmem:[#allocation61_spill] sm:$0xff] %v4908_v56  ;;  %v1473_v12 = vmul.f32 %v4641_v29, %v4908_v56  ;;  %6422 = vst [vmem:[#allocation62_spill] sm:$0xff] %v4913_v11  ;;  %v1497_v0 = vmul.f32 %v4650_v22, %v4913_v11  ;;  %v1521_v51 = vmul.f32 %v4659_v14, %v4921_v23  ;;  %v6437_v29 = vld [vmem:[#allocation40_spill] sm:$0xff] }
 0x865   : > { %6423 = vst [vmem:[#allocation63_spill] sm:$0xff] %v4921_v23  ;;  %v1569_v41 = vmul.f32 %v6429_v32, %v4940_v7  ;;  %v1680_v25 = vmul.f32 %v4959_v9, %v6437_v29 }
 0x866   : > { %1480 = vrot.lane.b32.xlu1 %v1473_v12, %s3633_s19  ;;  %v4916_v34 = vpop.permute.xlu0 %2200  ;;  %v4931_v12 = vrot.slane %v1289_v6, %v6373_v60 }
 0x868   : > { %6424 = vst [vmem:[#allocation64_spill] sm:$0xff] %v4931_v12 }
 0x86a   : > { %1504 = vrot.lane.b32.xlu1 %v1497_v0, %s3633_s19  ;;  %v6425_v0 = vld [vmem:[#allocation31_spill] sm:$0xff] }
 0x86b   : > { %v4924_v55 = vpop.permute.xlu0 %2219  ;;  %v1545_v27 = vmul.f32 %v6425_v0, %v4931_v12  ;;  %6426 = vst [vmem:[#allocation31_spill] sm:$0xff] %v4940_v7 }
 0x86c   : > { %v2224_v5 = vmul.f32 %v4924_v55, %v4639_v40 }
 0x86e   : > { %1528 = vrot.lane.b32.xlu1 %v1521_v51, %s3633_s19  ;;  %2232 = vrot.lane.b32.xlu0 %v2224_v5, %s3634_s25  ;;  %v2272_v51 = vmul.f32 %v4889_v36, %v4657_v19  ;;  %v4947_v5 = vrot.slane %v1289_v6, %v6427_v18 }
 0x870   : > { %6428 = vst [vmem:[#allocation65_spill] sm:$0xff] %v4947_v5  ;;  %v1593_v3 = vmul.f32 %v6432_v16, %v4947_v5 }
 0x872   : > { %1552 = vrot.lane.b32.xlu1 %v1545_v27, %s3633_s19  ;;  %2256 = vrot.lane.b32.xlu0 %v2248_v44, %s3634_s25  ;;  %v2296_v27 = vmul.f32 %v4893_v1, %v4666_v20  ;;  %v6430_v44 = vld [vmem:[#allocation51_spill] sm:$0xff] }
 0x873   : > { %v4956_v33 = vrot.slane %v1289_v6, %v6430_v44 }
 0x875   : > { %6431 = vst [vmem:[#allocation24_spill] sm:$0xff] %v4956_v33 }
 0x876   : > { %1576 = vrot.lane.b32.xlu1 %v1569_v41, %s3633_s19  ;;  %2280 = vrot.lane.b32.xlu0 %v2272_v51, %s3634_s25  ;;  %v4966_v41 = vrot.slane %v1289_v6, %v6433_v47  ;;  %v6435_v51 = vld [vmem:[#allocation27_spill] sm:$0xff]  ;;  %v1498_v6 = vmul.f32 %v4650_v22, %v4973_v37  ;;  %v1716_v22 = vmul.f32 %v4722_v48, %v4973_v37 }
 0x877   : > { %v1617_v54 = vmul.f32 %v6435_v51, %v4956_v33 }
 0x878   : > { %6434 = vst [vmem:[#allocation51_spill] sm:$0xff] %v4966_v41 }
 0x87a   : > { %1600 = vrot.lane.b32.xlu1 %v1593_v3, %s3633_s19  ;;  %2304 = vrot.lane.b32.xlu0 %v2296_v27, %s3634_s25  ;;  %v6436_v3 = vld [vmem:[#allocation28_spill] sm:$0xff]  ;;  %v4982_v27 = vrot.slane %v1290_v10, %v3954_v46 }
 0x87b   : > { %v1641_v28 = vmul.f32 %v6436_v3, %v4966_v41 }
 0x87e   : > { %1624 = vrot.lane.b32.xlu1 %v1617_v54, %s3633_s19  ;;  %1482 = vrot.lane.b32.xlu0 %v1474_v45, %s3633_s19  ;;  %v1522_v54 = vmul.f32 %v4659_v14, %v4982_v27  ;;  %v4991_v45 = vrot.slane %v1290_v10, %v6373_v60  ;;  %v5005_v14 = vrot.slane %v1290_v10, %v6427_v18 }
 0x87f   : > { %v5023_v60 = vrot.slane %v1290_v10, %v6433_v47 }
 0x880   : > { %6439 = vst [vmem:[#allocation27_spill] sm:$0xff] %v5005_v14 }
 0x881   : > { %6441 = vst [vmem:[#allocation40_spill] sm:$0xff] %v5023_v60 }
 0x882   : > { %1648 = vrot.lane.b32.xlu1 %v1641_v28, %s3633_s19  ;;  %1506 = vrot.lane.b32.xlu0 %v1498_v6, %s3633_s19  ;;  %v1546_v28 = vmul.f32 %v6425_v0, %v4991_v45  ;;  %v5000_v6 = vrot.slane %v1290_v10, %v6376_v35  ;;  %v5014_v0 = vrot.slane %v1290_v10, %v6430_v44 }
 0x884   : > { %6438 = vst [vmem:[#allocation25_spill] sm:$0xff] %v5000_v6  ;;  %6440 = vst [vmem:[#allocation28_spill] sm:$0xff] %v5014_v0  ;;  %v1896_v10 = vmul.f32 %v4776_v38, %v5014_v0 }
 0x886   : > { %1687 = vrot.lane.b32.xlu1 %v1680_v25, %s3634_s25  ;;  %1530 = vrot.lane.b32.xlu0 %v1522_v54, %s3633_s19  ;;  %v1752_v25 = vmul.f32 %v4737_v43, %v4982_v27  ;;  %v1570_v54 = vmul.f32 %v6429_v32, %v5000_v6  ;;  %v1824_v32 = vmul.f32 %v4752_v2, %v5000_v6 }
 0x88a   : > { %1723 = vrot.lane.b32.xlu1 %v1716_v22, %s3634_s25  ;;  %1554 = vrot.lane.b32.xlu0 %v1546_v28, %s3633_s19  ;;  %v1788_v22 = vmul.f32 %v4743_v63, %v4991_v45  ;;  %v1594_v28 = vmul.f32 %v6432_v16, %v5005_v14  ;;  %v1860_v16 = vmul.f32 %v4764_v15, %v5005_v14 }
 0x88e   : > { %1759 = vrot.lane.b32.xlu1 %v1752_v25, %s3634_s25  ;;  %1578 = vrot.lane.b32.xlu0 %v1570_v54, %s3633_s19  ;;  %v1618_v25 = vmul.f32 %v6435_v51, %v5014_v0  ;;  %v1642_v54 = vmul.f32 %v6436_v3, %v5023_v60  ;;  %v1679_v51 = vmul.f32 %v6437_v29, %v4908_v56 }
 0x88f   : > { %v1715_v3 = vmul.f32 %v4722_v48, %v4913_v11  ;;  %v1751_v29 = vmul.f32 %v4737_v43, %v4921_v23  ;;  %v1787_v48 = vmul.f32 %v4743_v63, %v4931_v12  ;;  %v1823_v43 = vmul.f32 %v4752_v2, %v4940_v7 }
 0x890   : > { %v1859_v63 = vmul.f32 %v4764_v15, %v4947_v5  ;;  %v1895_v2 = vmul.f32 %v4776_v38, %v4956_v33  ;;  %v1931_v15 = vmul.f32 %v4787_v13, %v4966_v41  ;;  %v2071_v38 = vmul.f32 %v4875_v58, %v4959_v9 }
 0x892   : > { %1795 = vrot.lane.b32.xlu1 %v1788_v22, %s3634_s25  ;;  %1602 = vrot.lane.b32.xlu0 %v1594_v28, %s3633_s19  ;;  %v1932_v22 = vmul.f32 %v4787_v13, %v5023_v60  ;;  %v2070_v28 = vmul.f32 %v4875_v58, %v4908_v56  ;;  %v2089_v13 = vmul.f32 %v4879_v31, %v4913_v11 }
 0x893   : > { %v2246_v58 = vmul.f32 %v4883_v8, %v4913_v11 }
 0x896   : > { %1831 = vrot.lane.b32.xlu1 %v1824_v32, %s3634_s25  ;;  %1626 = vrot.lane.b32.xlu0 %v1618_v25, %s3633_s19  ;;  %v2090_v32 = vmul.f32 %v4879_v31, %v4973_v37  ;;  %v2108_v25 = vmul.f32 %v4891_v30, %v4921_v23  ;;  %v2270_v31 = vmul.f32 %v4889_v36, %v4921_v23 }
 0x89a   : > { %1867 = vrot.lane.b32.xlu1 %v1860_v16, %s3634_s25  ;;  %1650 = vrot.lane.b32.xlu0 %v1642_v54, %s3633_s19  ;;  %v2109_v16 = vmul.f32 %v4891_v30, %v4982_v27  ;;  %v2127_v54 = vmul.f32 %v4895_v17, %v4931_v12  ;;  %v2128_v30 = vmul.f32 %v4895_v17, %v4991_v45 }
 0x89b   : > { %v2147_v17 = vmul.f32 %v4899_v21, %v5000_v6 }
 0x89e   : > { %1903 = vrot.lane.b32.xlu1 %v1896_v10, %s3634_s25  ;;  %1685 = vrot.lane.b32.xlu0 %v1679_v51, %s3634_s25  ;;  %v2146_v10 = vmul.f32 %v4899_v21, %v4940_v7  ;;  %v2165_v51 = vmul.f32 %v4903_v53, %v4947_v5  ;;  %v2166_v21 = vmul.f32 %v4903_v53, %v5005_v14 }
 0x89f   : > { %v2185_v53 = vmul.f32 %v4905_v26, %v5014_v0 }
 0x8a2   : > { %1939 = vrot.lane.b32.xlu1 %v1932_v22, %s3634_s25  ;;  %1721 = vrot.lane.b32.xlu0 %v1715_v3, %s3634_s25  ;;  %v2184_v22 = vmul.f32 %v4905_v26, %v4956_v33  ;;  %v2294_v3 = vmul.f32 %v4893_v1, %v4931_v12  ;;  %v2204_v26 = vmul.f32 %v4916_v34, %v5023_v60 }
 0x8a6   : > { %2074 = vrot.lane.b32.xlu1 %v2070_v28, %s3633_s19  ;;  %1757 = vrot.lane.b32.xlu0 %v1751_v29, %s3634_s25  ;;  %v2318_v28 = vmul.f32 %v4897_v61, %v4940_v7  ;;  %v2203_v29 = vmul.f32 %v4916_v34, %v4966_v41  ;;  %v2223_v34 = vmul.f32 %v4924_v55, %v4959_v9 }
 0x8aa   : > { %2095 = vrot.lane.b32.xlu1 %v2090_v32, %s3633_s19  ;;  %1793 = vrot.lane.b32.xlu0 %v1787_v48, %s3634_s25  ;;  %v5127_v32 = vld [vmem:[%s6062_s5] sm:$0xf] }
 0x8ae   : > { %2112 = vrot.lane.b32.xlu1 %v2108_v25, %s3633_s19  ;;  %1829 = vrot.lane.b32.xlu0 %v1823_v43, %s3634_s25  ;;  %v3673_v25 = vmov 44   ;;  %v2222_v43 = vmul.f32 %v4924_v55, %v4908_v56 }
 0x8b2   : > { %2114 = vrot.lane.b32.xlu1 %v2109_v16, %s3633_s19  ;;  %1865 = vrot.lane.b32.xlu0 %v1859_v63, %s3634_s25  ;;  %v3674_v63 = vmov 47  }
 0x8b6   : > { %2131 = vrot.lane.b32.xlu1 %v2127_v54, %s3633_s19  ;;  %1901 = vrot.lane.b32.xlu0 %v1895_v2, %s3634_s25 }
 0x8ba   : > { %2133 = vrot.lane.b32.xlu1 %v2128_v30, %s3633_s19  ;;  %1937 = vrot.lane.b32.xlu0 %v1931_v15, %s3634_s25  ;;  %v3675_v15 = vmov 66  }
 0x8be   : > { %2150 = vrot.lane.b32.xlu1 %v2146_v10, %s3633_s19  ;;  %2076 = vrot.lane.b32.xlu0 %v2071_v38, %s3633_s19  ;;  %v2247_v38 = vmul.f32 %v4883_v8, %v4973_v37 }
 0x8c2   : > { %2152 = vrot.lane.b32.xlu1 %v2147_v17, %s3633_s19  ;;  %2093 = vrot.lane.b32.xlu0 %v2089_v13, %s3633_s19  ;;  %v2271_v13 = vmul.f32 %v4889_v36, %v4982_v27 }
 0x8c6   : > { %2169 = vrot.lane.b32.xlu1 %v2165_v51, %s3633_s19  ;;  %2252 = vrot.lane.b32.xlu0 %v2246_v58, %s3634_s25  ;;  %v3676_v51 = vmov 61  }
 0x8ca   : > { %2171 = vrot.lane.b32.xlu1 %v2166_v21, %s3633_s19  ;;  %2276 = vrot.lane.b32.xlu0 %v2270_v31, %s3634_s25  ;;  %v2295_v21 = vmul.f32 %v4893_v1, %v4991_v45  ;;  %v3677_v31 = vmov 70  }
 0x8ce   : > { %2188 = vrot.lane.b32.xlu1 %v2184_v22, %s3633_s19  ;;  %2300 = vrot.lane.b32.xlu0 %v2294_v3, %s3634_s25  ;;  %v6454_v3 = vmov 16  }
 0x8d2   : > { %2190 = vrot.lane.b32.xlu1 %v2185_v53, %s3633_s19  ;;  %2324 = vrot.lane.b32.xlu0 %v2318_v28, %s3634_s25  ;;  %v3678_v28 = vmov 42  }
 0x8d6   : > { %2207 = vrot.lane.b32.xlu1 %v2203_v29, %s3633_s19  ;;  %2532 = vperm.xlu0 %3467, %v5127_v32  }
 0x8d8   : > { %v5132_v48 = vpop.permute.xlu1 %1480 }
 0x8d9   : > { %6442 = vst [vmem:[#allocation66_spill] sm:$0xff] %v5132_v48 }
 0x8da   : > { %2209 = vrot.lane.b32.xlu1 %v2204_v26, %s3633_s19  ;;  %3470 = vset.pattern.permute.xlu0 %v3673_v25  ;;  %v6458_v26 = vmov 19   ;;  %v3679_v25 = vmov 43  }
 0x8db   : > { %2604 = vperm.xlu0 %3470, %v5127_v32  }
 0x8dc   : > { %v5138_v16 = vpop.permute.xlu1 %1504 }
 0x8dd   : > { %6443 = vst [vmem:[#allocation67_spill] sm:$0xff] %v5138_v16  ;;  %v6498_v16 = vmov 5  }
 0x8de   : > { %2228 = vrot.lane.b32.xlu1 %v2222_v43, %s3634_s25 }
 0x8df   : > { %3473 = vset.pattern.permute.xlu0 %v3674_v63 }
 0x8e0   : > { %v5143_v54 = vpop.permute.xlu1 %1528  ;;  %2676 = vperm.xlu0 %3473, %v5127_v32   ;;  %v5146_v2 = vpop.permute.xlu0 %2232 }
 0x8e1   : > { %6444 = vst [vmem:[#allocation68_spill] sm:$0xff] %v5143_v54  ;;  %6445 = vst [vmem:[#allocation69_spill] sm:$0xff] %v5146_v2 }
 0x8e2   : > { %2230 = vrot.lane.b32.xlu1 %v2223_v34, %s3634_s25  ;;  %v6461_v34 = vmov 22  }
 0x8e4   : > { %v5149_v30 = vpop.permute.xlu1 %1552  ;;  %3476 = vset.pattern.permute.xlu0 %v3675_v15  ;;  %v5151_v10 = vpop.permute.xlu0 %2256 }
 0x8e5   : > { %6446 = vst [vmem:[#allocation70_spill] sm:$0xff] %v5149_v30  ;;  %6447 = vst [vmem:[#allocation71_spill] sm:$0xff] %v5151_v10  ;;  %2748 = vperm.xlu0 %3476, %v5127_v32   ;;  %v6489_v30 = vmov 20  }
 0x8e6   : > { %2254 = vrot.lane.b32.xlu1 %v2247_v38, %s3634_s25  ;;  %v3680_v38 = vmov 45  }
 0x8e8   : > { %v5157_v55 = vpop.permute.xlu1 %1576  ;;  %v5159_v17 = vpop.permute.xlu0 %2280 }
 0x8e9   : > { %6448 = vst [vmem:[#allocation72_spill] sm:$0xff] %v5157_v55  ;;  %6449 = vst [vmem:[#allocation73_spill] sm:$0xff] %v5159_v17  ;;  %3479 = vset.pattern.permute.xlu0 %v3676_v51 }
 0x8ea   : > { %2339 = vperm.xlu0 %3479, %v5127_v32   ;;  %2278 = vrot.lane.b32.xlu1 %v2271_v13, %s3634_s25  ;;  %v6463_v13 = vmov 4  }
 0x8ec   : > { %v5165_v58 = vpop.permute.xlu1 %1600  ;;  %v5167_v8 = vpop.permute.xlu0 %2304 }
 0x8ed   : > { %6450 = vst [vmem:[#allocation74_spill] sm:$0xff] %v5165_v58  ;;  %6451 = vst [vmem:[#allocation75_spill] sm:$0xff] %v5167_v8 }
 0x8ee   : > { %3482 = vset.pattern.permute.xlu0 %v3677_v31  ;;  %2302 = vrot.lane.b32.xlu1 %v2295_v21, %s3634_s25  ;;  %v3681_v31 = vmov 46  }
 0x8ef   : > { %2844 = vperm.xlu0 %3482, %v5127_v32  }
 0x8f0   : > { %v5173_v36 = vpop.permute.xlu1 %1624  ;;  %v5175_v22 = vpop.permute.xlu0 %1482 }
 0x8f1   : > { %6452 = vst [vmem:[#allocation76_spill] sm:$0xff] %v5173_v36  ;;  %6453 = vst [vmem:[#allocation77_spill] sm:$0xff] %v5175_v22 }
 0x8f2   : > { %2508 = vperm.xlu1 %3466, %v5127_v32  }
 0x8f3   : > { %3485 = vset.pattern.permute.xlu0 %v6454_v3 }
 0x8f4   : > { %v5179_v53 = vpop.permute.xlu1 %1648  ;;  %2428 = vperm.xlu0 %3485, %v5127_v32   ;;  %v5182_v1 = vpop.permute.xlu0 %1506 }
 0x8f5   : > { %6455 = vst [vmem:[#allocation78_spill] sm:$0xff] %v5179_v53  ;;  %6456 = vst [vmem:[#allocation79_spill] sm:$0xff] %v5182_v1 }
 0x8f6   : > { %3468 = vset.pattern.permute.xlu1 %v3678_v28 }
 0x8f7   : > { %2556 = vperm.xlu1 %3468, %v5127_v32  }
 0x8f8   : > { %v5185_v29 = vpop.permute.xlu1 %1687  ;;  %3488 = vset.pattern.permute.xlu0 %v6458_v26  ;;  %v5192_v63 = vpop.permute.xlu0 %1530  ;;  %v3682_v26 = vmov 64  }
 0x8f9   : > { %6457 = vst [vmem:[#allocation80_spill] sm:$0xff] %v5185_v29  ;;  %2458 = vperm.xlu0 %3488, %v5127_v32   ;;  %6460 = vst [vmem:[#allocation82_spill] sm:$0xff] %v5192_v63  ;;  %v3688_v29 = vmov 63  }
 0x8fb   : > { %3469 = vset.pattern.permute.xlu1 %v3679_v25 }
 0x8fc   : > { %v5189_v43 = vpop.permute.xlu1 %1723  ;;  %2580 = vperm.xlu1 %3469, %v5127_v32   ;;  %v5200_v51 = vpop.permute.xlu0 %1554 }
 0x8fd   : > { %6459 = vst [vmem:[#allocation81_spill] sm:$0xff] %v5189_v43  ;;  %3491 = vset.pattern.permute.xlu0 %v6461_v34  ;;  %6464 = vst [vmem:[#allocation84_spill] sm:$0xff] %v5200_v51  ;;  %v3687_v43 = vmov 62  }
 0x8fe   : > { %2488 = vperm.xlu0 %3491, %v5127_v32  }
 0x900   : > { %v5196_v15 = vpop.permute.xlu1 %1759  ;;  %3471 = vset.pattern.permute.xlu1 %v3680_v38  ;;  %v5207_v28 = vpop.permute.xlu0 %1578  ;;  %v3683_v38 = vmov 65  }
 0x901   : > { %6462 = vst [vmem:[#allocation83_spill] sm:$0xff] %v5196_v15  ;;  %2628 = vperm.xlu1 %3471, %v5127_v32   ;;  %6467 = vst [vmem:[#allocation87_spill] sm:$0xff] %v5207_v28  ;;  %v3685_v15 = vmov 68   ;;  %v6495_v28 = vmov 23  }
 0x902   : > { %3493 = vset.pattern.permute.xlu0 %v6463_v13 }
 0x904   : > { %v5202_v21 = vpop.permute.xlu1 %1795  ;;  %v5212_v34 = vpop.permute.xlu0 %1602 }
 0x905   : > { %6465 = vst [vmem:[#allocation85_spill] sm:$0xff] %v5202_v21  ;;  %3472 = vset.pattern.permute.xlu1 %v3681_v31  ;;  %6469 = vst [vmem:[#allocation89_spill] sm:$0xff] %v5212_v34  ;;  %v3684_v21 = vmov 67   ;;  %v6492_v34 = vmov 21  }
 0x906   : > { %2652 = vperm.xlu1 %3472, %v5127_v32  }
 0x908   : > { %v5205_v3 = vpop.permute.xlu1 %1831 }
 0x909   : > { %6466 = vst [vmem:[#allocation86_spill] sm:$0xff] %v5205_v3  ;;  %v5219_v3 = vpop.permute.xlu0 %1626 }
 0x90a   : > { %3474 = vset.pattern.permute.xlu1 %v3682_v26  ;;  %6472 = vst [vmem:[#allocation92_spill] sm:$0xff] %v5219_v3 }
 0x90b   : > { %2700 = vperm.xlu1 %3474, %v5127_v32  }
 0x90c   : > { %v5210_v25 = vpop.permute.xlu1 %1867 }
 0x90d   : > { %6468 = vst [vmem:[#allocation88_spill] sm:$0xff] %v5210_v25  ;;  %v5225_v25 = vpop.permute.xlu0 %1650 }
 0x90e   : > { %6473 = vst [vmem:[#allocation93_spill] sm:$0xff] %v5225_v25  ;;  %v3689_v25 = vmov 71  }
 0x90f   : > { %3475 = vset.pattern.permute.xlu1 %v3683_v38 }
 0x910   : > { %v5214_v13 = vpop.permute.xlu1 %1903  ;;  %2724 = vperm.xlu1 %3475, %v5127_v32  }
 0x911   : > { %6470 = vst [vmem:[#allocation90_spill] sm:$0xff] %v5214_v13  ;;  %v3686_v13 = vmov 69  }
 0x914   : > { %v5217_v31 = vpop.permute.xlu1 %1939  ;;  %3477 = vset.pattern.permute.xlu1 %v3684_v21  ;;  %v5232_v21 = vpop.permute.xlu0 %1685 }
 0x915   : > { %6471 = vst [vmem:[#allocation91_spill] sm:$0xff] %v5217_v31  ;;  %2772 = vperm.xlu1 %3477, %v5127_v32   ;;  %6475 = vst [vmem:[#allocation95_spill] sm:$0xff] %v5232_v21  ;;  %v6482_v21 = vmov 17  }
 0x918   : > { %v5222_v26 = vpop.permute.xlu1 %2074 }
 0x919   : > { %3478 = vset.pattern.permute.xlu1 %v3685_v15  ;;  %v5237_v15 = vpop.permute.xlu0 %1721 }
 0x91a   : > { %2796 = vperm.xlu1 %3478, %v5127_v32   ;;  %6477 = vst [vmem:[#allocation97_spill] sm:$0xff] %v5237_v15 }
 0x91c   : > { %v5227_v38 = vpop.permute.xlu1 %2095 }
 0x91d   : > { %6474 = vst [vmem:[#allocation94_spill] sm:$0xff] %v5227_v38  ;;  %v5244_v58 = vpop.permute.xlu0 %1757 }
 0x91e   : > { %3480 = vset.pattern.permute.xlu1 %v3686_v13  ;;  %6480 = vst [vmem:[#allocation100_spill] sm:$0xff] %v5244_v58 }
 0x91f   : > { %2820 = vperm.xlu1 %3480, %v5127_v32  }
 0x920   : > { %v5230_v31 = vpop.permute.xlu1 %2112 }
 0x921   : > { %v5250_v55 = vpop.permute.xlu0 %1793 }
 0x922   : > { %6483 = vst [vmem:[#allocation102_spill] sm:$0xff] %v5250_v55 }
 0x923   : > { %3481 = vset.pattern.permute.xlu1 %v3687_v43 }
 0x924   : > { %v5234_v53 = vpop.permute.xlu1 %2114  ;;  %2363 = vperm.xlu1 %3481, %v5127_v32  }
 0x925   : > { %6476 = vst [vmem:[#allocation96_spill] sm:$0xff] %v5234_v53  ;;  %v5259_v58 = vpop.permute.xlu0 %1829 }
 0x926   : > { %6487 = vst [vmem:[#allocation105_spill] sm:$0xff] %v5259_v58 }
 0x928   : > { %v5239_v36 = vpop.permute.xlu1 %2131  ;;  %3483 = vset.pattern.permute.xlu1 %v3688_v29  ;;  %v6485_v29 = vmov 18  }
 0x929   : > { %6478 = vst [vmem:[#allocation98_spill] sm:$0xff] %v5239_v36  ;;  %2387 = vperm.xlu1 %3483, %v5127_v32  }
 0x92c   : > { %v5242_v13 = vpop.permute.xlu1 %2133 }
 0x92d   : > { %6479 = vst [vmem:[#allocation99_spill] sm:$0xff] %v5242_v13  ;;  %3484 = vset.pattern.permute.xlu1 %v3689_v25 }
 0x92e   : > { %2868 = vperm.xlu1 %3484, %v5127_v32  }
 0x930   : > { %v5247_v43 = vpop.permute.xlu1 %2150 }
 0x931   : > { %6481 = vst [vmem:[#allocation101_spill] sm:$0xff] %v5247_v43 }
 0x932   : > { %3486 = vset.pattern.permute.xlu1 %v6482_v21  ;;  %v5265_v21 = vpop.permute.xlu0 %1865 }
 0x933   : > { %2438 = vperm.xlu1 %3486, %v5127_v32   ;;  %6490 = vst [vmem:[#allocation107_spill] sm:$0xff] %v5265_v21 }
 0x934   : > { %v5253_v15 = vpop.permute.xlu1 %2152 }
 0x935   : > { %6484 = vst [vmem:[#allocation103_spill] sm:$0xff] %v5253_v15 }
 0x936   : > { %v5273_v54 = vpop.permute.xlu0 %1901 }
 0x937   : > { %3487 = vset.pattern.permute.xlu1 %v6485_v29  ;;  %6494 = vst [vmem:[#allocation110_spill] sm:$0xff] %v5273_v54 }
 0x938   : > { %v5256_v3 = vpop.permute.xlu1 %2169  ;;  %2448 = vperm.xlu1 %3487, %v5127_v32  }
 0x939   : > { %6486 = vst [vmem:[#allocation104_spill] sm:$0xff] %v5256_v3 }
 0x93c   : > { %v5261_v25 = vpop.permute.xlu1 %2171  ;;  %3489 = vset.pattern.permute.xlu1 %v6489_v30  ;;  %v5279_v30 = vpop.permute.xlu0 %1937 }
 0x93d   : > { %6488 = vst [vmem:[#allocation106_spill] sm:$0xff] %v5261_v25  ;;  %2468 = vperm.xlu1 %3489, %v5127_v32   ;;  %6497 = vst [vmem:[#allocation112_spill] sm:$0xff] %v5279_v30 }
 0x940   : > { %v5267_v55 = vpop.permute.xlu1 %2188  ;;  %v5284_v51 = vpop.permute.xlu0 %2076 }
 0x941   : > { %6491 = vst [vmem:[#allocation108_spill] sm:$0xff] %v5267_v55  ;;  %3490 = vset.pattern.permute.xlu1 %v6492_v34  ;;  %6500 = vst [vmem:[#allocation114_spill] sm:$0xff] %v5284_v51 }
 0x942   : > { %2478 = vperm.xlu1 %3490, %v5127_v32  }
 0x944   : > { %v5271_v29 = vpop.permute.xlu1 %2190  ;;  %v5288_v48 = vpop.permute.xlu0 %2093 }
 0x945   : > { %6493 = vst [vmem:[#allocation109_spill] sm:$0xff] %v5271_v29 }
 0x946   : > { %3492 = vset.pattern.permute.xlu1 %v6495_v28 }
 0x947   : > { %2498 = vperm.xlu1 %3492, %v5127_v32  }
 0x948   : > { %v5277_v58 = vpop.permute.xlu1 %2207  ;;  %v5292_v54 = vpop.permute.xlu0 %2252 }
 0x949   : > { %6496 = vst [vmem:[#allocation111_spill] sm:$0xff] %v5277_v58  ;;  %6503 = vst [vmem:[#allocation117_spill] sm:$0xff] %v5292_v54 }
 0x94b   : > { %3494 = vset.pattern.permute.xlu1 %v6498_v16 }
 0x94c   : > { %v5282_v21 = vpop.permute.xlu1 %2209  ;;  %v5296_v32 = vpop.permute.xlu0 %2276 }
 0x94d   : > { %6499 = vst [vmem:[#allocation113_spill] sm:$0xff] %v5282_v21  ;;  %6505 = vst [vmem:[#allocation119_spill] sm:$0xff] %v5296_v32 }
 0x950   : > { %v5286_v34 = vpop.permute.xlu1 %2228  ;;  %v5300_v30 = vpop.permute.xlu0 %2300 }
 0x951   : > { %6501 = vst [vmem:[#allocation115_spill] sm:$0xff] %v5286_v34  ;;  %6507 = vst [vmem:[#allocation121_spill] sm:$0xff] %v5300_v30 }
 0x954   : > { %v5290_v63 = vpop.permute.xlu1 %2230  ;;  %v5304_v22 = vpop.permute.xlu0 %2324 }
 0x955   : > { %6502 = vst [vmem:[#allocation116_spill] sm:$0xff] %v5290_v63  ;;  %6509 = vst [vmem:[#allocation123_spill] sm:$0xff] %v5304_v22 }
 0x958   : > { %v5294_v28 = vpop.permute.xlu1 %2254  ;;  %v2533_v8 = vpop.permute.xlu0 %2532 }
 0x959   : > { %6504 = vst [vmem:[#allocation118_spill] sm:$0xff] %v5294_v28  ;;  %v2535_v17 = vmul.f32 %v2533_v8, %v4913_v11  ;;  %v2537_v28 = vmul.f32 %v2533_v8, %v4648_v59 }
 0x95c   : > { %v5298_v1 = vpop.permute.xlu1 %2278  ;;  %v2605_v2 = vpop.permute.xlu0 %2604 }
 0x95d   : > { %6506 = vst [vmem:[#allocation120_spill] sm:$0xff] %v5298_v1 }
 0x960   : > { %v5302_v16 = vpop.permute.xlu1 %2302 }
 0x961   : > { %6508 = vst [vmem:[#allocation122_spill] sm:$0xff] %v5302_v16  ;;  %v2536_v16 = vmul.f32 %v2533_v8, %v4973_v37 }
 0x971   : > { %v2509_v47 = vpop.permute.xlu1 %2508 }
 0x972   : > { %v2511_v18 = vmul.f32 %v2509_v47, %v4908_v56  ;;  %v2512_v35 = vmul.f32 %v2509_v47, %v4959_v9  ;;  %v2513_v1 = vmul.f32 %v2509_v47, %v4639_v40 }
 0x974   : > { %2519 = vrot.lane.b32.xlu0 %v2512_v35, %s3633_s19  ;;  %2517 = vrot.lane.b32.xlu1 %v2511_v18, %s3633_s19 }
 0x976   : > { %v2557_v10 = vpop.permute.xlu1 %2556 }
 0x977   : > { %v2559_v35 = vmul.f32 %v2557_v10, %v4921_v23  ;;  %v2560_v18 = vmul.f32 %v2557_v10, %v4982_v27 }
 0x978   : > { %2541 = vrot.lane.b32.xlu0 %v2535_v17, %s3633_s19  ;;  %2521 = vrot.lane.b32.xlu1 %v2513_v1, %s3633_s19  ;;  %v2561_v17 = vmul.f32 %v2557_v10, %v4657_v19  ;;  %v2608_v10 = vmul.f32 %v2605_v2, %v5000_v6 }
 0x97b   : > { %v2581_v22 = vpop.permute.xlu1 %2580 }
 0x97c   : > { %2545 = vrot.lane.b32.xlu0 %v2537_v28, %s3633_s19  ;;  %2543 = vrot.lane.b32.xlu1 %v2536_v16, %s3633_s19  ;;  %v2583_v1 = vmul.f32 %v2581_v22, %v4931_v12  ;;  %v2585_v8 = vmul.f32 %v2581_v22, %v4666_v20  ;;  %v2584_v16 = vmul.f32 %v2581_v22, %v4991_v45 }
 0x980   : > { %2567 = vrot.lane.b32.xlu0 %v2560_v18, %s3633_s19  ;;  %2565 = vrot.lane.b32.xlu1 %v2559_v35, %s3633_s19  ;;  %v2629_v47 = vpop.permute.xlu1 %2628  ;;  %v2607_v35 = vmul.f32 %v2605_v2, %v4940_v7 }
 0x981   : > { %v2633_v22 = vmul.f32 %v2629_v47, %v4685_v4 }
 0x984   : > { %2569 = vrot.lane.b32.xlu1 %v2561_v17, %s3633_s19  ;;  %2589 = vrot.lane.b32.xlu0 %v2583_v1, %s3633_s19  ;;  %v2609_v17 = vmul.f32 %v2605_v2, %v4674_v39  ;;  %v2631_v1 = vmul.f32 %v2629_v47, %v4947_v5 }
 0x985   : > { %v2653_v28 = vpop.permute.xlu1 %2652 }
 0x986   : > { %v2656_v2 = vmul.f32 %v2653_v28, %v5014_v0 }
 0x988   : > { %2591 = vrot.lane.b32.xlu1 %v2584_v16, %s3633_s19  ;;  %2593 = vrot.lane.b32.xlu0 %v2585_v8, %s3633_s19  ;;  %v2632_v8 = vmul.f32 %v2629_v47, %v5005_v14  ;;  %v2657_v47 = vmul.f32 %v2653_v28, %v4693_v50 }
 0x98a   : > { %v2701_v18 = vpop.permute.xlu1 %2700 }
 0x98c   : > { %2613 = vrot.lane.b32.xlu1 %v2607_v35, %s3633_s19  ;;  %2615 = vrot.lane.b32.xlu0 %v2608_v10, %s3633_s19  ;;  %v2655_v35 = vmul.f32 %v2653_v28, %v4956_v33  ;;  %v2677_v10 = vpop.permute.xlu0 %2676 }
 0x98f   : > { %v2725_v30 = vpop.permute.xlu1 %2724 }
 0x990   : > { %2617 = vrot.lane.b32.xlu1 %v2609_v17, %s3633_s19  ;;  %2637 = vrot.lane.b32.xlu0 %v2631_v1, %s3633_s19  ;;  %v2679_v17 = vmul.f32 %v2677_v10, %v4966_v41  ;;  %v2681_v1 = vmul.f32 %v2677_v10, %v4704_v57  ;;  %v2728_v29 = vmul.f32 %v2725_v30, %v4973_v37 }
 0x994   : > { %2639 = vrot.lane.b32.xlu1 %v2632_v8, %s3633_s19  ;;  %2641 = vrot.lane.b32.xlu0 %v2633_v22, %s3633_s19  ;;  %v2773_v16 = vpop.permute.xlu1 %2772  ;;  %v2680_v22 = vmul.f32 %v2677_v10, %v5023_v60  ;;  %v2749_v8 = vpop.permute.xlu0 %2748  ;;  %v2705_v10 = vmul.f32 %v2701_v18, %v4639_v40 }
 0x995   : > { %v2776_v34 = vmul.f32 %v2773_v16, %v4991_v45  ;;  %v2777_v13 = vmul.f32 %v2773_v16, %v4666_v20 }
 0x998   : > { %2663 = vrot.lane.b32.xlu0 %v2656_v2, %s3633_s19  ;;  %2661 = vrot.lane.b32.xlu1 %v2655_v35, %s3633_s19  ;;  %v2703_v35 = vmul.f32 %v2701_v18, %v4908_v56  ;;  %v2704_v2 = vmul.f32 %v2701_v18, %v4959_v9  ;;  %v5362_v32 = vpop.permute.xlu0 %2339  ;;  %v2751_v18 = vmul.f32 %v2749_v8, %v4921_v23 }
 0x999   : > { %v5346_v63 = vpop.permute.xlu1 %2796 }
 0x99c   : > { %2685 = vrot.lane.b32.xlu0 %v2679_v17, %s3633_s19  ;;  %2665 = vrot.lane.b32.xlu1 %v2657_v47, %s3633_s19  ;;  %v2727_v17 = vmul.f32 %v2725_v30, %v4913_v11  ;;  %v2729_v47 = vmul.f32 %v2725_v30, %v4648_v59  ;;  %v2775_v30 = vmul.f32 %v2773_v16, %v4931_v12 }
 0x99e   : > { %v5354_v21 = vpop.permute.xlu1 %2820 }
 0x9a0   : > { %2689 = vrot.lane.b32.xlu0 %v2681_v1, %s3633_s19  ;;  %2687 = vrot.lane.b32.xlu1 %v2680_v22, %s3633_s19  ;;  %v5373_v22 = vpop.permute.xlu0 %2844 }
 0x9a3   : > { %v5360_v28 = vpop.permute.xlu1 %2363 }
 0x9a4   : > { %2711 = vrot.lane.b32.xlu0 %v2704_v2, %s3634_s25  ;;  %2709 = vrot.lane.b32.xlu1 %v2703_v35, %s3634_s25  ;;  %v2752_v2 = vmul.f32 %v2749_v8, %v4982_v27  ;;  %v2429_v25 = vpop.permute.xlu0 %2428 }
 0x9a8   : > { %2713 = vrot.lane.b32.xlu1 %v2705_v10, %s3634_s25  ;;  %2733 = vrot.lane.b32.xlu0 %v2727_v17, %s3634_s25  ;;  %v5371_v1 = vpop.permute.xlu1 %2387  ;;  %v2753_v10 = vmul.f32 %v2749_v8, %v4657_v19  ;;  %v2431_v17 = vmul.f32 %v2429_v25, %v4639_v40  ;;  %v2459_v8 = vpop.permute.xlu0 %2458 }
 0x9a9   : > { %v2461_v55 = vmul.f32 %v2459_v8, %v4666_v20  ;;  %v2462_v16 = vmul.f32 %v2459_v8, %v4931_v12 }
 0x9ac   : > { %2735 = vrot.lane.b32.xlu1 %v2728_v29, %s3634_s25  ;;  %2737 = vrot.lane.b32.xlu0 %v2729_v47, %s3634_s25 }
 0x9ad   : > { %v5378_v35 = vpop.permute.xlu1 %2868 }
 0x9b0   : > { %2757 = vrot.lane.b32.xlu1 %v2751_v18, %s3634_s25  ;;  %2759 = vrot.lane.b32.xlu0 %v2752_v2, %s3634_s25  ;;  %v2432_v18 = vmul.f32 %v2429_v25, %v4908_v56  ;;  %v2433_v2 = vmul.f32 %v2429_v25, %v4959_v9  ;;  %v2320_v25 = vmul.f32 %v4897_v61, %v4674_v39 }
 0x9b2   : > { %v2439_v29 = vpop.permute.xlu1 %2438 }
 0x9b3   : > { %v2441_v47 = vmul.f32 %v2439_v29, %v4648_v59  ;;  %v2442_v54 = vmul.f32 %v2439_v29, %v4913_v11  ;;  %v2443_v15 = vmul.f32 %v2439_v29, %v4973_v37 }
 0x9b4   : > { %2761 = vrot.lane.b32.xlu1 %v2753_v10, %s3634_s25  ;;  %2781 = vrot.lane.b32.xlu0 %v2775_v30, %s3634_s25 }
 0x9b5   : > { %v2444_v58 = vadd.f32 %v2441_v47, %v2431_v17  ;;  %v2445_v53 = vadd.f32 %v2442_v54, %v2432_v18  ;;  %v2446_v3 = vadd.f32 %v2443_v15, %v2433_v2  ;;  %v2319_v54 = vmul.f32 %v4897_v61, %v5000_v6 }
 0x9b6   : > { %v2463_v15 = vmul.f32 %v2459_v8, %v4991_v45  ;;  %v2799_v61 = vmul.f32 %v5346_v63, %v4940_v7 }
 0x9b7   : > { %v2449_v43 = vpop.permute.xlu1 %2448 }
 0x9b8   : > { %v2451_v29 = vmul.f32 %v2449_v43, %v4657_v19  ;;  %v2452_v10 = vmul.f32 %v2449_v43, %v4921_v23  ;;  %v2453_v30 = vmul.f32 %v2449_v43, %v4982_v27  ;;  %2783 = vrot.lane.b32.xlu1 %v2776_v34, %s3634_s25  ;;  %2785 = vrot.lane.b32.xlu0 %v2777_v13, %s3634_s25 }
 0x9ba   : > { %v2454_v17 = vadd.f32 %v2451_v29, %v2444_v58  ;;  %v2455_v47 = vadd.f32 %v2452_v10, %v2445_v53  ;;  %v2456_v18 = vadd.f32 %v2453_v30, %v2446_v3  ;;  %v2800_v58 = vmul.f32 %v5346_v63, %v5000_v6  ;;  %v2489_v29 = vpop.permute.xlu0 %2488 }
 0x9bb   : > { %v2491_v10 = vmul.f32 %v2489_v29, %v4693_v50 }
 0x9bc   : > { %2326 = vrot.lane.b32.xlu1 %v2319_v54, %s3634_s25  ;;  %2328 = vrot.lane.b32.xlu0 %v2320_v25, %s3634_s25  ;;  %v2464_v43 = vadd.f32 %v2461_v55, %v2454_v17  ;;  %v2465_v34 = vadd.f32 %v2462_v16, %v2455_v47  ;;  %v2466_v13 = vadd.f32 %v2463_v15, %v2456_v18  ;;  %v2469_v2 = vpop.permute.xlu1 %2468 }
 0x9bd   : > { %v2471_v38 = vmul.f32 %v2469_v2, %v4674_v39  ;;  %v2472_v51 = vmul.f32 %v2469_v2, %v4940_v7  ;;  %v2473_v36 = vmul.f32 %v2469_v2, %v5000_v6  ;;  %v2342_v55 = vmul.f32 %v5362_v32, %v4947_v5 }
 0x9be   : > { %v2801_v25 = vmul.f32 %v5346_v63, %v4674_v39  ;;  %v2492_v54 = vmul.f32 %v2489_v29, %v4956_v33  ;;  %v2493_v15 = vmul.f32 %v2489_v29, %v5014_v0  ;;  %v2343_v63 = vmul.f32 %v5362_v32, %v5005_v14 }
 0x9bf   : > { %v2474_v53 = vadd.f32 %v2471_v38, %v2464_v43  ;;  %v2475_v3 = vadd.f32 %v2472_v51, %v2465_v34  ;;  %v2476_v8 = vadd.f32 %v2473_v36, %v2466_v13  ;;  %v2344_v51 = vmul.f32 %v5362_v32, %v4685_v4 }
 0x9c0   : > { %2807 = vrot.lane.b32.xlu0 %v2800_v58, %s3634_s25  ;;  %2805 = vrot.lane.b32.xlu1 %v2799_v61, %s3634_s25  ;;  %v2823_v32 = vmul.f32 %v5354_v21, %v4947_v5 }
 0x9c1   : > { %v2479_v30 = vpop.permute.xlu1 %2478 }
 0x9c2   : > { %v2481_v16 = vmul.f32 %v2479_v30, %v4685_v4  ;;  %v2482_v38 = vmul.f32 %v2479_v30, %v4947_v5  ;;  %v2483_v36 = vmul.f32 %v2479_v30, %v5005_v14  ;;  %v2366_v30 = vmul.f32 %v5360_v28, %v4956_v33 }
 0x9c4   : > { %v2484_v17 = vadd.f32 %v2481_v16, %v2474_v53  ;;  %v2485_v47 = vadd.f32 %v2482_v38, %v2475_v3  ;;  %v2486_v18 = vadd.f32 %v2483_v36, %v2476_v8  ;;  %2348 = vrot.lane.b32.xlu0 %v2342_v55, %s3634_s25  ;;  %2809 = vrot.lane.b32.xlu1 %v2801_v25, %s3634_s25 }
 0x9c5   : > { %v2824_v55 = vmul.f32 %v5354_v21, %v5005_v14  ;;  %v2367_v25 = vmul.f32 %v5360_v28, %v5014_v0  ;;  %v2368_v16 = vmul.f32 %v5360_v28, %v4693_v50  ;;  %v2848_v38 = vmul.f32 %v5373_v22, %v5014_v0 }
 0x9c6   : > { %v2499_v43 = vpop.permute.xlu1 %2498  ;;  %v2494_v34 = vadd.f32 %v2491_v10, %v2484_v17  ;;  %v2495_v13 = vadd.f32 %v2492_v54, %v2485_v47  ;;  %v2496_v2 = vadd.f32 %v2493_v15, %v2486_v18  ;;  %v2825_v10 = vmul.f32 %v5354_v21, %v4685_v4 }
 0x9c7   : > { %v2501_v61 = vmul.f32 %v2499_v43, %v4704_v57  ;;  %v2502_v58 = vmul.f32 %v2499_v43, %v4966_v41  ;;  %v2503_v29 = vmul.f32 %v2499_v43, %v5023_v60  ;;  %v2847_v21 = vmul.f32 %v5373_v22, %v4956_v33 }
 0x9c8   : > { %2352 = vrot.lane.b32.xlu0 %v2344_v51, %s3634_s25  ;;  %2350 = vrot.lane.b32.xlu1 %v2343_v63, %s3634_s25  ;;  %v2849_v36 = vmul.f32 %v5373_v22, %v4693_v50  ;;  %v2390_v28 = vmul.f32 %v5371_v1, %v4966_v41  ;;  %v2391_v51 = vmul.f32 %v5371_v1, %v5023_v60  ;;  %v3510_v22 = vld [vmem:[%s6059_s2] sm:$0x77] }
 0x9c9   : > { %v2504_v53 = vadd.f32 %v2501_v61, %v2494_v34  ;;  %v2505_v3 = vadd.f32 %v2502_v58, %v2495_v13  ;;  %v2506_v8 = vadd.f32 %v2503_v29, %v2496_v2  ;;  %v2392_v54 = vmul.f32 %v5371_v1, %v4704_v57  ;;  %v5497_v29 = vld [vmem:[%s6064_s7] sm:$0xff] }
 0x9ca   : > { %v2894_v15 = vrot.slane %v3510_v22, %v3954_v46  ;;  %v2871_v17 = vmul.f32 %v5378_v35, %v4966_v41  ;;  %v2872_v47 = vmul.f32 %v5378_v35, %v5023_v60  ;;  %v2898_v18 = vrot.slane %v3510_v22, %v6430_v44 }
 0x9cb   : > { %v2873_v63 = vmul.f32 %v5378_v35, %v4704_v57 }
 0x9cc   : > { %2831 = vrot.lane.b32.xlu0 %v2824_v55, %s3634_s25  ;;  %2829 = vrot.lane.b32.xlu1 %v2823_v32, %s3634_s25  ;;  %v2904_v1 = vrot.slane %v2894_v15, %v3954_v46  ;;  %v2908_v58 = vrot.slane %v2898_v18, %v3954_v46  ;;  %v6511_v15 = vmov 6  }
 0x9d0   : > { %2833 = vrot.lane.b32.xlu1 %v2825_v10, %s3634_s25  ;;  %2372 = vrot.lane.b32.xlu0 %v2366_v30, %s3634_s25 }
 0x9d4   : > { %2374 = vrot.lane.b32.xlu1 %v2367_v25, %s3634_s25  ;;  %2376 = vrot.lane.b32.xlu0 %v2368_v16, %s3634_s25 }
 0x9d8   : > { %2853 = vrot.lane.b32.xlu1 %v2847_v21, %s3634_s25  ;;  %2855 = vrot.lane.b32.xlu0 %v2848_v38, %s3634_s25 }
 0x9dc   : > { %2857 = vrot.lane.b32.xlu1 %v2849_v36, %s3634_s25  ;;  %2396 = vrot.lane.b32.xlu0 %v2390_v28, %s3634_s25  ;;  %v6510_v36 = vmov 7  }
 0x9e0   : > { %2398 = vrot.lane.b32.xlu1 %v2391_v51, %s3634_s25  ;;  %2400 = vrot.lane.b32.xlu0 %v2392_v54, %s3634_s25 }
 0x9e4   : > { %2879 = vrot.lane.b32.xlu0 %v2872_v47, %s3634_s25  ;;  %2877 = vrot.lane.b32.xlu1 %v2871_v17, %s3634_s25  ;;  %v6512_v17 = vmov 1  }
 0x9e6   : > { %v2520_v43 = vpop.permute.xlu0 %2519  ;;  %v2518_v34 = vpop.permute.xlu1 %2517 }
 0x9e7   : > { %v2523_v13 = vsel %vm478_vm0, %v2518_v34, %v2520_v43  ;;  %v2528_v2 = vadd.f32 %v2518_v34, %v2504_v53  ;;  %v6513_v34 = vmov 0  }
 0x9e8   : > { %v2529_v61 = vadd.f32 %v2523_v13, %v2505_v3  ;;  %2911 = vrot.lane.b32.xlu0 %v2904_v1, %s3649_s16  ;;  %2881 = vrot.lane.b32.xlu1 %v2873_v63, %s3634_s25 }
 0x9ea   : > { %v2542_v32 = vpop.permute.xlu0 %2541  ;;  %v2522_v55 = vpop.permute.xlu1 %2521 }
 0x9eb   : > { %v2552_v35 = vadd.f32 %v2542_v32, %v2528_v2  ;;  %v2524_v10 = vsel %vm478_vm0, %v2520_v43, %v2522_v55 }
 0x9ec   : > { %v2530_v30 = vadd.f32 %v2524_v10, %v2506_v8  ;;  %2913 = vrot.lane.b32.xlu1 %v2908_v58, %s3649_s16  ;;  %3037 = vperm.xlu0 %3493, %v5497_v29  }
 0x9ee   : > { %v2546_v53 = vpop.permute.xlu0 %2545  ;;  %v2544_v3 = vpop.permute.xlu1 %2543 }
 0x9ef   : > { %v2547_v25 = vsel %vm478_vm0, %v2542_v32, %v2544_v3  ;;  %v2548_v16 = vsel %vm478_vm0, %v2544_v3, %v2546_v53  ;;  %v2000_v3 = vmul.f32 %v4881_v62, %v4648_v59 }
 0x9f0   : > { %v2553_v21 = vadd.f32 %v2547_v25, %v2529_v61  ;;  %v2554_v38 = vadd.f32 %v2548_v16, %v2530_v30  ;;  %3064 = vperm.xlu1 %3494, %v5497_v29   ;;  %3496 = vset.pattern.permute.xlu0 %v6510_v36  ;;  %v1990_v16 = vmul.f32 %v4855_v52, %v4639_v40 }
 0x9f1   : > { %3118 = vperm.xlu0 %3496, %v5497_v29  }
 0x9f2   : > { %v2568_v28 = vpop.permute.xlu0 %2567  ;;  %v2566_v8 = vpop.permute.xlu1 %2565 }
 0x9f3   : > { %v2571_v51 = vsel %vm478_vm0, %v2566_v8, %v2568_v28  ;;  %v2576_v54 = vadd.f32 %v2566_v8, %v2552_v35 }
 0x9f4   : > { %v2577_v22 = vadd.f32 %v2571_v51, %v2553_v21  ;;  %3495 = vset.pattern.permute.xlu1 %v6511_v15  ;;  %v2003_v51 = vadd.f32 %v2000_v3, %v1990_v16  ;;  %v2002_v16 = vmul.f32 %v4881_v62, %v4973_v37 }
 0x9f5   : > { %3091 = vperm.xlu1 %3495, %v5497_v29   ;;  %3498 = vset.pattern.permute.xlu0 %v6512_v17 }
 0x9f6   : > { %v2590_v47 = vpop.permute.xlu0 %2589  ;;  %v2570_v1 = vpop.permute.xlu1 %2569 }
 0x9f7   : > { %v2600_v18 = vadd.f32 %v2590_v47, %v2576_v54  ;;  %v2572_v63 = vsel %vm478_vm0, %v2568_v28, %v2570_v1 }
 0x9f8   : > { %v2578_v43 = vadd.f32 %v2572_v63, %v2554_v38 }
 0x9f9   : > { %3497 = vset.pattern.permute.xlu1 %v6513_v34  ;;  %v2020_v34 = vmul.f32 %v4863_v42, %v4666_v20  ;;  %v6529_v20 = vld [vmem:[#allocation106_spill] sm:$0xff] }
 0x9fa   : > { %v2594_v13 = vpop.permute.xlu0 %2593  ;;  %v2592_v2 = vpop.permute.xlu1 %2591 }
 0x9fb   : > { %v2595_v61 = vsel %vm478_vm0, %v2590_v47, %v2592_v2  ;;  %v2596_v58 = vsel %vm478_vm0, %v2592_v2, %v2594_v13 }
 0x9fc   : > { %v2601_v32 = vadd.f32 %v2595_v61, %v2577_v22  ;;  %v2602_v55 = vadd.f32 %v2596_v58, %v2578_v43  ;;  %v2010_v22 = vmul.f32 %v4859_v49, %v4657_v19  ;;  %v6534_v19 = vld [vmem:[#allocation121_spill] sm:$0xff] }
 0x9fe   : > { %v2616_v35 = vpop.permute.xlu0 %2615  ;;  %v2614_v10 = vpop.permute.xlu1 %2613 }
 0x9ff   : > { %v2619_v30 = vsel %vm478_vm0, %v2614_v10, %v2616_v35  ;;  %v2624_v53 = vadd.f32 %v2614_v10, %v2600_v18  ;;  %v2013_v18 = vadd.f32 %v2010_v22, %v2003_v51 }
 0xa00   : > { %v2625_v25 = vadd.f32 %v2619_v30, %v2601_v32  ;;  %v2030_v32 = vmul.f32 %v4885_v24, %v4674_v39  ;;  %v1991_v30 = vmul.f32 %v4855_v52, %v4908_v56  ;;  %v6527_v39 = vld [vmem:[#allocation103_spill] sm:$0xff] }
 0xa01   : > { %v2023_v58 = vadd.f32 %v2020_v34, %v2013_v18 }
 0xa02   : > { %v2638_v21 = vpop.permute.xlu0 %2637  ;;  %v2618_v38 = vpop.permute.xlu1 %2617 }
 0xa03   : > { %v5520_v28 = vadd.f32 %v2638_v21, %v2624_v53  ;;  %v2620_v8 = vsel %vm478_vm0, %v2616_v35, %v2618_v38  ;;  %v2001_v53 = vmul.f32 %v4881_v62, %v4913_v11  ;;  %v2033_v3 = vadd.f32 %v2030_v32, %v2023_v58  ;;  %v6516_v32 = vld [vmem:[#allocation60_spill] sm:$0xff] }
 0xa04   : > { %v2626_v54 = vadd.f32 %v2620_v8, %v2602_v55  ;;  %v2021_v58 = vmul.f32 %v4863_v42, %v4931_v12 }
 0xa06   : > { %v2642_v15 = vpop.permute.xlu0 %2641  ;;  %v2640_v17 = vpop.permute.xlu1 %2639 }
 0xa07   : > { %v2643_v47 = vsel %vm478_vm0, %v2638_v21, %v2640_v17  ;;  %v2644_v1 = vsel %vm478_vm0, %v2640_v17, %v2642_v15  ;;  %v6514_v21 = vld [vmem:[#allocation55_spill] sm:$0xff]  ;;  %v2011_v17 = vmul.f32 %v4859_v49, %v4921_v23 }
 0xa08   : > { %v2649_v63 = vadd.f32 %v2643_v47, %v2625_v25  ;;  %v5527_v43 = vadd.f32 %v2644_v1, %v2626_v54  ;;  %v1992_v25 = vmul.f32 %v4855_v52, %v4959_v9  ;;  %v2040_v38 = vmul.f32 %v6514_v21, %v4685_v4  ;;  %v6515_v47 = vld [vmem:[#allocation57_spill] sm:$0xff]  ;;  %v6522_v4 = vld [vmem:[#allocation96_spill] sm:$0xff] }
 0xa09   : > { %v2004_v54 = vadd.f32 %v2001_v53, %v1991_v30  ;;  %v2050_v1 = vmul.f32 %v6515_v47, %v4693_v50  ;;  %v2012_v52 = vmul.f32 %v4859_v49, %v4982_v27  ;;  %v2060_v30 = vmul.f32 %v6516_v32, %v4704_v57 }
 0xa0a   : > { %v5531_v13 = vpop.permute.xlu0 %2663  ;;  %v5533_v2 = vpop.permute.xlu1 %2661  ;;  %v2043_v22 = vadd.f32 %v2040_v38, %v2033_v3  ;;  %v2005_v15 = vadd.f32 %v2002_v16, %v1992_v25  ;;  %v2022_v53 = vmul.f32 %v4863_v42, %v4991_v45 }
 0xa0b   : > { %v2667_v61 = vsel %vm478_vm0, %v5533_v2, %v5531_v13 }
 0xa0c   : > { %v5540_v55 = vadd.f32 %v2667_v61, %v2649_v63  ;;  %v2014_v63 = vadd.f32 %v2011_v17, %v2004_v54  ;;  %v2053_v34 = vadd.f32 %v2050_v1, %v2043_v22  ;;  %v2015_v61 = vadd.f32 %v2012_v52, %v2005_v15 }
 0xa0d   : > { %v2031_v54 = vmul.f32 %v4885_v24, %v4940_v7  ;;  %v2032_v15 = vmul.f32 %v4885_v24, %v5000_v6  ;;  %v6521_v7 = vld [vmem:[#allocation104_spill] sm:$0xff] }
 0xa0e   : > { %v5542_v35 = vpop.permute.xlu0 %2685  ;;  %v5544_v10 = vpop.permute.xlu1 %2665  ;;  %v2024_v49 = vadd.f32 %v2021_v58, %v2014_v63  ;;  %v2063_v16 = vadd.f32 %v2060_v30, %v2053_v34  ;;  %v2025_v38 = vadd.f32 %v2022_v53, %v2015_v61  ;;  %v2041_v63 = vmul.f32 %v6514_v21, %v4947_v5 }
 0xa0f   : > { %v2042_v34 = vmul.f32 %v6514_v21, %v5005_v14 }
 0xa10   : > { %v2082_v22 = vadd.f32 %v5222_v26, %v2063_v16  ;;  %v2034_v42 = vadd.f32 %v2031_v54, %v2024_v49  ;;  %v2035_v52 = vadd.f32 %v2032_v15, %v2025_v38  ;;  %v2051_v49 = vmul.f32 %v6515_v47, %v4956_v33  ;;  %v6517_v15 = vld [vmem:[#allocation98_spill] sm:$0xff] }
 0xa11   : > { %v2052_v16 = vmul.f32 %v6515_v47, %v5014_v0 }
 0xa12   : > { %v5556_v8 = vpop.permute.xlu0 %2689  ;;  %v5558_v51 = vpop.permute.xlu1 %2687  ;;  %v2101_v46 = vadd.f32 %v5288_v48, %v2082_v22  ;;  %v2044_v30 = vadd.f32 %v2041_v63, %v2034_v42  ;;  %v2045_v24 = vadd.f32 %v2042_v34, %v2035_v52  ;;  %v2061_v42 = vmul.f32 %v6516_v32, %v4966_v41  ;;  %v6518_v52 = vld [vmem:[#allocation114_spill] sm:$0xff] }
 0xa13   : > { %v2078_v63 = vsel %vm478_vm0, %v5222_v26, %v6518_v52 }
 0xa14   : > { %v2120_v53 = vadd.f32 %v5230_v31, %v2101_v46  ;;  %v2054_v22 = vadd.f32 %v2051_v49, %v2044_v30  ;;  %v2055_v21 = vadd.f32 %v2052_v16, %v2045_v24  ;;  %v2062_v46 = vmul.f32 %v6516_v32, %v5023_v60  ;;  %v6519_v30 = vld [vmem:[#allocation94_spill] sm:$0xff] }
 0xa15   : > { %v2097_v24 = vsel %vm478_vm0, %v5288_v48, %v6519_v30 }
 0xa16   : > { %v5566_v62 = vpop.permute.xlu0 %2711  ;;  %v5568_v18 = vpop.permute.xlu1 %2709  ;;  %v2139_v57 = vadd.f32 %v6517_v15, %v2120_v53  ;;  %v2064_v33 = vadd.f32 %v2061_v42, %v2054_v22  ;;  %v2065_v5 = vadd.f32 %v2062_v46, %v2055_v21  ;;  %v6520_v53 = vld [vmem:[#allocation101_spill] sm:$0xff]  ;;  %v2116_v22 = vsel %vm478_vm0, %v5230_v31, %v6522_v4  ;;  %v6523_v42 = vld [vmem:[#allocation108_spill] sm:$0xff] }
 0xa18   : > { %v2158_v49 = vadd.f32 %v6520_v53, %v2139_v57  ;;  %v2083_v16 = vadd.f32 %v2078_v63, %v2064_v33  ;;  %v2084_v41 = vadd.f32 %v6518_v52, %v2065_v5  ;;  %v6524_v5 = vld [vmem:[#allocation111_spill] sm:$0xff] }
 0xa19   : > { %v6525_v63 = vld [vmem:[#allocation99_spill] sm:$0xff] }
 0xa1a   : > { %v5576_v3 = vpop.permute.xlu0 %2733  ;;  %v5578_v25 = vpop.permute.xlu1 %2713  ;;  %v2102_v26 = vadd.f32 %v2097_v24, %v2083_v16  ;;  %v2177_v60 = vadd.f32 %v6521_v7, %v2158_v49  ;;  %v2103_v21 = vadd.f32 %v6519_v30, %v2084_v41  ;;  %v2135_v24 = vsel %vm478_vm0, %v6517_v15, %v6525_v63  ;;  %v6526_v16 = vld [vmem:[#allocation115_spill] sm:$0xff] }
 0xa1c   : > { %v2196_v48 = vadd.f32 %v6523_v42, %v2177_v60  ;;  %v2121_v33 = vadd.f32 %v2116_v22, %v2102_v26  ;;  %v2122_v49 = vadd.f32 %v6522_v4, %v2103_v21  ;;  %v2154_v26 = vsel %vm478_vm0, %v6520_v53, %v6527_v39  ;;  %v6528_v22 = vld [vmem:[#allocation117_spill] sm:$0xff] }
 0xa1d   : > { %v2173_v4 = vsel %vm478_vm0, %v6521_v7, %v6529_v20 }
 0xa1e   : > { %v5585_v17 = vpop.permute.xlu0 %2737  ;;  %v5587_v1 = vpop.permute.xlu1 %2735  ;;  %v2215_v52 = vadd.f32 %v6524_v5, %v2196_v48  ;;  %v2140_v60 = vadd.f32 %v2135_v24, %v2121_v33  ;;  %v2141_v30 = vadd.f32 %v6525_v63, %v2122_v49  ;;  %v6531_v63 = vld [vmem:[#allocation119_spill] sm:$0xff] }
 0xa20   : > { %v2239_v12 = vadd.f32 %v6526_v16, %v2215_v52  ;;  %v2159_v15 = vadd.f32 %v2154_v26, %v2140_v60  ;;  %v2160_v21 = vadd.f32 %v6527_v39, %v2141_v30  ;;  %v6530_v52 = vld [vmem:[#allocation109_spill] sm:$0xff]  ;;  %v6533_v30 = vld [vmem:[#allocation116_spill] sm:$0xff] }
 0xa21   : > { %v2192_v33 = vsel %vm478_vm0, %v6523_v42, %v6530_v52  ;;  %v6532_v60 = vld [vmem:[#allocation113_spill] sm:$0xff]  ;;  %v2234_v42 = vsel %vm590_vm1, %v6526_v16, %v6533_v30 }
 0xa22   : > { %v5594_v61 = vpop.permute.xlu0 %2759  ;;  %v5596_v58 = vpop.permute.xlu1 %2757  ;;  %v2263_v48 = vadd.f32 %v6528_v22, %v2239_v12  ;;  %v2178_v12 = vadd.f32 %v2173_v4, %v2159_v15  ;;  %v2179_v14 = vadd.f32 %v6529_v20, %v2160_v21  ;;  %v2211_v26 = vsel %vm478_vm0, %v6524_v5, %v6532_v60  ;;  %v6535_v15 = vld [vmem:[#allocation69_spill] sm:$0xff]  ;;  %v6536_v5 = vld [vmem:[#allocation118_spill] sm:$0xff] }
 0xa23   : > { %v2235_v20 = vsel %vm590_vm1, %v6533_v30, %v6535_v15 }
 0xa24   : > { %v2287_v24 = vadd.f32 %v6531_v63, %v2263_v48  ;;  %v2197_v7 = vadd.f32 %v2192_v33, %v2178_v12  ;;  %v2198_v39 = vadd.f32 %v6530_v52, %v2179_v14  ;;  %v2258_v14 = vsel %vm590_vm1, %v6528_v22, %v6536_v5  ;;  %v6537_v52 = vld [vmem:[#allocation71_spill] sm:$0xff]  ;;  %v6538_v12 = vld [vmem:[#allocation120_spill] sm:$0xff] }
 0xa25   : > { %v2259_v16 = vsel %vm590_vm1, %v6536_v5, %v6537_v52  ;;  %v2668_v33 = vsel %vm478_vm0, %v5531_v13, %v5544_v10  ;;  %v2691_v13 = vsel %vm478_vm0, %v5542_v35, %v5558_v51  ;;  %v2692_v10 = vsel %vm478_vm0, %v5558_v51, %v5556_v8  ;;  %v6542_v5 = vld [vmem:[#allocation75_spill] sm:$0xff] }
 0xa26   : > { %v5603_v38 = vpop.permute.xlu0 %2781  ;;  %v5605_v54 = vpop.permute.xlu1 %2761  ;;  %v2311_v48 = vadd.f32 %v6534_v19, %v2287_v24  ;;  %v2216_v56 = vadd.f32 %v2211_v26, %v2197_v7  ;;  %v2217_v4 = vadd.f32 %v6532_v60, %v2198_v39  ;;  %v2282_v26 = vsel %vm590_vm1, %v6531_v63, %v6538_v12  ;;  %v6539_v7 = vld [vmem:[#allocation123_spill] sm:$0xff] }
 0xa27   : > { %v2672_v60 = vadd.f32 %v5533_v2, %v5520_v28  ;;  %v2716_v8 = vsel %vm590_vm1, %v5566_v62, %v5578_v25 }
 0xa28   : > { %v2240_v21 = vadd.f32 %v2234_v42, %v2216_v56  ;;  %v2241_v24 = vadd.f32 %v2235_v20, %v2217_v4  ;;  %v2335_v39 = vadd.f32 %v6539_v7, %v2311_v48  ;;  %v6540_v42 = vld [vmem:[#allocation73_spill] sm:$0xff]  ;;  %v6541_v20 = vld [vmem:[#allocation122_spill] sm:$0xff]  ;;  %v2674_v48 = vadd.f32 %v2668_v33, %v5527_v43 }
 0xa29   : > { %v2283_v15 = vsel %vm590_vm1, %v6538_v12, %v6540_v42  ;;  %v2306_v28 = vsel %vm590_vm1, %v6534_v19, %v6541_v20  ;;  %v2696_v2 = vadd.f32 %v5542_v35, %v2672_v60  ;;  %v2697_v19 = vadd.f32 %v2691_v13, %v5540_v55 }
 0xa2a   : > { %v5615_v34 = vpop.permute.xlu0 %2785  ;;  %v5617_v47 = vpop.permute.xlu1 %2783  ;;  %v2264_v30 = vadd.f32 %v2258_v14, %v2240_v21  ;;  %v2265_v63 = vadd.f32 %v2259_v16, %v2241_v24  ;;  %v2307_v14 = vsel %vm590_vm1, %v6541_v20, %v6542_v5  ;;  %v2715_v21 = vsel %vm590_vm1, %v5568_v18, %v5566_v62 }
 0xa2b   : > { %v2698_v52 = vadd.f32 %v2692_v10, %v2674_v48  ;;  %v2720_v35 = vadd.f32 %v5568_v18, %v2696_v2  ;;  %v2721_v25 = vadd.f32 %v2715_v21, %v2697_v19  ;;  %v2740_v18 = vsel %vm590_vm1, %v5587_v1, %v5585_v17 }
 0xa2c   : > { %v2288_v4 = vadd.f32 %v2282_v26, %v2264_v30  ;;  %v2289_v51 = vadd.f32 %v2283_v15, %v2265_v63  ;;  %v2764_v17 = vsel %vm590_vm1, %v5594_v61, %v5605_v54  ;;  %v2788_v48 = vsel %vm590_vm1, %v5617_v47, %v5615_v34 }
 0xa2d   : > { %v2744_v55 = vadd.f32 %v5576_v3, %v2720_v35  ;;  %v2722_v60 = vadd.f32 %v2716_v8, %v2698_v52  ;;  %v2787_v54 = vsel %vm590_vm1, %v5603_v38, %v5617_v47 }
 0xa2e   : > { %v5624_v32 = vpop.permute.xlu0 %2328  ;;  %v5626_v50 = vpop.permute.xlu1 %2326  ;;  %v2312_v33 = vadd.f32 %v2306_v28, %v2288_v4  ;;  %v2313_v62 = vadd.f32 %v2307_v14, %v2289_v51 }
 0xa2f   : > { %v2330_v24 = vsel %vm590_vm1, %v6539_v7, %v5626_v50  ;;  %v2331_v12 = vsel %vm590_vm1, %v5626_v50, %v5624_v32  ;;  %v2739_v50 = vsel %vm590_vm1, %v5576_v3, %v5587_v1  ;;  %v2768_v32 = vadd.f32 %v5596_v58, %v2744_v55 }
 0xa30   : > { %v2337_v15 = vadd.f32 %v2331_v12, %v2313_v62  ;;  %v2745_v2 = vadd.f32 %v2739_v50, %v2721_v25  ;;  %v2763_v3 = vsel %vm590_vm1, %v5596_v58, %v5594_v61 }
 0xa31   : > { %v2792_v1 = vadd.f32 %v5603_v38, %v2768_v32 }
 0xa32   : > { %v5634_v46 = vpop.permute.xlu0 %2807  ;;  %v5636_v57 = vpop.permute.xlu1 %2805  ;;  %v2769_v21 = vadd.f32 %v2763_v3, %v2745_v2  ;;  %v6547_v2 = vld [vmem:[#allocation33_spill] sm:$0xff] }
 0xa33   : > { %v2816_v14 = vadd.f32 %v5636_v57, %v2792_v1  ;;  %v2811_v38 = vsel %vm590_vm1, %v5636_v57, %v5634_v46  ;;  %v6548_v1 = vmov 3  }
 0xa34   : > { %v2793_v35 = vadd.f32 %v2787_v54, %v2769_v21 }
 0xa36   : > { %v5644_v31 = vpop.permute.xlu0 %2348  ;;  %v5646_v41 = vpop.permute.xlu1 %2809  ;;  %v2817_v57 = vadd.f32 %v2811_v38, %v2793_v35  ;;  %v6551_v38 = vld [vmem:[#allocation47_spill] sm:$0xff]  ;;  %v6552_v35 = vld [vmem:[#allocation45_spill] sm:$0xff] }
 0xa37   : > { %v2359_v26 = vadd.f32 %v5644_v31, %v2335_v39  ;;  %v2336_v39 = vadd.f32 %v2330_v24, %v2312_v33  ;;  %v2812_v61 = vsel %vm590_vm1, %v5634_v46, %v5646_v41 }
 0xa3a   : > { %v2353_v0 = vpop.permute.xlu0 %2352  ;;  %v2351_v23 = vpop.permute.xlu1 %2350 }
 0xa3b   : > { %v2354_v30 = vsel %vm590_vm1, %v5644_v31, %v2351_v23  ;;  %v2355_v7 = vsel %vm590_vm1, %v2351_v23, %v2353_v0  ;;  %v2746_v0 = vadd.f32 %v2740_v18, %v2722_v60 }
 0xa3c   : > { %v2360_v20 = vadd.f32 %v2354_v30, %v2336_v39  ;;  %v2361_v28 = vadd.f32 %v2355_v7, %v2337_v15 }
 0xa3e   : > { %v5661_v49 = vpop.permute.xlu0 %2831  ;;  %v5663_v53 = vpop.permute.xlu1 %2829 }
 0xa3f   : > { %v2840_v47 = vadd.f32 %v5663_v53, %v2816_v14  ;;  %v2835_v12 = vsel %vm590_vm1, %v5663_v53, %v5661_v49 }
 0xa40   : > { %v2841_v55 = vadd.f32 %v2835_v12, %v2817_v57  ;;  %v1330_v57 = vmul.f32 %v4648_v59, %v6551_v38  ;;  %v6561_v59 = vld [vmem:[#allocation30_spill] sm:$0xff] }
 0xa42   : > { %v2373_v6 = vpop.permute.xlu0 %2372  ;;  %v5674_v11 = vpop.permute.xlu1 %2833 }
 0xa43   : > { %v2383_v42 = vadd.f32 %v2373_v6, %v2359_v26  ;;  %v2836_v52 = vsel %vm590_vm1, %v5661_v49, %v5674_v11 }
 0xa46   : > { %v2377_v22 = vpop.permute.xlu0 %2376  ;;  %v2375_v56 = vpop.permute.xlu1 %2374 }
 0xa47   : > { %v2378_v63 = vsel %vm590_vm1, %v2373_v6, %v2375_v56  ;;  %v2379_v31 = vsel %vm590_vm1, %v2375_v56, %v2377_v22  ;;  %v2770_v6 = vadd.f32 %v2764_v17, %v2746_v0  ;;  %v6544_v17 = vld [vmem:[#allocation11_spill] sm:$0xff]  ;;  %v6546_v0 = vld [vmem:[#allocation12_spill] sm:$0xff] }
 0xa48   : > { %v2384_v22 = vadd.f32 %v2378_v63, %v2360_v20  ;;  %v2385_v56 = vadd.f32 %v2379_v31, %v2361_v28  ;;  %v6545_v31 = vmov 2   ;;  %v3070_v3 = vrot.slane %v6544_v17, %v6547_v2 }
 0xa49   : > { %v2794_v8 = vadd.f32 %v2788_v48, %v2770_v6  ;;  %v3074_v6 = vrot.slane %v6546_v0, %v6547_v2  ;;  %v3101_v14 = vrot.slane %v6546_v0, %v6430_v44 }
 0xa4a   : > { %v2856_v43 = vpop.permute.xlu0 %2855  ;;  %v2854_v16 = vpop.permute.xlu1 %2853 }
 0xa4b   : > { %v2818_v41 = vadd.f32 %v2812_v61, %v2794_v8  ;;  %v2864_v26 = vadd.f32 %v2854_v16, %v2840_v47  ;;  %v2859_v25 = vsel %vm590_vm1, %v2854_v16, %v2856_v43  ;;  %v1332_v47 = vmul.f32 %v4973_v37, %v6551_v38  ;;  %v6555_v37 = vld [vmem:[#allocation62_spill] sm:$0xff] }
 0xa4c   : > { %v2865_v49 = vadd.f32 %v2859_v25, %v2841_v55  ;;  %v1331_v25 = vmul.f32 %v6555_v37, %v6551_v38  ;;  %v6557_v55 = vld [vmem:[#allocation25_spill] sm:$0xff]  ;;  %v6581_v37 = vld [vmem:[#allocation67_spill] sm:$0xff] }
 0xa4d   : > { %v2842_v62 = vadd.f32 %v2836_v52, %v2818_v41  ;;  %v1354_v41 = vmul.f32 %v4982_v27, %v6552_v35 }
 0xa4e   : > { %v2397_v13 = vpop.permute.xlu0 %2396  ;;  %v2858_v10 = vpop.permute.xlu1 %2857 }
 0xa4f   : > { %v2407_v23 = vadd.f32 %v2397_v13, %v2383_v42  ;;  %v2860_v46 = vsel %vm590_vm1, %v2856_v43, %v2858_v10  ;;  %v6543_v10 = vld [vmem:[#allocation10_spill] sm:$0xff] }
 0xa50   : > { %v2866_v60 = vadd.f32 %v2860_v46, %v2842_v62  ;;  %v3043_v63 = vrot.slane %v6544_v17, %v6543_v10  ;;  %v3047_v20 = vrot.slane %v6546_v0, %v6543_v10 }
 0xa51   : > { %2413 = vrot.lane.b32.xlu1 %v2407_v23, %s3651_s27 }
 0xa52   : > { %v2401_v4 = vpop.permute.xlu0 %2400  ;;  %v2399_v5 = vpop.permute.xlu1 %2398 }
 0xa53   : > { %v2402_v58 = vsel %vm590_vm1, %v2397_v13, %v2399_v5  ;;  %v2403_v34 = vsel %vm590_vm1, %v2399_v5, %v2401_v4  ;;  %v2940_v13 = vld [vmem:[%s6065_s8] sm:$0xff] }
 0xa54   : > { %v2408_v51 = vadd.f32 %v2402_v58, %v2384_v22  ;;  %v2409_v19 = vadd.f32 %v2403_v34, %v2385_v56  ;;  %v3097_v22 = vrot.slane %v6544_v17, %v6430_v44  ;;  %v6549_v56 = vld [vmem:[#allocation36_spill] sm:$0xff] }
 0xa55   : > { %v3124_v4 = vrot.slane %v6544_v17, %v6549_v56  ;;  %v3128_v8 = vrot.slane %v6546_v0, %v6549_v56  ;;  %v6550_v44 = vld [vmem:[#allocation44_spill] sm:$0xff] }
 0xa56   : > { %v2880_v33 = vpop.permute.xlu0 %2879  ;;  %2417 = vrot.lane.b32.xlu0 %v2409_v19, %s3651_s27  ;;  %2415 = vrot.lane.b32.xlu1 %v2408_v51, %s3651_s27  ;;  %v2878_v24 = vpop.permute.xlu1 %2877  ;;  %v1310_v19 = vmul.f32 %v4959_v9, %v6550_v44  ;;  %v1308_v46 = vmul.f32 %v4639_v40, %v6550_v44  ;;  %v6554_v9 = vld [vmem:[#allocation61_spill] sm:$0xff]  ;;  %v6560_v40 = vld [vmem:[#allocation27_spill] sm:$0xff] }
 0xa57   : > { %v2888_v11 = vadd.f32 %v2878_v24, %v2864_v26  ;;  %v2883_v7 = vsel %vm590_vm1, %v2878_v24, %v2880_v33  ;;  %v6553_v24 = vld [vmem:[#allocation13_spill] sm:$0xff]  ;;  %v1309_v62 = vmul.f32 %v6554_v9, %v6550_v44  ;;  %v6575_v44 = vld [vmem:[#allocation38_spill] sm:$0xff] }
 0xa58   : > { %v2889_v32 = vadd.f32 %v2883_v7, %v2865_v49  ;;  %v1335_v52 = vadd.f32 %v1332_v47, %v1310_v19  ;;  %v1376_v12 = vmul.f32 %v4991_v45, %v6553_v24 }
 0xa59   : > { %v1334_v7 = vadd.f32 %v1331_v25, %v1309_v62  ;;  %v6582_v25 = vld [vmem:[#allocation42_spill] sm:$0xff] }
 0xa5a   : > { %v2912_v18 = vpop.permute.xlu0 %2911  ;;  %2949 = vperm.xlu1 %3497, %v5497_v29   ;;  %v2882_v30 = vpop.permute.xlu1 %2881 }
 0xa5b   : > { %v2919_v42 = vmul.f32 %v2912_v18, %v2888_v11  ;;  %v2884_v50 = vsel %vm590_vm1, %v2880_v33, %v2882_v30  ;;  %v1357_v33 = vadd.f32 %v1354_v41, %v1335_v52  ;;  %v6556_v11 = vld [vmem:[#allocation48_spill] sm:$0xff]  ;;  %v1333_v30 = vadd.f32 %v1330_v57, %v1308_v46  ;;  %v6576_v52 = vld [vmem:[#allocation82_spill] sm:$0xff] }
 0xa5c   : > { %v2890_v53 = vadd.f32 %v2884_v50, %v2866_v60  ;;  %v1398_v27 = vmul.f32 %v6557_v55, %v6556_v11  ;;  %v6558_v60 = vld [vmem:[#allocation21_spill] sm:$0xff]  ;;  %v6577_v41 = vld [vmem:[#allocation24_spill] sm:$0xff]  ;;  %v6583_v55 = vld [vmem:[#allocation87_spill] sm:$0xff] }
 0xa5d   : > { %2925 = vrot.lane.b32.xlu0 %v2919_v42, %s3652_s29  ;;  %v1379_v26 = vadd.f32 %v1376_v12, %v1357_v33  ;;  %v6559_v42 = vld [vmem:[#allocation49_spill] sm:$0xff]  ;;  %v6580_v46 = vld [vmem:[#allocation84_spill] sm:$0xff] }
 0xa5e   : > { %v2914_v39 = vpop.permute.xlu1 %2913  ;;  %v1420_v50 = vmul.f32 %v6560_v40, %v6559_v42  ;;  %v6579_v12 = vld [vmem:[#allocation29_spill] sm:$0xff] }
 0xa5f   : > { %v2915_v43 = vsel %vm1229_vm2, %v2912_v18, %v2914_v39  ;;  %v2921_v16 = vmul.f32 %v2914_v39, %v2890_v53  ;;  %v1352_v18 = vmul.f32 %v6558_v60, %v6552_v35  ;;  %v1401_v45 = vadd.f32 %v1398_v27, %v1379_v26 }
 0xa60   : > { %v2920_v15 = vmul.f32 %v2915_v43, %v2889_v32  ;;  %v1374_v53 = vmul.f32 %v6561_v59, %v6553_v24  ;;  %v6562_v32 = vld [vmem:[#allocation63_spill] sm:$0xff] }
 0xa61   : > { %2929 = vrot.lane.b32.xlu0 %v2921_v16, %s3652_s29  ;;  %v1355_v49 = vadd.f32 %v1352_v18, %v1333_v30  ;;  %v1353_v39 = vmul.f32 %v6562_v32, %v6552_v35  ;;  %v1423_v43 = vadd.f32 %v1420_v50, %v1401_v45  ;;  %v6584_v18 = vld [vmem:[#allocation51_spill] sm:$0xff]  ;;  %v6585_v30 = vld [vmem:[#allocation68_spill] sm:$0xff]  ;;  %v6587_v50 = vld [vmem:[#allocation89_spill] sm:$0xff] }
 0xa62   : > { %2927 = vrot.lane.b32.xlu1 %v2920_v15, %s3652_s29  ;;  %v6563_v15 = vld [vmem:[#allocation14_spill] sm:$0xff]  ;;  %s3259_s29 = sshll.u32 %s3762_s13, 8 }
 0xa63   : > { %v1356_v16 = vadd.f32 %v1353_v39, %v1334_v7  ;;  %v1377_v17 = vadd.f32 %v1374_v53, %v1355_v49  ;;  %v1441_v33 = vmul.f32 %v6577_v41, %v6563_v15  ;;  %v6586_v7 = vld [vmem:[#allocation18_spill] sm:$0xff]  ;;  %v6589_v39 = vld [vmem:[#allocation19_spill] sm:$0xff]  ;;  %s6011_s17 = scalar_lea.hbm %s6066_s9, %s3259_s29 }
 0xa64   : > { %v6588_v32 = vld [vmem:[#allocation70_spill] sm:$0xff] }
 0xa65   : > { %2971 = vperm.xlu0 %3498, %v5497_v29  }
 0xa66   : > { %2943 = vperm.xlu1 %3497, %v2940_v13   ;;  %v6564_v13 = vld [vmem:[#allocation28_spill] sm:$0xff] }
 0xa67   : > { %v1442_v10 = vmul.f32 %v6564_v13, %v6563_v15 }
 0xa69   : > { %3501 = vset.pattern.permute.xlu0 %v6510_v36 }
 0xa6a   : > { %3499 = vset.pattern.permute.xlu1 %v6545_v31 }
 0xa6b   : > { %2993 = vperm.xlu1 %3499, %v5497_v29   ;;  %v3038_v23 = vpop.permute.xlu0 %3037 }
 0xa6c   : > { %v3048_v28 = vmul.f32 %v3043_v63, %v3038_v23  ;;  %v3049_v36 = vmul.f32 %v3047_v20, %v3038_v23  ;;  %v6565_v63 = vld [vmem:[#allocation23_spill] sm:$0xff]  ;;  %v6566_v23 = vld [vmem:[#allocation64_spill] sm:$0xff]  ;;  %v1445_v20 = vadd.f32 %v1442_v10, %v1423_v43  ;;  %v1556_v43 = vsel %vm478_vm0, %v6589_v39, %v6588_v32 }
 0xa6d   : > { %v1396_v31 = vmul.f32 %v6565_v63, %v6556_v11  ;;  %v1375_v0 = vmul.f32 %v6566_v23, %v6553_v24  ;;  %v6578_v24 = vld [vmem:[#allocation66_spill] sm:$0xff]  ;;  %v6591_v63 = vld [vmem:[#allocation72_spill] sm:$0xff] }
 0xa6e   : > { %3052 = vrot.lane.b32.xlu0 %v3048_v28, %s3615_s23  ;;  %v6567_v28 = vld [vmem:[#allocation35_spill] sm:$0xff]  ;;  %v1484_v26 = vsel %vm478_vm0, %v6579_v12, %v6578_v24 }
 0xa6f   : > { %3500 = vset.pattern.permute.xlu1 %v6548_v1  ;;  %v3065_v48 = vpop.permute.xlu1 %3064  ;;  %v1418_v2 = vmul.f32 %v6567_v28, %v6559_v42  ;;  %v6568_v1 = vld [vmem:[#allocation50_spill] sm:$0xff] }
 0xa70   : > { %3015 = vperm.xlu1 %3500, %v5497_v29   ;;  %v3075_v54 = vmul.f32 %v3070_v3, %v3065_v48  ;;  %v3076_v5 = vmul.f32 %v3074_v6, %v3065_v48  ;;  %v3119_v61 = vpop.permute.xlu0 %3118  ;;  %v1378_v3 = vadd.f32 %v1375_v0, %v1356_v16  ;;  %v6569_v48 = vld [vmem:[#allocation40_spill] sm:$0xff]  ;;  %v1399_v6 = vadd.f32 %v1396_v31, %v1377_v17 }
 0xa71   : > { %v3129_v34 = vmul.f32 %v3124_v4, %v3119_v61  ;;  %v3130_v51 = vmul.f32 %v3128_v8, %v3119_v61  ;;  %v6571_v4 = vld [vmem:[#allocation26_spill] sm:$0xff]  ;;  %v6572_v61 = vld [vmem:[#allocation77_spill] sm:$0xff]  ;;  %v6574_v8 = vld [vmem:[#allocation79_spill] sm:$0xff]  ;;  %v1462_v19 = vmul.f32 %v6575_v44, %v6568_v1  ;;  %v1463_v45 = vmul.f32 %v6584_v18, %v6568_v1 }
 0xa72   : > { %3079 = vrot.lane.b32.xlu0 %v3075_v54, %s3615_s23  ;;  %v6570_v54 = vld [vmem:[#allocation31_spill] sm:$0xff]  ;;  %v1485_v40 = vsel %vm478_vm0, %v6578_v24, %v6572_v61  ;;  %v1509_v16 = vsel %vm478_vm0, %v6581_v37, %v6574_v8  ;;  %v6592_v31 = vld [vmem:[#allocation20_spill] sm:$0xff]  ;;  %v1533_v0 = vsel %vm478_vm0, %v6585_v30, %v6576_v52  ;;  %v6601_v44 = vld [vmem:[#allocation34_spill] sm:$0xff] }
 0xa73   : > { %v1580_v23 = vsel %vm478_vm0, %v6592_v31, %v6591_v63 }
 0xa74   : > { %3054 = vrot.lane.b32.xlu1 %v3049_v36, %s3615_s23  ;;  %v3092_v29 = vpop.permute.xlu1 %3091  ;;  %v1464_v36 = vmul.f32 %v6569_v48, %v6568_v1  ;;  %v6594_v1 = vld [vmem:[#allocation74_spill] sm:$0xff] }
 0xa75   : > { %v3102_v58 = vmul.f32 %v3097_v22, %v3092_v29  ;;  %v3103_v21 = vmul.f32 %v3101_v14, %v3092_v29  ;;  %v1397_v22 = vmul.f32 %v6570_v54, %v6556_v11  ;;  %v1421_v14 = vadd.f32 %v1418_v2, %v1399_v6  ;;  %v6595_v48 = vld [vmem:[#allocation22_spill] sm:$0xff] }
 0xa76   : > { %v1467_v56 = vadd.f32 %v1464_v36, %v1445_v20  ;;  %v1508_v11 = vsel %vm478_vm0, %v6582_v25, %v6581_v37  ;;  %v6593_v20 = vld [vmem:[#allocation93_spill] sm:$0xff]  ;;  %v1604_v36 = vsel %vm478_vm0, %v6595_v48, %v6594_v1  ;;  %v1557_v6 = vsel %vm478_vm0, %v6588_v32, %v6580_v46 }
 0xa77   : > { %3106 = vrot.lane.b32.xlu0 %v3102_v58, %s3615_s23  ;;  %v1400_v29 = vadd.f32 %v1397_v22, %v1378_v3  ;;  %v6596_v22 = vld [vmem:[#allocation37_spill] sm:$0xff] }
 0xa78   : > { %3081 = vrot.lane.b32.xlu1 %v3076_v5, %s3615_s23  ;;  %v1440_v5 = vmul.f32 %v6571_v4, %v6563_v15  ;;  %v1491_v58 = vadd.f32 %v6572_v61, %v1467_v56  ;;  %v6590_v15 = vld [vmem:[#allocation92_spill] sm:$0xff] }
 0xa79   : > { %v6597_v56 = vld [vmem:[#allocation80_spill] sm:$0xff] }
 0xa7a   : > { %v1443_v38 = vadd.f32 %v1440_v5, %v1421_v14  ;;  %v1692_v4 = vsel %vm590_vm1, %v6597_v56, %v6596_v22  ;;  %v6598_v14 = vld [vmem:[#allocation76_spill] sm:$0xff] }
 0xa7b   : > { %3133 = vrot.lane.b32.xlu0 %v3129_v34, %s3615_s23  ;;  %v6573_v34 = vld [vmem:[#allocation65_spill] sm:$0xff]  ;;  %v1629_v24 = vsel %vm478_vm0, %v6598_v14, %v6590_v15 }
 0xa7c   : > { %3108 = vrot.lane.b32.xlu1 %v3103_v21, %s3615_s23  ;;  %v1419_v21 = vmul.f32 %v6573_v34, %v6559_v42  ;;  %v1465_v9 = vadd.f32 %v1462_v19, %v1443_v38  ;;  %v1532_v42 = vsel %vm478_vm0, %v6586_v7, %v6585_v30  ;;  %v1605_v38 = vsel %vm478_vm0, %v6594_v1, %v6587_v50 }
 0xa7e   : > { %v1422_v47 = vadd.f32 %v1419_v21, %v1400_v29  ;;  %v1489_v60 = vadd.f32 %v1484_v26, %v1465_v9  ;;  %v6599_v29 = vld [vmem:[#allocation32_spill] sm:$0xff]  ;;  %v6604_v9 = vld [vmem:[#allocation43_spill] sm:$0xff] }
 0xa7f   : > { %v1628_v61 = vsel %vm478_vm0, %v6599_v29, %v6598_v14  ;;  %v6619_v29 = vld [vmem:[#allocation90_spill] sm:$0xff] }
 0xa80   : > { %3135 = vrot.lane.b32.xlu1 %v3130_v51, %s3615_s23  ;;  %v1515_v51 = vadd.f32 %v6574_v8, %v1491_v58  ;;  %v1444_v62 = vadd.f32 %v1441_v33, %v1422_v47  ;;  %v1513_v59 = vadd.f32 %v1508_v11, %v1489_v60  ;;  %v1581_v58 = vsel %vm478_vm0, %v6591_v63, %v6583_v55  ;;  %v6606_v11 = vld [vmem:[#allocation95_spill] sm:$0xff]  ;;  %s348_s23 = scalar_lea.vmem [#allocation6], %s3251_s26  ;;  %s3160_s26 = scalar_lea.sflag [#allocation5], %s3846_s24 }
 0xa81   : > { %v1691_v60 = vsel %vm590_vm1, %v6606_v11, %v6597_v56  ;;  %s3174_s27 = sshll.u32 %s348_s23, 4  ;;  %s6013_s27 = int_to_ptr.vmem [resolvable:$true] %s3174_s27 }
 0xa82   : > { %v1539_v35 = vadd.f32 %v6576_v52, %v1515_v51  ;;  %v1466_v53 = vadd.f32 %v1463_v45, %v1444_v62  ;;  %v1537_v10 = vadd.f32 %v1532_v42, %v1513_v59  ;;  %v6600_v51 = vld [vmem:[#allocation78_spill] sm:$0xff]  ;;  %v6602_v52 = vld [vmem:[#allocation39_spill] sm:$0xff]  ;;  %v6607_v45 = vld [vmem:[#allocation97_spill] sm:$0xff]  ;;  %s3541_s13 = scalar_lea.vmem %s6013_s27, 256 }
 0xa83   : > { %v1652_v19 = vsel %vm478_vm0, %v6601_v44, %v6600_v51  ;;  %v6605_v62 = vld [vmem:[#allocation83_spill] sm:$0xff]  ;;  %v6608_v42 = vld [vmem:[#allocation52_spill] sm:$0xff]  ;;  %p3542_p6 = scmp.ne.s32.totalorder %s6013_s27, %s3541_s13 }
 0xa84   : > { %v1563_v57 = vadd.f32 %v6580_v46, %v1539_v35  ;;  %v1490_v17 = vadd.f32 %v1485_v40, %v1466_v53  ;;  %v1561_v2 = vadd.f32 %v1556_v43, %v1537_v10  ;;  %v6603_v35 = vld [vmem:[#allocation81_spill] sm:$0xff]  ;;  %v1764_v37 = vsel %vm590_vm1, %v6605_v62, %v6604_v9  ;;  %v6610_v59 = vld [vmem:[#allocation100_spill] sm:$0xff]  ;;  %v6625_v9 = vld [vmem:[#allocation59_spill] sm:$0xff] }
 0xa85   : > { %v1728_v41 = vsel %vm590_vm1, %v6603_v35, %v6602_v52  ;;  %v1727_v7 = vsel %vm590_vm1, %v6607_v45, %v6603_v35  ;;  %v6609_v40 = vld [vmem:[#allocation85_spill] sm:$0xff]  ;;  %v1763_v39 = vsel %vm590_vm1, %v6610_v59, %v6605_v62  ;;  %v6622_v44 = vld [vmem:[#allocation56_spill] sm:$0xff]  ;;  %p3543_p12 = pnand %p3542_p6, %p6631_p11 }
 0xa86   : > { %v1587_v27 = vadd.f32 %v6583_v55, %v1563_v57  ;;  %v1514_v3 = vadd.f32 %v1509_v16, %v1490_v17  ;;  %v1585_v54 = vadd.f32 %v1580_v23, %v1561_v2  ;;  %v1653_v57 = vsel %vm478_vm0, %v6600_v51, %v6593_v20  ;;  %v6611_v16 = vld [vmem:[#allocation102_spill] sm:$0xff]  ;;  %v6612_v10 = vld [vmem:[#allocation53_spill] sm:$0xff] }
 0xa87   : > { %v6613_v17 = vld [vmem:[#allocation86_spill] sm:$0xff]  ;;  %v6614_v23 = vld [vmem:[#allocation105_spill] sm:$0xff]  ;;  %p3544_p13 = pneg %p3543_p12 }
 0xa88   : > { %v1611_v49 = vadd.f32 %v6587_v50, %v1587_v27  ;;  %v1538_v5 = vadd.f32 %v1533_v0, %v1514_v3  ;;  %v1609_v21 = vadd.f32 %v1604_v36, %v1585_v54  ;;  %v1800_v50 = vsel %vm590_vm1, %v6609_v40, %v6608_v42  ;;  %v6615_v3 = vld [vmem:[#allocation107_spill] sm:$0xff]  ;;  %v6616_v36 = vld [vmem:[#allocation88_spill] sm:$0xff]  ;;  %v6617_v54 = vld [vmem:[#allocation54_spill] sm:$0xff] }
 0xa89   : > { %v1836_v63 = vsel %vm590_vm1, %v6613_v17, %v6612_v10  ;;  %v1872_v22 = vsel %vm590_vm1, %v6616_v36, %v6617_v54 }
 0xa8a   : > { %v1635_v13 = vadd.f32 %v6590_v15, %v1611_v49  ;;  %v1562_v8 = vadd.f32 %v1557_v6, %v1538_v5  ;;  %v1633_v47 = vadd.f32 %v1628_v61, %v1609_v21  ;;  %v1871_v6 = vsel %vm590_vm1, %v6615_v3, %v6616_v36 }
 0xa8c   : > { %v1659_v28 = vadd.f32 %v6593_v20, %v1635_v13  ;;  %v1586_v33 = vadd.f32 %v1581_v58, %v1562_v8  ;;  %v1657_v26 = vadd.f32 %v1652_v19, %v1633_v47  ;;  %v1799_v13 = vsel %vm590_vm1, %v6611_v16, %v6609_v40  ;;  %v6621_v8 = vld [vmem:[#allocation91_spill] sm:$0xff] }
 0xa8d   : > { %v1908_v19 = vsel %vm590_vm1, %v6619_v29, %v6622_v44 }
 0xa8e   : > { %v1698_v34 = vadd.f32 %v1692_v4, %v1659_v28  ;;  %v1610_v46 = vadd.f32 %v1605_v38, %v1586_v33  ;;  %v1696_v55 = vadd.f32 %v6606_v11, %v1657_v26  ;;  %v1835_v28 = vsel %vm590_vm1, %v6614_v23, %v6613_v17  ;;  %v6618_v4 = vld [vmem:[#allocation110_spill] sm:$0xff]  ;;  %v6623_v33 = vld [vmem:[#allocation41_spill] sm:$0xff] }
 0xa8f   : > { %v1907_v61 = vsel %vm590_vm1, %v6618_v4, %v6619_v29  ;;  %v1976_v62 = vsel %vm732_vm3, %v6623_v33, %v6625_v9 }
 0xa90   : > { %v1734_v12 = vadd.f32 %v1728_v41, %v1698_v34  ;;  %v1634_v25 = vadd.f32 %v1629_v24, %v1610_v46  ;;  %v1732_v30 = vadd.f32 %v6607_v45, %v1696_v55  ;;  %v6620_v34 = vld [vmem:[#allocation112_spill] sm:$0xff]  ;;  %v6626_v55 = vld [vmem:[#allocation46_spill] sm:$0xff] }
 0xa91   : > { %v1943_v51 = vsel %vm590_vm1, %v6620_v34, %v6621_v8 }
 0xa92   : > { %v1770_v27 = vadd.f32 %v1764_v37, %v1734_v12  ;;  %v1658_v18 = vadd.f32 %v1653_v57, %v1634_v25  ;;  %v1768_v53 = vadd.f32 %v6610_v59, %v1732_v30  ;;  %v6624_v12 = vld [vmem:[#allocation58_spill] sm:$0xff] }
 0xa93   : > { %v1944_v26 = vsel %vm590_vm1, %v6621_v8, %v6624_v12 }
 0xa94   : > { %v1697_v49 = vadd.f32 %v1691_v60, %v1658_v18  ;;  %v1806_v32 = vadd.f32 %v1800_v50, %v1770_v27  ;;  %v1804_v15 = vadd.f32 %v6611_v16, %v1768_v53 }
 0xa96   : > { %v1733_v43 = vadd.f32 %v1727_v7, %v1697_v49  ;;  %v1840_v0 = vadd.f32 %v6614_v23, %v1804_v15  ;;  %v1842_v20 = vadd.f32 %v1836_v63, %v1806_v32  ;;  %v6627_v32 = vld [vmem:[#allocation9_spill] sm:$0xff] }
 0xa98   : > { %v1769_v31 = vadd.f32 %v1763_v39, %v1733_v43  ;;  %v1876_v1 = vadd.f32 %v6615_v3, %v1840_v0  ;;  %v1878_v14 = vadd.f32 %v1872_v22, %v1842_v20  ;;  %v6629_v3 = vld [vmem:[#allocation16_spill] sm:$0xff] }
 0xa9a   : > { %v1805_v2 = vadd.f32 %v1799_v13, %v1769_v31  ;;  %v1912_v5 = vadd.f32 %v6618_v4, %v1876_v1  ;;  %v1914_v35 = vadd.f32 %v1908_v19, %v1878_v14  ;;  %v6628_v31 = vld [vmem:[#allocation15_spill] sm:$0xff] }
 0xa9c   : > { %v1841_v56 = vadd.f32 %v1835_v28, %v1805_v2  ;;  %v1948_v21 = vadd.f32 %v6620_v34, %v1912_v5  ;;  %v1950_v37 = vadd.f32 %v1944_v26, %v1914_v35 }
 0xa9e   : > { %v1877_v58 = vadd.f32 %v1871_v6, %v1841_v56  ;;  %v1980_v24 = vmul.f32 %v6623_v33, %v1948_v21  ;;  %v1982_v45 = vmul.f32 %v6625_v9, %v1950_v37 }
 0xaa0   : > { %v1913_v38 = vadd.f32 %v1907_v61, %v1877_v58  ;;  %v1983_v27 = vadd.f32 %v1980_v24, %v6626_v55  ;;  %v1985_v53 = vadd.f32 %v1982_v45, %v6626_v55  ;;  %v6630_v58 = vld [vmem:[#allocation17_spill] sm:$0xff] }
 0xaa2   : > { %v1949_v41 = vadd.f32 %v1943_v51, %v1913_v38 }
 0xaa4   : > { %v1981_v11 = vmul.f32 %v1976_v62, %v1949_v41 }
 0xaa6   : > { %v1984_v42 = vadd.f32 %v1981_v11, %v6626_v55 }
 0xac3   : > { %v2414_v48 = vpop.permute.xlu1 %2413 }
 0xac8   : > { %v2418_v47 = vpop.permute.xlu0 %2417  ;;  %v2416_v52 = vpop.permute.xlu1 %2415 }
 0xac9   : > { %v2419_v25 = vsel %vm964_vm4, %v2414_v48, %v2416_v52  ;;  %v2420_v30 = vsel %vm964_vm4, %v2416_v52, %v2418_v47  ;;  %v2426_v16 = vadd.f32 %v2418_v47, %v1985_v53 }
 0xaca   : > { %v2424_v60 = vadd.f32 %v2419_v25, %v1983_v27  ;;  %v2425_v59 = vadd.f32 %v2420_v30, %v1984_v42 }
 0xacf   : > { %v2926_v46 = vpop.permute.xlu0 %2925 }
 0xad3   : > { %v2930_v40 = vpop.permute.xlu0 %2929 }
 0xad4   : > { %v2938_v10 = vadd.f32 %v2930_v40, %v2426_v16 }
 0xad6   : > { %v2963_v20 = vrot.slane %v2938_v10, %v6627_v32  ;;  %v2985_v54 = vrot.slane %v2938_v10, %v6628_v31  ;;  %v3007_v5 = vrot.slane %v2938_v10, %v6629_v3  ;;  %v3029_v47 = vrot.slane %v2938_v10, %v6630_v58 }
 0xad9   : > { %v2950_v57 = vpop.permute.xlu1 %2949 }
 0xada   : > { %v2966_v6 = vmul.f32 %v2963_v20, %v2950_v57 }
 0xadd   : > { %v2928_v18 = vpop.permute.xlu1 %2927 }
 0xade   : > { %v2931_v7 = vsel %vm1246_vm5, %v2926_v46, %v2928_v18  ;;  %v2932_v49 = vsel %vm1246_vm5, %v2928_v18, %v2930_v40 }
 0xadf   : > { %v2936_v50 = vadd.f32 %v2931_v7, %v2424_v60  ;;  %v2937_v43 = vadd.f32 %v2932_v49, %v2425_v59 }
 0xae1   : > { %v2955_v39 = vrot.slane %v2936_v50, %v6627_v32  ;;  %v2959_v63 = vrot.slane %v2937_v43, %v6627_v32  ;;  %v2977_v23 = vrot.slane %v2936_v50, %v6628_v31  ;;  %v2999_v1 = vrot.slane %v2936_v50, %v6629_v3 }
 0xae2   : > { %v2981_v4 = vrot.slane %v2937_v43, %v6628_v31  ;;  %v3021_v34 = vrot.slane %v2936_v50, %v6630_v58  ;;  %v3003_v51 = vrot.slane %v2937_v43, %v6629_v3  ;;  %v3025_v41 = vrot.slane %v2937_v43, %v6630_v58 }
 0xae3   : > { %v2964_v17 = vmul.f32 %v2955_v39, %v2950_v57  ;;  %v2965_v36 = vmul.f32 %v2959_v63, %v2950_v57 }
 0xae4   : > { %v2972_v15 = vpop.permute.xlu0 %2971 }
 0xae5   : > { %v2944_v13 = vpop.permute.xlu1 %2943  ;;  %v2986_v28 = vmul.f32 %v2977_v23, %v2972_v15  ;;  %v2988_v14 = vmul.f32 %v2985_v54, %v2972_v15  ;;  %v2987_v21 = vmul.f32 %v2981_v4, %v2972_v15 }
 0xae6   : > { %v2967_v2 = vadd.f32 %v2964_v17, %v2944_v13  ;;  %v2969_v29 = vadd.f32 %v2966_v6, %v2944_v13  ;;  %v2968_v8 = vadd.f32 %v2965_v36, %v2944_v13 }
 0xae8   : > { %v3053_v0 = vpop.permute.xlu0 %3052  ;;  %v2989_v61 = vadd.f32 %v2986_v28, %v2967_v2  ;;  %v2991_v24 = vadd.f32 %v2988_v14, %v2969_v29  ;;  %v2990_v46 = vadd.f32 %v2987_v21, %v2968_v8 }
 0xaea   : > { %v2994_v48 = vpop.permute.xlu1 %2993 }
 0xaeb   : > { %v3008_v22 = vmul.f32 %v2999_v1, %v2994_v48  ;;  %v3010_v19 = vmul.f32 %v3007_v5, %v2994_v48  ;;  %v3009_v35 = vmul.f32 %v3003_v51, %v2994_v48 }
 0xaec   : > { %v3080_v56 = vpop.permute.xlu0 %3079 }
 0xaed   : > { %v3011_v38 = vadd.f32 %v3008_v22, %v2989_v61  ;;  %v3013_v62 = vadd.f32 %v3010_v19, %v2991_v24  ;;  %v3012_v25 = vadd.f32 %v3009_v35, %v2990_v46 }
 0xaef   : > { %v3016_v44 = vpop.permute.xlu1 %3015 }
 0xaf0   : > { %v3030_v52 = vmul.f32 %v3021_v34, %v3016_v44  ;;  %v3107_v33 = vpop.permute.xlu0 %3106  ;;  %v3032_v12 = vmul.f32 %v3029_v47, %v3016_v44  ;;  %v3031_v57 = vmul.f32 %v3025_v41, %v3016_v44 }
 0xaf2   : > { %v3033_v26 = vadd.f32 %v3030_v52, %v3011_v38  ;;  %v3035_v55 = vadd.f32 %v3032_v12, %v3013_v62  ;;  %v3034_v27 = vadd.f32 %v3031_v57, %v3012_v25 }
 0xaf3   : > { %v3055_v9 = vpop.permute.xlu1 %3054 }
 0xaf4   : > { %v3060_v37 = vadd.f32 %v3053_v0, %v3033_v26  ;;  %v3134_v18 = vpop.permute.xlu0 %3133  ;;  %v3056_v45 = vsel %vm732_vm3, %v3053_v0, %v3055_v9  ;;  %v3062_v7 = vadd.f32 %v3055_v9, %v3035_v55 }
 0xaf5   : > { %v3061_v50 = vadd.f32 %v3056_v45, %v3034_v27 }
 0xaf6   : > { %v3087_v11 = vadd.f32 %v3080_v56, %v3060_v37 }
 0xaf7   : > { %v3082_v60 = vpop.permute.xlu1 %3081 }
 0xaf8   : > { %v3114_v30 = vadd.f32 %v3107_v33, %v3087_v11  ;;  %v3083_v42 = vsel %vm732_vm3, %v3080_v56, %v3082_v60  ;;  %v3089_v59 = vadd.f32 %v3082_v60, %v3062_v7 }
 0xaf9   : > { %v3088_v32 = vadd.f32 %v3083_v42, %v3061_v50 }
 0xafa   : > { %v3141_v40 = vadd.f32 %v3134_v18, %v3114_v30 }
 0xafb   : > { %v3109_v49 = vpop.permute.xlu1 %3108 }
 0xafc   : > { %v3110_v53 = vsel %vm732_vm3, %v3107_v33, %v3109_v49  ;;  %3147 = vrot.lane.b32.xlu0 %v3141_v40, %s3665_s20  ;;  %v3116_v39 = vadd.f32 %v3109_v49, %v3089_v59 }
 0xafd   : > { %v3115_v43 = vadd.f32 %v3110_v53, %v3088_v32 }
 0xaff   : > { %v3136_v16 = vpop.permute.xlu1 %3135 }
 0xb00   : > { %v3137_v15 = vsel %vm732_vm3, %v3134_v18, %v3136_v16  ;;  %v3143_v13 = vadd.f32 %v3136_v16, %v3116_v39 }
 0xb01   : > { %v3142_v10 = vadd.f32 %v3137_v15, %v3115_v43 }
 0xb02   : > { %3151 = vrot.lane.b32.xlu0 %v3143_v13, %s3665_s20 }
 0xb03   : > { %3149 = vrot.lane.b32.xlu1 %v3142_v10, %s3665_s20  ;;  %s3690_s20 = smov [#allocation6]  }
 0xb04   : > { %s3545_s28 = sshll.u32 %s3690_s20, 4  ;;  %s3546_s28 = int_to_ptr.vmem [resolvable:$false] %s3545_s28 }
 0xb05   : > { %s3547_s25 = scalar_lea.vmem %s3546_s28, 512  ;;  %p3548_p7 = scmp.lt.s32.totalorder %s6013_s27, %s3546_s28 }
 0xb06   : > { %p3549_p10 = scmp.lt.s32.totalorder %s3547_s25, %s3541_s13 }
 0xb08   : > { %p3550_p2 = por %p3549_p10, %p3548_p7 }
 0xb0a   : > { %p3551_p4 = pnand %p3550_p2, %p3544_p13 }
 0xb6e   : > { %v3148_v17 = vpop.permute.xlu0 %3147 }
 0xb74   : > { %v3152_v63 = vpop.permute.xlu0 %3151 }
 0xb75   : > { %v3150_v31 = vpop.permute.xlu1 %3149 }
 0xb76   : > { %v3153_v23 = vsel %vm1272_vm6, %v3148_v17, %v3150_v31  ;;  %v3154_v0 = vsel %vm1272_vm6, %v3150_v31, %v3152_v63 }
 0xb77   : > { %3157 = vst [vmem:[%s348_s23] sm:$0xff] %v3153_v23  ;;  %3158 = vst [vmem:[%s348_s23 + $0x8] sm:$0xff] %v3154_v0 }
 0xb78   : > { %3554 = shalt.err (!%p3551_p4)
}
 0xb79   : > { %s3555_s24 = scalar_lea.hbm %s6011_s17, 256  ;;  %s3559_s29 = scalar_lea.hbm %s6066_s9, 512 }
 0xb7a   : > { %p3556_p5 = scmp.ne.s32.totalorder %s6011_s17, %s3555_s24  ;;  %p3560_p0 = scmp.lt.u32.totalorder %s6011_s17, %s6066_s9 }
 0xb7b   : > { %p3561_p1 = scmp.lt.u32.totalorder %s3559_s29, %s3555_s24  ;;  %p3563_p6 = scmp.lt.u32.totalorder %s3555_s24, %s6011_s17 }
 0xb7c   : > { %p3557_p8 = pnand %p3556_p5, %p6631_p11 }
 0xb7d   : > { %p3562_p3 = por %p3561_p1, %p3560_p0 }
 0xb7e   : > { %p3558_p9 = pneg %p3557_p8 }
 0xb7f   : > { %p3564_p12 = por %p3563_p6, %p3562_p3 }
 0xb81   : > { %p3565_p13 = pnand %p3564_p12, %p3558_p9 }
 0xb83   : > { %3568 = shalt.err (!%p3565_p13)
}
 0xb84   : > { %3262 = dma.vmem_to_hbm [thread:$0]  (%p6631_p11), %s6013_s27, 256, %s6011_s17, %s3160_s26  }
 0xb85 PF: > { %s3186_s13 = sand.u32 1, %s3595_s30   ;;  %p6632_p7 = scmp.ne.s32.totalorder %s6264_s22, 0 }
 0xb86   : > { %p6633_p10 = scmp.ge.s32.totalorder %s3607_s12, 2  ;;  %s3187_s20 = scalar_lea.sflag [#allocation5], %s3186_s13 }
 0xb88   : > { %p3269_p2 = pnand %p6633_p10, %p6632_p7 }
 0xb8a   : > { %3590 = dma.done.wait (!%p3269_p2), %s3187_s20, 256  }
 0xb8b   : > { %3592 = vsyncadd (!%p3269_p2), %s3187_s20, 4294967040  ;;  %p22_p4 = scmp.ge.s32.totalorder %s3766_s15, 4   ;;  %s6634_s30 = smov %s3599_s10 }
 0xb8c   : > { %s6635_s10 = smov %s3603_s11  ;;  %s6636_s11 = smov %s3778_s18 }
 0xb8d   : > { %s6637_s12 = smov %s3766_s15  ;;  %24 = sbr.rel (!%p22_p4) target bundleno = 5 (0x5), region = 101 }
 0xb94   :  { %3192 = vsyncpa [#allocation4], 1 }
 0xb95   :  { %3194 = vsyncpa [#allocation4 + $0x1], 1 }
 0xb96   :  { %3195 = vsyncpa [#allocation5], 1 }
 0xb97   :  { %3197 = vsyncpa [#allocation5 + $0x1], 1 }

</bundles_post_ra>
